<compile_context>
chip_gen: v7x
topology: tpu7x:2x2x1
jax: 0.10.0
libtpu: 0.0.40
codegen_flags: <defaults>
</compile_context>

<pallas_src>
import functools

import jax
import jax.numpy as jnp
from jax.experimental import pallas as pl
from jax.experimental.pallas import tpu as pltpu

# ---- MoCo hyper-parameters (small, deterministic, synthetic) -----------------
DIM = 128            # feature dimension (MoCo default)
K_QUEUE = 512        # queue size (small stand-in for 65536; divisible by batch)
M_MOM = 0.999        # key-encoder momentum
TEMP = 0.07          # softmax temperature
HIDDEN = 128         # hidden width of the synthetic encoder MLP (full MXU tile)
N_PAD = 8            # batch rows padded to a full sublane group
LOGITS_PAD = 128 + K_QUEUE   # lanes 0..127: l_pos (broadcast), 128..: l_neg


# -----------------------------------------------------------------------------
# Fused MoCo forward kernel.
#   inputs : ptr (SMEM), xq, xk, encoder_q params, encoder_k params, queue (HBM)
#   outputs: padded logits, updated encoder_k params (aliased), queue (aliased)
# -----------------------------------------------------------------------------
def _moco_fused_kernel(
    ptr_ref,
    xq_ref, xk_ref,
    w1q_ref, b1q_ref, w2q_ref, b2q_ref,
    w1k_ref, b1k_ref, w2k_ref, b2k_ref,
    queue_hbm_ref,
    logits_ref,
    w1k_out_ref, b1k_out_ref, w2k_out_ref, b2k_out_ref,
    queue_out_ref,
    queue_vmem, kn_vmem, dma_sems,
    *, batch,
):
    # Start streaming the (pre-update) queue HBM -> VMEM; this DMA overlaps the
    # momentum update and the encoder matmuls below.
    queue_load = pltpu.make_async_copy(queue_hbm_ref, queue_vmem, dma_sems.at[0])
    queue_load.start()

    m = M_MOM
    one_m = 1.0 - M_MOM
    inv_t = 1.0 / TEMP

    # ---- momentum update of the key encoder (VPU); written back in place ----
    w1k = w1k_ref[...] * m + w1q_ref[...] * one_m
    b1k = b1k_ref[...] * m + b1q_ref[...] * one_m
    w2k = w2k_ref[...] * m + w2q_ref[...] * one_m
    b2k = b2k_ref[...] * m + b2q_ref[...] * one_m
    w1k_out_ref[...] = w1k
    b1k_out_ref[...] = b1k
    w2k_out_ref[...] = w2k
    b2k_out_ref[...] = b2k

    # ---- query / key encoders (MXU); k uses the *updated* key params ---------
    hq = jnp.maximum(
        jnp.dot(xq_ref[...], w1q_ref[...], preferred_element_type=jnp.float32)
        + b1q_ref[...], 0.0)
    q = jnp.dot(hq, w2q_ref[...], preferred_element_type=jnp.float32) + b2q_ref[...]

    hk = jnp.maximum(
        jnp.dot(xk_ref[...], w1k, preferred_element_type=jnp.float32) + b1k, 0.0)
    k = jnp.dot(hk, w2k, preferred_element_type=jnp.float32) + b2k

    # ---- L2 normalize with rsqrt (EUP); matches F.normalize(eps=1e-12) -------
    q_n = q * jax.lax.rsqrt(jnp.maximum(jnp.sum(q * q, axis=1, keepdims=True), 1e-24))
    k_n = k * jax.lax.rsqrt(jnp.maximum(jnp.sum(k * k, axis=1, keepdims=True), 1e-24))
    kn_vmem[...] = k_n

    # ---- l_pos, replicated across a full 128-lane block (unmasked store) -----
    l_pos = jnp.sum(q_n * k_n, axis=1, keepdims=True) * inv_t
    logits_ref[:, 0:128] = jnp.broadcast_to(l_pos, (l_pos.shape[0], 128))

    # ---- l_neg = q_n @ queue^T (queue stored (K, DIM): contract feature dims)
    queue_load.wait()
    l_neg = jax.lax.dot_general(
        q_n, queue_vmem[...],
        dimension_numbers=(((1,), (1,)), ((), ())),
        preferred_element_type=jnp.float32)
    logits_ref[:, 128:] = l_neg * inv_t

    # ---- dequeue-and-enqueue: DMA the `batch` fresh keys into the aliased ----
    # queue output at rows [ptr, ptr+batch) (padded rows are never written).
    ptr = ptr_ref[0]
    enqueue = pltpu.make_async_copy(
        kn_vmem.at[pl.ds(0, batch)],
        queue_out_ref.at[pl.ds(ptr, batch)],
        dma_sems.at[1])
    enqueue.start()
    enqueue.wait()


# -----------------------------------------------------------------------------
# Functional step (jitted, with params_k / queue donated so the in-kernel
# aliasing becomes a true in-place update).
# -----------------------------------------------------------------------------
def _moco_step_impl(params_q, params_k, queue, ptr, im_q, im_k):
    b = im_q.shape[0]
    xq = im_q.reshape(b, -1).astype(jnp.float32)
    xk = im_k.reshape(b, -1).astype(jnp.float32)
    din = xq.shape[1]
    xq_p = jnp.pad(xq, ((0, N_PAD - b), (0, 0)))
    xk_p = jnp.pad(xk, ((0, N_PAD - b), (0, 0)))

    kq, dim = queue.shape
    hid = params_q["w1"].shape[1]

    def full(shp):
        return pl.BlockSpec(shp, lambda i: (0,) * len(shp))

    in_specs = [
        pl.BlockSpec(memory_space=pltpu.MemorySpace.SMEM),   # 0: queue ptr
        full((N_PAD, din)), full((N_PAD, din)),              # 1,2: xq, xk
        full((din, hid)), full((1, hid)),                    # 3,4: w1_q, b1_q
        full((hid, dim)), full((1, dim)),                    # 5,6: w2_q, b2_q
        full((din, hid)), full((1, hid)),                    # 7,8: w1_k, b1_k
        full((hid, dim)), full((1, dim)),                    # 9,10: w2_k, b2_k
        pl.BlockSpec(memory_space=pl.ANY),                   # 11: queue (K, dim)
    ]
    out_specs = (
        full((N_PAD, 128 + kq)),                             # 0: padded logits
        full((din, hid)), full((1, hid)),                    # 1,2: new w1_k, b1_k
        full((hid, dim)), full((1, dim)),                    # 3,4: new w2_k, b2_k
        pl.BlockSpec(memory_space=pl.ANY),                   # 5: updated queue
    )
    out_shape = (
        jax.ShapeDtypeStruct((N_PAD, 128 + kq), jnp.float32),
        jax.ShapeDtypeStruct((din, hid), jnp.float32),
        jax.ShapeDtypeStruct((1, hid), jnp.float32),
        jax.ShapeDtypeStruct((hid, dim), jnp.float32),
        jax.ShapeDtypeStruct((1, dim), jnp.float32),
        jax.ShapeDtypeStruct((kq, dim), jnp.float32),
    )

    flops = (2 * N_PAD * din * hid * 2        # two first-layer matmuls
             + 2 * N_PAD * hid * dim * 2      # two second-layer matmuls
             + 2 * N_PAD * dim * kq)          # l_neg matmul
    bytes_accessed = 4 * (
        2 * N_PAD * din
        + 3 * (din * hid + hid + hid * dim + dim)   # q params + k params in/out
        + 2 * kq * dim                              # queue in + aliased out
        + N_PAD * (128 + kq))                       # logits
    cost = pl.CostEstimate(flops=flops, transcendentals=2 * N_PAD,
                           bytes_accessed=bytes_accessed)

    fused = pl.pallas_call(
        functools.partial(_moco_fused_kernel, batch=b),
        out_shape=out_shape,
        grid=(1,),
        in_specs=in_specs,
        out_specs=out_specs,
        scratch_shapes=[
            pltpu.VMEM((kq, dim), jnp.float32),     # queue staging buffer
            pltpu.VMEM((N_PAD, dim), jnp.float32),  # normalized keys (enqueue src)
            pltpu.SemaphoreType.DMA((2,)),          # load sem, enqueue sem
        ],
        input_output_aliases={7: 1, 8: 2, 9: 3, 10: 4, 11: 5},
        compiler_params=pltpu.CompilerParams(dimension_semantics=("arbitrary",)),
        cost_estimate=cost,
    )

    logits_pad, w1k, b1k, w2k, b2k, new_queue = fused(
        ptr, xq_p, xk_p,
        params_q["w1"], params_q["b1"], params_q["w2"], params_q["b2"],
        params_k["w1"], params_k["b1"], params_k["w2"], params_k["b2"],
        queue)

    # lanes 0..127 all hold l_pos, lanes 128.. hold l_neg -> [:, 127:] is
    # exactly [l_pos, l_neg] with no concat.
    logits = logits_pad[:b, 127:]
    labels = jnp.zeros((b,), jnp.int32)
    new_params_k = {"w1": w1k, "b1": b1k, "w2": w2k, "b2": b2k}
    new_ptr = (ptr + b) % kq
    return logits, labels, new_params_k, new_queue, new_ptr


_moco_step = jax.jit(_moco_step_impl, donate_argnums=(1, 2))


# -----------------------------------------------------------------------------
# MoCo "module": holds parameters / buffers, runs the fused forward pass.
# -----------------------------------------------------------------------------
class MoCoPallas:
    """MoCo with a synthetic MLP base_encoder; forward runs as one Pallas kernel.

    The queue is stored as (K, dim) (rows = keys) instead of torch's (dim, K) so
    the enqueue is a contiguous row DMA; the forward semantics are identical.
    """

    def __init__(self, key, in_features, dim=DIM, K=K_QUEUE):
        self.K = K
        k1, k2, k3 = jax.random.split(key, 3)
        # Deterministic synthetic encoder weights (query encoder).
        w1 = jax.random.normal(k1, (in_features, HIDDEN), jnp.float32) * 0.02
        b1 = jnp.zeros((1, HIDDEN), jnp.float32)
        w2 = jax.random.normal(k2, (HIDDEN, dim), jnp.float32) * 0.02
        b2 = jnp.zeros((1, dim), jnp.float32)
        self.params_q = {"w1": w1, "b1": b1, "w2": w2, "b2": b2}
        # key encoder: separate-buffer copy of the query encoder (no grad).
        self.params_k = {n: jnp.copy(p) for n, p in self.params_q.items()}
        # queue: randn keys, L2-normalized along the feature dim.  Stored (K, dim).
        queue = jax.random.normal(k3, (K, dim), jnp.float32)
        self.queue = queue * jax.lax.rsqrt(
            jnp.maximum(jnp.sum(queue * queue, axis=1, keepdims=True), 1e-24))
        self.queue_ptr = jnp.zeros((1,), jnp.int32)

    def __call__(self, im_q, im_k):
        n = im_q.shape[0]
        assert self.K % n == 0 and n <= N_PAD
        # TODO(synk): concat_all_gather / _batch_shuffle_ddp / _batch_unshuffle_ddp
        # are DDP BatchNorm tricks; with world_size == 1 and a BN-free synthetic
        # encoder they are exact identities, so they are elided here.
        logits, labels, self.params_k, self.queue, self.queue_ptr = _moco_step(
            self.params_q, self.params_k, self.queue, self.queue_ptr, im_q, im_k)
        return logits, labels


# -----------------------------------------------------------------------------
if __name__ == "__main__":
    key = jax.random.PRNGKey(0)
    k_model, k_q, k_k = jax.random.split(key, 3)

    # small example shapes: batch=2, channels=4, spatial=16x16 (NCHW)
    B, C, H, W = 2, 4, 16, 16
    im_q = jax.random.normal(k_q, (B, C, H, W), jnp.float32)
    im_k = jax.random.normal(k_k, (B, C, H, W), jnp.float32)

    model = MoCoPallas(k_model, in_features=C * H * W)

    # keep copies of the (soon to be donated) state for the pure-JAX reference
    queue0 = jnp.copy(model.queue)
    params_q0 = model.params_q

    logits, labels = model(im_q, im_k)
    jax.block_until_ready((logits, labels, model.queue, model.queue_ptr,
                           *model.params_k.values()))

    assert logits.shape == (B, 1 + K_QUEUE)
    assert labels.shape == (B,) and labels.dtype == jnp.int32
    assert bool(jnp.all(jnp.isfinite(logits)))

    # ---- pure-JAX reference check (no Pallas) --------------------------------
    hp = jax.lax.Precision.HIGHEST

    def enc(x, p):
        h = jnp.maximum(jnp.dot(x, p["w1"], precision=hp) + p["b1"], 0.0)
        return jnp.dot(h, p["w2"], precision=hp) + p["b2"]

    def l2n(x):
        return x / jnp.maximum(jnp.linalg.norm(x, axis=1, keepdims=True), 1e-12)

    xq_ref = im_q.reshape(B, -1)
    xk_ref = im_k.reshape(B, -1)
    # initial params_k == params_q (copy), so the momentum-updated reference is:
    pk_ref = {n: params_q0[n] * M_MOM + params_q0[n] * (1.0 - M_MOM)
              for n in params_q0}
    q_ref = l2n(enc(xq_ref, params_q0))
    k_ref = l2n(enc(xk_ref, pk_ref))
    l_pos_ref = jnp.sum(q_ref * k_ref, axis=1, keepdims=True)
    l_neg_ref = jnp.dot(q_ref, queue0.T, precision=hp)
    logits_ref = jnp.concatenate([l_pos_ref, l_neg_ref], axis=1) / TEMP
    queue_ref = queue0.at[0:B].set(k_ref)

    assert jnp.allclose(logits, logits_ref, rtol=1e-2, atol=1e-2)
    assert jnp.allclose(model.queue, queue_ref, rtol=1e-2, atol=1e-2)
    assert int(model.queue_ptr[0]) == B % K_QUEUE
    for name in ("w1", "b1", "w2", "b2"):
        assert jnp.allclose(model.params_k[name], pk_ref[name],
                            rtol=1e-5, atol=1e-6)

    print("KERNEL_OK")
</pallas_src>

<mosaic_0001>
module attributes {stable_mosaic.version = 11 : i64} {
  func.func @_moco_fused_kernel(%arg0: i32, %arg1: memref<1xi32, #tpu.memory_space<smem>>, %arg2: memref<8x1024xf32, #tpu.memory_space<vmem>>, %arg3: memref<8x1024xf32, #tpu.memory_space<vmem>>, %arg4: memref<1024x128xf32, #tpu.memory_space<vmem>>, %arg5: memref<1x128xf32, #tpu.memory_space<vmem>>, %arg6: memref<128x128xf32, #tpu.memory_space<vmem>>, %arg7: memref<1x128xf32, #tpu.memory_space<vmem>>, %arg8: memref<1024x128xf32, #tpu.memory_space<vmem>>, %arg9: memref<1x128xf32, #tpu.memory_space<vmem>>, %arg10: memref<128x128xf32, #tpu.memory_space<vmem>>, %arg11: memref<1x128xf32, #tpu.memory_space<vmem>>, %arg12: memref<512x128xf32, #tpu.memory_space<any>>, %arg13: memref<8x640xf32, #tpu.memory_space<vmem>>, %arg14: memref<1024x128xf32, #tpu.memory_space<vmem>>, %arg15: memref<1x128xf32, #tpu.memory_space<vmem>>, %arg16: memref<128x128xf32, #tpu.memory_space<vmem>>, %arg17: memref<1x128xf32, #tpu.memory_space<vmem>>, %arg18: memref<512x128xf32, #tpu.memory_space<any>>, %arg19: memref<512x128xf32, #tpu.memory_space<vmem>>, %arg20: memref<8x128xf32, #tpu.memory_space<vmem>>, %arg21: memref<2x!tpu.dma_semaphore, #tpu.memory_space<semaphore_mem>>) attributes {dimension_semantics = [#tpu.dimension_semantics<arbitrary>], iteration_bounds = array<i64: 1>, scalar_prefetch = 0 : i64, scratch_operands = 3 : i64, tpu.core_type = #tpu.core_type<tc>, window_params = [{transform_indices = @transform_0, window_bounds = array<i64: 1>}, {pipeline_mode = #tpu.pipeline_mode<synchronous>, transform_indices = @transform_1, window_bounds = array<i64: 8, 1024>}, {pipeline_mode = #tpu.pipeline_mode<synchronous>, transform_indices = @transform_2, window_bounds = array<i64: 8, 1024>}, {pipeline_mode = #tpu.pipeline_mode<synchronous>, transform_indices = @transform_3, window_bounds = array<i64: 1024, 128>}, {pipeline_mode = #tpu.pipeline_mode<synchronous>, transform_indices = @transform_4, window_bounds = array<i64: 1, 128>}, {pipeline_mode = #tpu.pipeline_mode<synchronous>, transform_indices = @transform_5, window_bounds = array<i64: 128, 128>}, {pipeline_mode = #tpu.pipeline_mode<synchronous>, transform_indices = @transform_6, window_bounds = array<i64: 1, 128>}, {pipeline_mode = #tpu.pipeline_mode<synchronous>, transform_indices = @transform_7, window_bounds = array<i64: 1024, 128>}, {pipeline_mode = #tpu.pipeline_mode<synchronous>, transform_indices = @transform_8, window_bounds = array<i64: 1, 128>}, {pipeline_mode = #tpu.pipeline_mode<synchronous>, transform_indices = @transform_9, window_bounds = array<i64: 128, 128>}, {pipeline_mode = #tpu.pipeline_mode<synchronous>, transform_indices = @transform_10, window_bounds = array<i64: 1, 128>}, {}, {pipeline_mode = #tpu.pipeline_mode<synchronous>, transform_indices = @transform_12, window_bounds = array<i64: 8, 640>}, {pipeline_mode = #tpu.pipeline_mode<synchronous>, transform_indices = @transform_13, window_bounds = array<i64: 1024, 128>}, {pipeline_mode = #tpu.pipeline_mode<synchronous>, transform_indices = @transform_14, window_bounds = array<i64: 1, 128>}, {pipeline_mode = #tpu.pipeline_mode<synchronous>, transform_indices = @transform_15, window_bounds = array<i64: 128, 128>}, {pipeline_mode = #tpu.pipeline_mode<synchronous>, transform_indices = @transform_16, window_bounds = array<i64: 1, 128>}, {}]} {
    %c0_i32 = arith.constant 0 : i32
    %0 = tpu.memref_slice %arg21[%c0_i32] : memref<2x!tpu.dma_semaphore, #tpu.memory_space<semaphore_mem>> -> memref<1x!tpu.dma_semaphore, #tpu.memory_space<semaphore_mem>>
    %1 = tpu.memref_squeeze %0 : memref<1x!tpu.dma_semaphore, #tpu.memory_space<semaphore_mem>> -> memref<!tpu.dma_semaphore, #tpu.memory_space<semaphore_mem>>
    tpu.enqueue_dma source(%arg12 : memref<512x128xf32, #tpu.memory_space<any>>) target(%arg19 : memref<512x128xf32, #tpu.memory_space<vmem>>) target_semaphore(%1 : memref<!tpu.dma_semaphore, #tpu.memory_space<semaphore_mem>>)
    %c0 = arith.constant 0 : index
    %c0_0 = arith.constant 0 : index
    %2 = vector.load %arg8[%c0, %c0_0] : memref<1024x128xf32, #tpu.memory_space<vmem>>, vector<1024x128xf32>
    %cst = arith.constant 9.990000e-01 : f32
    %3 = vector.broadcast %cst : f32 to vector<1024x128xf32>
    %4 = arith.mulf %2, %3 : vector<1024x128xf32>
    %c0_1 = arith.constant 0 : index
    %c0_2 = arith.constant 0 : index
    %5 = vector.load %arg4[%c0_1, %c0_2] : memref<1024x128xf32, #tpu.memory_space<vmem>>, vector<1024x128xf32>
    %cst_3 = arith.constant 1.000000e-03 : f32
    %6 = vector.broadcast %cst_3 : f32 to vector<1024x128xf32>
    %7 = arith.mulf %5, %6 : vector<1024x128xf32>
    %8 = arith.addf %4, %7 : vector<1024x128xf32>
    %c0_4 = arith.constant 0 : index
    %c0_5 = arith.constant 0 : index
    %9 = vector.load %arg9[%c0_4, %c0_5] : memref<1x128xf32, #tpu.memory_space<vmem>>, vector<1x128xf32>
    %cst_6 = arith.constant 9.990000e-01 : f32
    %10 = vector.broadcast %cst_6 : f32 to vector<1x128xf32>
    %11 = arith.mulf %9, %10 : vector<1x128xf32>
    %c0_7 = arith.constant 0 : index
    %c0_8 = arith.constant 0 : index
    %12 = vector.load %arg5[%c0_7, %c0_8] : memref<1x128xf32, #tpu.memory_space<vmem>>, vector<1x128xf32>
    %cst_9 = arith.constant 1.000000e-03 : f32
    %13 = vector.broadcast %cst_9 : f32 to vector<1x128xf32>
    %14 = arith.mulf %12, %13 : vector<1x128xf32>
    %15 = arith.addf %11, %14 : vector<1x128xf32>
    %c0_10 = arith.constant 0 : index
    %c0_11 = arith.constant 0 : index
    %16 = vector.load %arg10[%c0_10, %c0_11] : memref<128x128xf32, #tpu.memory_space<vmem>>, vector<128x128xf32>
    %cst_12 = arith.constant 9.990000e-01 : f32
    %17 = vector.broadcast %cst_12 : f32 to vector<128x128xf32>
    %18 = arith.mulf %16, %17 : vector<128x128xf32>
    %c0_13 = arith.constant 0 : index
    %c0_14 = arith.constant 0 : index
    %19 = vector.load %arg6[%c0_13, %c0_14] : memref<128x128xf32, #tpu.memory_space<vmem>>, vector<128x128xf32>
    %cst_15 = arith.constant 1.000000e-03 : f32
    %20 = vector.broadcast %cst_15 : f32 to vector<128x128xf32>
    %21 = arith.mulf %19, %20 : vector<128x128xf32>
    %22 = arith.addf %18, %21 : vector<128x128xf32>
    %c0_16 = arith.constant 0 : index
    %c0_17 = arith.constant 0 : index
    %23 = vector.load %arg11[%c0_16, %c0_17] : memref<1x128xf32, #tpu.memory_space<vmem>>, vector<1x128xf32>
    %cst_18 = arith.constant 9.990000e-01 : f32
    %24 = vector.broadcast %cst_18 : f32 to vector<1x128xf32>
    %25 = arith.mulf %23, %24 : vector<1x128xf32>
    %c0_19 = arith.constant 0 : index
    %c0_20 = arith.constant 0 : index
    %26 = vector.load %arg7[%c0_19, %c0_20] : memref<1x128xf32, #tpu.memory_space<vmem>>, vector<1x128xf32>
    %cst_21 = arith.constant 1.000000e-03 : f32
    %27 = vector.broadcast %cst_21 : f32 to vector<1x128xf32>
    %28 = arith.mulf %26, %27 : vector<1x128xf32>
    %29 = arith.addf %25, %28 : vector<1x128xf32>
    %c0_22 = arith.constant 0 : index
    %c0_23 = arith.constant 0 : index
    %30 = vector.load %arg14[%c0_22, %c0_23] : memref<1024x128xf32, #tpu.memory_space<vmem>>, vector<1024x128xf32>
    tpu.vector_store %arg14[%c0_22, %c0_23], %8 {strides = array<i32>} : memref<1024x128xf32, #tpu.memory_space<vmem>>, vector<1024x128xf32>,
    %c0_24 = arith.constant 0 : index
    %c0_25 = arith.constant 0 : index
    %31 = vector.load %arg15[%c0_24, %c0_25] : memref<1x128xf32, #tpu.memory_space<vmem>>, vector<1x128xf32>
    tpu.vector_store %arg15[%c0_24, %c0_25], %15 {strides = array<i32>} : memref<1x128xf32, #tpu.memory_space<vmem>>, vector<1x128xf32>,
    %c0_26 = arith.constant 0 : index
    %c0_27 = arith.constant 0 : index
    %32 = vector.load %arg16[%c0_26, %c0_27] : memref<128x128xf32, #tpu.memory_space<vmem>>, vector<128x128xf32>
    tpu.vector_store %arg16[%c0_26, %c0_27], %22 {strides = array<i32>} : memref<128x128xf32, #tpu.memory_space<vmem>>, vector<128x128xf32>,
    %c0_28 = arith.constant 0 : index
    %c0_29 = arith.constant 0 : index
    %33 = vector.load %arg17[%c0_28, %c0_29] : memref<1x128xf32, #tpu.memory_space<vmem>>, vector<1x128xf32>
    tpu.vector_store %arg17[%c0_28, %c0_29], %29 {strides = array<i32>} : memref<1x128xf32, #tpu.memory_space<vmem>>, vector<1x128xf32>,
    %c0_30 = arith.constant 0 : index
    %c0_31 = arith.constant 0 : index
    %34 = vector.load %arg2[%c0_30, %c0_31] : memref<8x1024xf32, #tpu.memory_space<vmem>>, vector<8x1024xf32>
    %c0_32 = arith.constant 0 : index
    %c0_33 = arith.constant 0 : index
    %35 = vector.load %arg4[%c0_32, %c0_33] : memref<1024x128xf32, #tpu.memory_space<vmem>>, vector<1024x128xf32>
    %cst_34 = arith.constant dense<0.000000e+00> : vector<8x128xf32>
    %36 = tpu.matmul %34, %35, %cst_34 {dimension_numbers = #tpu.dot_dimension_numbers<[1], [0], [0], [1], [0, 0, 1, 1], [], []>} : vector<8x1024xf32>, vector<1024x128xf32>, vector<8x128xf32> -> vector<8x128xf32>
    %c0_35 = arith.constant 0 : index
    %c0_36 = arith.constant 0 : index
    %37 = vector.load %arg5[%c0_35, %c0_36] : memref<1x128xf32, #tpu.memory_space<vmem>>, vector<1x128xf32>
    %38 = vector.broadcast %37 : vector<1x128xf32> to vector<8x128xf32>
    %39 = arith.addf %36, %38 : vector<8x128xf32>
    %cst_37 = arith.constant 0.000000e+00 : f32
    %40 = vector.broadcast %cst_37 : f32 to vector<8x128xf32>
    %41 = arith.maximumf %39, %40 : vector<8x128xf32>
    %c0_38 = arith.constant 0 : index
    %c0_39 = arith.constant 0 : index
    %42 = vector.load %arg6[%c0_38, %c0_39] : memref<128x128xf32, #tpu.memory_space<vmem>>, vector<128x128xf32>
    %cst_40 = arith.constant dense<0.000000e+00> : vector<8x128xf32>
    %43 = tpu.matmul %41, %42, %cst_40 {dimension_numbers = #tpu.dot_dimension_numbers<[1], [0], [0], [1], [0, 0, 1, 1], [], []>} : vector<8x128xf32>, vector<128x128xf32>, vector<8x128xf32> -> vector<8x128xf32>
    %c0_41 = arith.constant 0 : index
    %c0_42 = arith.constant 0 : index
    %44 = vector.load %arg7[%c0_41, %c0_42] : memref<1x128xf32, #tpu.memory_space<vmem>>, vector<1x128xf32>
    %45 = vector.broadcast %44 : vector<1x128xf32> to vector<8x128xf32>
    %46 = arith.addf %43, %45 : vector<8x128xf32>
    %c0_43 = arith.constant 0 : index
    %c0_44 = arith.constant 0 : index
    %47 = vector.load %arg3[%c0_43, %c0_44] : memref<8x1024xf32, #tpu.memory_space<vmem>>, vector<8x1024xf32>
    %cst_45 = arith.constant dense<0.000000e+00> : vector<8x128xf32>
    %48 = tpu.matmul %47, %8, %cst_45 {dimension_numbers = #tpu.dot_dimension_numbers<[1], [0], [0], [1], [0, 0, 1, 1], [], []>} : vector<8x1024xf32>, vector<1024x128xf32>, vector<8x128xf32> -> vector<8x128xf32>
    %49 = vector.broadcast %15 : vector<1x128xf32> to vector<8x128xf32>
    %50 = arith.addf %48, %49 : vector<8x128xf32>
    %cst_46 = arith.constant 0.000000e+00 : f32
    %51 = vector.broadcast %cst_46 : f32 to vector<8x128xf32>
    %52 = arith.maximumf %50, %51 : vector<8x128xf32>
    %cst_47 = arith.constant dense<0.000000e+00> : vector<8x128xf32>
    %53 = tpu.matmul %52, %22, %cst_47 {dimension_numbers = #tpu.dot_dimension_numbers<[1], [0], [0], [1], [0, 0, 1, 1], [], []>} : vector<8x128xf32>, vector<128x128xf32>, vector<8x128xf32> -> vector<8x128xf32>
    %54 = vector.broadcast %29 : vector<1x128xf32> to vector<8x128xf32>
    %55 = arith.addf %53, %54 : vector<8x128xf32>
    %56 = arith.mulf %46, %46 : vector<8x128xf32>
    %cst_48 = arith.constant dense<0.000000e+00> : vector<8xf32>
    %57 = vector.multi_reduction <add>, %56, %cst_48 [1] : vector<8x128xf32> to vector<8xf32>
    %58 = vector.shape_cast %57 : vector<8xf32> to vector<8x1xf32>
    %cst_49 = arith.constant 1.000000e-24 : f32
    %59 = vector.broadcast %cst_49 : f32 to vector<8x1xf32>
    %60 = arith.maximumf %58, %59 : vector<8x1xf32>
    %61 = math.rsqrt %60 : vector<8x1xf32>
    %62 = vector.broadcast %61 : vector<8x1xf32> to vector<8x128xf32>
    %63 = arith.mulf %46, %62 : vector<8x128xf32>
    %64 = arith.mulf %55, %55 : vector<8x128xf32>
    %cst_50 = arith.constant dense<0.000000e+00> : vector<8xf32>
    %65 = vector.multi_reduction <add>, %64, %cst_50 [1] : vector<8x128xf32> to vector<8xf32>
    %66 = vector.shape_cast %65 : vector<8xf32> to vector<8x1xf32>
    %cst_51 = arith.constant 1.000000e-24 : f32
    %67 = vector.broadcast %cst_51 : f32 to vector<8x1xf32>
    %68 = arith.maximumf %66, %67 : vector<8x1xf32>
    %69 = math.rsqrt %68 : vector<8x1xf32>
    %70 = vector.broadcast %69 : vector<8x1xf32> to vector<8x128xf32>
    %71 = arith.mulf %55, %70 : vector<8x128xf32>
    %c0_52 = arith.constant 0 : index
    %c0_53 = arith.constant 0 : index
    %72 = vector.load %arg20[%c0_52, %c0_53] : memref<8x128xf32, #tpu.memory_space<vmem>>, vector<8x128xf32>
    tpu.vector_store %arg20[%c0_52, %c0_53], %71 {strides = array<i32>} : memref<8x128xf32, #tpu.memory_space<vmem>>, vector<8x128xf32>,
    %73 = arith.mulf %63, %71 : vector<8x128xf32>
    %cst_54 = arith.constant dense<0.000000e+00> : vector<8xf32>
    %74 = vector.multi_reduction <add>, %73, %cst_54 [1] : vector<8x128xf32> to vector<8xf32>
    %75 = vector.shape_cast %74 : vector<8xf32> to vector<8x1xf32>
    %cst_55 = arith.constant 14.2857141 : f32
    %76 = vector.broadcast %cst_55 : f32 to vector<8x1xf32>
    %77 = arith.mulf %75, %76 : vector<8x1xf32>
    %78 = vector.shape_cast %77 : vector<8x1xf32> to vector<8x1xf32>
    %79 = vector.broadcast %78 : vector<8x1xf32> to vector<8x128xf32>
    %c0_56 = arith.constant 0 : index
    %c0_57 = arith.constant 0 : index
    %80 = vector.load %arg13[%c0_56, %c0_57] : memref<8x640xf32, #tpu.memory_space<vmem>>, vector<8x128xf32>
    tpu.vector_store %arg13[%c0_56, %c0_57], %79 {strides = array<i32>} : memref<8x640xf32, #tpu.memory_space<vmem>>, vector<8x128xf32>,
    %c0_i32_58 = arith.constant 0 : i32
    %81 = tpu.memref_slice %arg21[%c0_i32_58] : memref<2x!tpu.dma_semaphore, #tpu.memory_space<semaphore_mem>> -> memref<1x!tpu.dma_semaphore, #tpu.memory_space<semaphore_mem>>
    %82 = tpu.memref_squeeze %81 : memref<1x!tpu.dma_semaphore, #tpu.memory_space<semaphore_mem>> -> memref<!tpu.dma_semaphore, #tpu.memory_space<semaphore_mem>>
    tpu.wait_dma2 semaphore(%82 : memref<!tpu.dma_semaphore, #tpu.memory_space<semaphore_mem>>) src(%arg12 : memref<512x128xf32, #tpu.memory_space<any>>) dst(%arg19 : memref<512x128xf32, #tpu.memory_space<vmem>>)
    %c0_59 = arith.constant 0 : index
    %c0_60 = arith.constant 0 : index
    %83 = vector.load %arg19[%c0_59, %c0_60] : memref<512x128xf32, #tpu.memory_space<vmem>>, vector<512x128xf32>
    %cst_61 = arith.constant dense<0.000000e+00> : vector<8x512xf32>
    %84 = tpu.matmul %63, %83, %cst_61 {dimension_numbers = #tpu.dot_dimension_numbers<[1], [1], [0], [0], [0, 0, 1, 0], [], []>} : vector<8x128xf32>, vector<512x128xf32>, vector<8x512xf32> -> vector<8x512xf32>
    %cst_62 = arith.constant 14.2857141 : f32
    %85 = vector.broadcast %cst_62 : f32 to vector<8x512xf32>
    %86 = arith.mulf %84, %85 : vector<8x512xf32>
    %c0_63 = arith.constant 0 : index
    %c128 = arith.constant 128 : index
    %87 = vector.load %arg13[%c0_63, %c128] : memref<8x640xf32, #tpu.memory_space<vmem>>, vector<8x512xf32>
    tpu.vector_store %arg13[%c0_63, %c128], %86 {strides = array<i32>} : memref<8x640xf32, #tpu.memory_space<vmem>>, vector<8x512xf32>,
    %c0_64 = arith.constant 0 : index
    %88 = memref.load %arg1[%c0_64] : memref<1xi32, #tpu.memory_space<smem>>
    %c1_i32 = arith.constant 1 : i32
    %c0_i32_65 = arith.constant 0 : i32
    %c0_i32_66 = arith.constant 0 : i32
    %89 = tpu.memref_slice %arg20[%c0_i32_65, %c0_i32_66] : memref<8x128xf32, #tpu.memory_space<vmem>> -> memref<2x128xf32, #tpu.memory_space<vmem>>
    %c0_i32_67 = arith.constant 0 : i32
    %90 = tpu.memref_slice %arg18[%88, %c0_i32_67] : memref<512x128xf32, #tpu.memory_space<any>> -> memref<2x128xf32, #tpu.memory_space<any>>
    %91 = tpu.memref_slice %arg21[%c1_i32] : memref<2x!tpu.dma_semaphore, #tpu.memory_space<semaphore_mem>> -> memref<1x!tpu.dma_semaphore, #tpu.memory_space<semaphore_mem>>
    %92 = tpu.memref_squeeze %91 : memref<1x!tpu.dma_semaphore, #tpu.memory_space<semaphore_mem>> -> memref<!tpu.dma_semaphore, #tpu.memory_space<semaphore_mem>>
    tpu.enqueue_dma source(%89 : memref<2x128xf32, #tpu.memory_space<vmem>>) target(%90 : memref<2x128xf32, #tpu.memory_space<any>>) target_semaphore(%92 : memref<!tpu.dma_semaphore, #tpu.memory_space<semaphore_mem>>)
    %c1_i32_68 = arith.constant 1 : i32
    %c0_i32_69 = arith.constant 0 : i32
    %c0_i32_70 = arith.constant 0 : i32
    %93 = tpu.memref_slice %arg20[%c0_i32_69, %c0_i32_70] : memref<8x128xf32, #tpu.memory_space<vmem>> -> memref<2x128xf32, #tpu.memory_space<vmem>>
    %c0_i32_71 = arith.constant 0 : i32
    %94 = tpu.memref_slice %arg18[%88, %c0_i32_71] : memref<512x128xf32, #tpu.memory_space<any>> -> memref<2x128xf32, #tpu.memory_space<any>>
    %95 = tpu.memref_slice %arg21[%c1_i32_68] : memref<2x!tpu.dma_semaphore, #tpu.memory_space<semaphore_mem>> -> memref<1x!tpu.dma_semaphore, #tpu.memory_space<semaphore_mem>>
    %96 = tpu.memref_squeeze %95 : memref<1x!tpu.dma_semaphore, #tpu.memory_space<semaphore_mem>> -> memref<!tpu.dma_semaphore, #tpu.memory_space<semaphore_mem>>
    tpu.wait_dma2 semaphore(%96 : memref<!tpu.dma_semaphore, #tpu.memory_space<semaphore_mem>>) src(%93 : memref<2x128xf32, #tpu.memory_space<vmem>>) dst(%94 : memref<2x128xf32, #tpu.memory_space<any>>)
    return
  }
  func.func @transform_0(%arg0: i32) -> i32 {
    %c0_i32 = arith.constant 0 : i32
    %c0_i32_0 = arith.constant 0 : i32
    return %c0_i32 : i32
  }
  func.func @transform_1(%arg0: i32) -> (i32, i32) {
    %c0_i32 = arith.constant 0 : i32
    %c0_i32_0 = arith.constant 0 : i32
    %c0_i32_1 = arith.constant 0 : i32
    return %c0_i32, %c0_i32_0 : i32, i32
  }
  func.func @transform_2(%arg0: i32) -> (i32, i32) {
    %c0_i32 = arith.constant 0 : i32
    %c0_i32_0 = arith.constant 0 : i32
    %c0_i32_1 = arith.constant 0 : i32
    return %c0_i32, %c0_i32_0 : i32, i32
  }
  func.func @transform_3(%arg0: i32) -> (i32, i32) {
    %c0_i32 = arith.constant 0 : i32
    %c0_i32_0 = arith.constant 0 : i32
    %c0_i32_1 = arith.constant 0 : i32
    return %c0_i32, %c0_i32_0 : i32, i32
  }
  func.func @transform_4(%arg0: i32) -> (i32, i32) {
    %c0_i32 = arith.constant 0 : i32
    %c0_i32_0 = arith.constant 0 : i32
    %c0_i32_1 = arith.constant 0 : i32
    return %c0_i32, %c0_i32_0 : i32, i32
  }
  func.func @transform_5(%arg0: i32) -> (i32, i32) {
    %c0_i32 = arith.constant 0 : i32
    %c0_i32_0 = arith.constant 0 : i32
    %c0_i32_1 = arith.constant 0 : i32
    return %c0_i32, %c0_i32_0 : i32, i32
  }
  func.func @transform_6(%arg0: i32) -> (i32, i32) {
    %c0_i32 = arith.constant 0 : i32
    %c0_i32_0 = arith.constant 0 : i32
    %c0_i32_1 = arith.constant 0 : i32
    return %c0_i32, %c0_i32_0 : i32, i32
  }
  func.func @transform_7(%arg0: i32) -> (i32, i32) {
    %c0_i32 = arith.constant 0 : i32
    %c0_i32_0 = arith.constant 0 : i32
    %c0_i32_1 = arith.constant 0 : i32
    return %c0_i32, %c0_i32_0 : i32, i32
  }
  func.func @transform_8(%arg0: i32) -> (i32, i32) {
    %c0_i32 = arith.constant 0 : i32
    %c0_i32_0 = arith.constant 0 : i32
    %c0_i32_1 = arith.constant 0 : i32
    return %c0_i32, %c0_i32_0 : i32, i32
  }
  func.func @transform_9(%arg0: i32) -> (i32, i32) {
    %c0_i32 = arith.constant 0 : i32
    %c0_i32_0 = arith.constant 0 : i32
    %c0_i32_1 = arith.constant 0 : i32
    return %c0_i32, %c0_i32_0 : i32, i32
  }
  func.func @transform_10(%arg0: i32) -> (i32, i32) {
    %c0_i32 = arith.constant 0 : i32
    %c0_i32_0 = arith.constant 0 : i32
    %c0_i32_1 = arith.constant 0 : i32
    return %c0_i32, %c0_i32_0 : i32, i32
  }
  func.func @transform_12(%arg0: i32) -> (i32, i32) {
    %c0_i32 = arith.constant 0 : i32
    %c0_i32_0 = arith.constant 0 : i32
    %c0_i32_1 = arith.constant 0 : i32
    return %c0_i32, %c0_i32_0 : i32, i32
  }
  func.func @transform_13(%arg0: i32) -> (i32, i32) {
    %c0_i32 = arith.constant 0 : i32
    %c0_i32_0 = arith.constant 0 : i32
    %c0_i32_1 = arith.constant 0 : i32
    return %c0_i32, %c0_i32_0 : i32, i32
  }
  func.func @transform_14(%arg0: i32) -> (i32, i32) {
    %c0_i32 = arith.constant 0 : i32
    %c0_i32_0 = arith.constant 0 : i32
    %c0_i32_1 = arith.constant 0 : i32
    return %c0_i32, %c0_i32_0 : i32, i32
  }
  func.func @transform_15(%arg0: i32) -> (i32, i32) {
    %c0_i32 = arith.constant 0 : i32
    %c0_i32_0 = arith.constant 0 : i32
    %c0_i32_1 = arith.constant 0 : i32
    return %c0_i32, %c0_i32_0 : i32, i32
  }
  func.func @transform_16(%arg0: i32) -> (i32, i32) {
    %c0_i32 = arith.constant 0 : i32
    %c0_i32_0 = arith.constant 0 : i32
    %c0_i32_1 = arith.constant 0 : i32
    return %c0_i32, %c0_i32_0 : i32, i32
  }
}

</mosaic_0001>

<bundles_post_ra>
// kernel: _moco_step_impl.1
= control target key start
LH: loop header
LB: loop body
LE: loop exit
PB: predicated region body
PF: predicated region fallthrough
CT: control target
= control target key end

     0   :  { %s4071_s0 = inlined_call_operand.<no memory space> [shape: s32[1], index: 0, kind: input, shape index: {}]   ;;  %s4072_s1 = inlined_call_operand.vmem [shape: f32[8,1024], index: 1, kind: input, shape index: {}]   ;;  %s4073_s2 = inlined_call_operand.vmem [shape: f32[8,1024], index: 2, kind: input, shape index: {}]   ;;  %s4074_s3 = inlined_call_operand.hbm [shape: f32[1024,128], index: 3, kind: input, shape index: {}]   ;;  %s4075_s4 = inlined_call_operand.vmem [shape: f32[1,128], index: 4, kind: input, shape index: {}]   ;;  %s4076_s5 = inlined_call_operand.vmem [shape: f32[128,128], index: 5, kind: input, shape index: {}]   ;;  %s4077_s6 = inlined_call_operand.vmem [shape: f32[1,128], index: 6, kind: input, shape index: {}]   ;;  %s4078_s7 = inlined_call_operand.hbm [shape: f32[1024,128], index: 7, kind: input, shape index: {}, may-alias: {7,13}]   ;;  %s4079_s8 = inlined_call_operand.vmem [shape: f32[1,128], index: 8, kind: input, shape index: {}, may-alias: {8,14}]   ;;  %s4080_s9 = inlined_call_operand.vmem [shape: f32[128,128], index: 9, kind: input, shape index: {}, may-alias: {9,15}]   ;;  %s4081_s10 = inlined_call_operand.vmem [shape: f32[1,128], index: 10, kind: input, shape index: {}, may-alias: {10,16}]   ;;  %s4082_s11 = inlined_call_operand.hbm [shape: f32[512,128], index: 11, kind: input, shape index: {}, may-alias: {11,17}]   ;;  %s4083_s12 = inlined_call_operand.vmem [shape: f32[8,640], index: 12, kind: output, shape index: {0}]   ;;  %s4084_s13 = inlined_call_operand.hbm [shape: f32[1024,128], index: 13, kind: output, shape index: {1}, may-alias: {7,13}]   ;;  %s4085_s14 = inlined_call_operand.vmem [shape: f32[1,128], index: 14, kind: output, shape index: {2}, may-alias: {8,14}]   ;;  %s4086_s15 = inlined_call_operand.vmem [shape: f32[128,128], index: 15, kind: output, shape index: {3}, may-alias: {9,15}]   ;;  %s4087_s16 = inlined_call_operand.vmem [shape: f32[1,128], index: 16, kind: output, shape index: {4}, may-alias: {10,16}]   ;;  %s4088_s17 = inlined_call_operand.hbm [shape: f32[512,128], index: 17, kind: output, shape index: {5}, may-alias: {11,17}]  }
   0x1   :  { %4112 = sst [smem:[#allocation41_spill]] %s4071_s0 }
   0x2   :  { %4113 = sst [smem:[#allocation42_spill]] %s4072_s1 }
   0x3   :  { %24 = vsyncpa [#allocation7], 0 }
   0x4   :  { %25 = vsyncpa [#allocation10], 0 }
   0x5   :  { %26 = vsyncpa [#allocation8], 0  ;;  %s3113_s24 = smov [#allocation6]   ;;  %s2991_s28 = scalar_lea.hbm %s4074_s3, 16384 }
   0x6   :  { %s38_s25 = sshll.u32 %s3113_s24, 4  ;;  %p2992_p0 = scmp.ne.s32.totalorder %s4074_s3, %s2991_s28  ;;  %s39_s25 = int_to_ptr.vmem [resolvable:$true] %s38_s25 }
   0x7   :  { %p2995_p1 = scmp.lt.u32.totalorder %s2991_s28, %s4074_s3 }
   0x9   :  { %p2997_p2 = pnand %p2995_p1, %p2992_p0 }
   0xb   :  { %3000 = shalt.err (!%p2997_p2)
}
   0xc   :  { %s3001_s19 = scalar_lea.vmem %s39_s25, 16384  ;;  %p3006_p4 = scmp.lt.s32.totalorder %s39_s25, %s39_s25 }
   0xd   :  { %p3002_p3 = scmp.ne.s32.totalorder %s39_s25, %s3001_s19  ;;  %p3007_p5 = scmp.lt.s32.totalorder %s3001_s19, %s3001_s19 }
   0xf   :  { %p3008_p6 = por %p3007_p5, %p3006_p4 }
  0x11   :  { %p3009_p7 = pnand %p3008_p6, %p3002_p3 }
  0x13   :  { %3012 = shalt.err (!%p3009_p7)
}
  0x14   :  { %s3114_s1 = smov 128   ;;  %s3115_s20 = smov 8  }
  0x15   :  { %44 = dma.hbm_to_vmem [thread:$0]  %s4074_s3, 16384, %s39_s25, [#allocation7], %s3114_s1, %s3114_s1, %s3115_s20  }
  0x16   :  { %s3116_s23 = smov [#allocation9]   ;;  %s3013_s28 = scalar_lea.hbm %s4078_s7, 16384 }
  0x17   :  { %s56_s24 = sshll.u32 %s3116_s23, 4  ;;  %p3014_p8 = scmp.ne.s32.totalorder %s4078_s7, %s3013_s28  ;;  %s57_s24 = int_to_ptr.vmem [resolvable:$true] %s56_s24 }
  0x18   :  { %p3017_p9 = scmp.lt.u32.totalorder %s3013_s28, %s4078_s7 }
  0x1a   :  { %p3019_p10 = pnand %p3017_p9, %p3014_p8 }
  0x1c   :  { %3022 = shalt.err (!%p3019_p10)
}
  0x1d   :  { %s3023_s19 = scalar_lea.vmem %s57_s24, 16384  ;;  %p3028_p12 = scmp.lt.s32.totalorder %s57_s24, %s57_s24 }
  0x1e   :  { %p3024_p11 = scmp.ne.s32.totalorder %s57_s24, %s3023_s19  ;;  %p3029_p13 = scmp.lt.s32.totalorder %s3023_s19, %s3023_s19 }
  0x20   :  { %p3030_p0 = por %p3029_p13, %p3028_p12 }
  0x22   :  { %p3031_p1 = pnand %p3030_p0, %p3024_p11 }
  0x24   :  { %3034 = shalt.err (!%p3031_p1)
}
  0x25   :  { %62 = dma.hbm_to_vmem [thread:$0]  %s4078_s7, 16384, %s57_s24, [#allocation10], %s3114_s1, %s3114_s1, %s3115_s20  }
  0x26   :  { %3103 = dma.done.wait [#allocation7], 16384  }
  0x27   :  { %3104 = vsyncadd [#allocation7], 4294950912 }
  0x28   :  { %3105 = dma.done.wait [#allocation10], 16384  }
  0x29   :  { %3106 = vsyncadd [#allocation10], 4294950912  ;;  %v3243_v0 = vld [vmem:[#allocation6 + $0x80] sm:$0xff]  ;;  %v3245_v1 = vld [vmem:[#allocation6 + $0x88] sm:$0xff]  ;;  %s4114_s22 = sld [smem:[#allocation42_spill]]  ;;  %vm3118_vm0 = vmmov 0  }
  0x2a   :  { %v3247_v2 = vld [vmem:[#allocation6] sm:$0xff]  ;;  %v2609_v3 = vpack.c.bf16 %v3245_v1, %v3243_v0  ;;  %v3251_v4 = vld [vmem:[#allocation6 + $0x8] sm:$0xff]  ;;  %v3255_v11 = vld [vmem:[#allocation6 + $0x90] sm:$0xff]  ;;  %s3035_s21 = scalar_lea.hbm %s4082_s11, 8192 }
  0x2b   :  { %v1018_v5 = vld [vmem:[#allocation6 + $0x180] sm:$0xff]  ;;  %v1019_v6 = vld [vmem:[#allocation6 + $0x188] sm:$0xff]  ;;  %v2611_v7 = vpack.c.bf16 %v3251_v4, %v3247_v2  ;;  %v3257_v13 = vld [vmem:[#allocation6 + $0x98] sm:$0xff]  ;;  %p3036_p2 = scmp.ne.s32.totalorder %s4082_s11, %s3035_s21  ;;  %p3039_p3 = scmp.lt.u32.totalorder %s3035_s21, %s4082_s11 }
  0x2c   :  { %v2641_v8 = vpack.c.bf16 %v1019_v6, %v1018_v5  ;;  %v1002_v9 = vld [vmem:[#allocation6 + $0x100] sm:$0xff]  ;;  %v1003_v10 = vld [vmem:[#allocation6 + $0x108] sm:$0xff]  ;;  %2610 = vmatprep.subr.bf16.mxu0 %v2609_v3  ;;  %v3259_v14 = vld [vmem:[#allocation6 + $0x10] sm:$0xff]  ;;  %v2613_v16 = vpack.c.bf16 %v3257_v13, %v3255_v11 }
  0x2d   :  { %v2643_v12 = vpack.c.bf16 %v1003_v10, %v1002_v9  ;;  %v3261_v15 = vld [vmem:[#allocation6 + $0x18] sm:$0xff]  ;;  %2612 = vmatpush3.bf16.msra.mxu0 %v2611_v7  ;;  %v1020_v18 = vld [vmem:[#allocation6 + $0x190] sm:$0xff]  ;;  %v3267_v23 = vld [vmem:[#allocation6 + $0xa0] sm:$0xff]  ;;  %p3041_p4 = pnand %p3039_p3, %p3036_p2 }
  0x2e   :  { %2642 = vmatprep.subr.bf16.mxu1 %v2641_v8  ;;  %v2615_v17 = vpack.c.bf16 %v3261_v15, %v3259_v14  ;;  %v1021_v19 = vld [vmem:[#allocation6 + $0x198] sm:$0xff]  ;;  %v1004_v20 = vld [vmem:[#allocation6 + $0x110] sm:$0xff]  ;;  %v3269_v24 = vld [vmem:[#allocation6 + $0xa8] sm:$0xff]  ;;  %2614 = vmatprep.subr.bf16.mxu0 %v2613_v16 }
  0x2f   :  { %2644 = vmatpush3.bf16.msra.mxu1 %v2643_v12  ;;  %v2645_v21 = vpack.c.bf16 %v1021_v19, %v1020_v18  ;;  %v1005_v22 = vld [vmem:[#allocation6 + $0x118] sm:$0xff]  ;;  %v2617_v26 = vpack.c.bf16 %v3269_v24, %v3267_v23  ;;  %v3273_v27 = vld [vmem:[#allocation6 + $0x20] sm:$0xff]  ;;  %v3275_v28 = vld [vmem:[#allocation6 + $0x28] sm:$0xff] }
  0x30   :  { %v2647_v25 = vpack.c.bf16 %v1005_v22, %v1004_v20  ;;  %v1022_v29 = vld [vmem:[#allocation6 + $0x1a0] sm:$0xff]  ;;  %v1023_v30 = vld [vmem:[#allocation6 + $0x1a8] sm:$0xff]  ;;  %v2619_v33 = vpack.c.bf16 %v3275_v28, %v3273_v27  ;;  %v3279_v35 = vld [vmem:[#allocation6 + $0xb0] sm:$0xff] }
  0x31   :  { %2646 = vmatprep.subr.bf16.mxu1 %v2645_v21  ;;  %v1006_v31 = vld [vmem:[#allocation6 + $0x120] sm:$0xff]  ;;  %v1007_v32 = vld [vmem:[#allocation6 + $0x128] sm:$0xff]  ;;  %2616 = vmatpush3.bf16.msra.mxu0 %v2615_v17  ;;  %v2649_v34 = vpack.c.bf16 %v1023_v30, %v1022_v29  ;;  %v3281_v36 = vld [vmem:[#allocation6 + $0xb8] sm:$0xff] }
  0x32   :  { %v3283_v37 = vld [vmem:[#allocation6 + $0x30] sm:$0xff]  ;;  %2618 = vmatprep.subr.bf16.mxu0 %v2617_v26  ;;  %v2651_v38 = vpack.c.bf16 %v1007_v32, %v1006_v31  ;;  %v2621_v39 = vpack.c.bf16 %v3281_v36, %v3279_v35  ;;  %v3287_v40 = vld [vmem:[#allocation6 + $0x38] sm:$0xff]  ;;  %v3289_v46 = vld [vmem:[#allocation6 + $0xc0] sm:$0xff] }
  0x33   :  { %2648 = vmatpush3.bf16.msra.mxu1 %v2647_v25  ;;  %v1024_v41 = vld [vmem:[#allocation6 + $0x1b0] sm:$0xff]  ;;  %v1025_v42 = vld [vmem:[#allocation6 + $0x1b8] sm:$0xff]  ;;  %v3291_v47 = vld [vmem:[#allocation6 + $0xc8] sm:$0xff]  ;;  %v2623_v48 = vpack.c.bf16 %v3287_v40, %v3283_v37 }
  0x34   :  { %2650 = vmatprep.subr.bf16.mxu1 %v2649_v34  ;;  %v2653_v43 = vpack.c.bf16 %v1025_v42, %v1024_v41  ;;  %v1008_v44 = vld [vmem:[#allocation6 + $0x130] sm:$0xff]  ;;  %v1009_v45 = vld [vmem:[#allocation6 + $0x138] sm:$0xff]  ;;  %v1026_v49 = vld [vmem:[#allocation6 + $0x1c0] sm:$0xff]  ;;  %v2625_v52 = vpack.c.bf16 %v3291_v47, %v3289_v46 }
  0x35   :  { %2620 = vmatpush3.bf16.msra.mxu0 %v2619_v33  ;;  %v1027_v50 = vld [vmem:[#allocation6 + $0x1c8] sm:$0xff]  ;;  %v2655_v51 = vpack.c.bf16 %v1009_v45, %v1008_v44  ;;  %v3297_v53 = vld [vmem:[#allocation6 + $0x40] sm:$0xff]  ;;  %v3301_v58 = vld [vmem:[#allocation6 + $0xd0] sm:$0xff] }
  0x36   :  { %2622 = vmatprep.subr.bf16.mxu0 %v2621_v39  ;;  %v3299_v54 = vld [vmem:[#allocation6 + $0x48] sm:$0xff]  ;;  %v1010_v55 = vld [vmem:[#allocation6 + $0x140] sm:$0xff]  ;;  %v2657_v56 = vpack.c.bf16 %v1027_v50, %v1026_v49  ;;  %v3303_v59 = vld [vmem:[#allocation6 + $0xd8] sm:$0xff] }
  0x37   :  { %2652 = vmatpush3.bf16.msra.mxu1 %v2651_v38  ;;  %v1011_v57 = vld [vmem:[#allocation6 + $0x148] sm:$0xff]  ;;  %v1028_v60 = vld [vmem:[#allocation6 + $0x1d0] sm:$0xff]  ;;  %v1029_v61 = vld [vmem:[#allocation6 + $0x1d8] sm:$0xff]  ;;  %v2627_v62 = vpack.c.bf16 %v3299_v54, %v3297_v53  ;;  %v2629_v3 = vpack.c.bf16 %v3303_v59, %v3301_v58 }
  0x38   :  { %2654 = vmatprep.subr.bf16.mxu1 %v2653_v43  ;;  %v2659_v63 = vpack.c.bf16 %v1011_v57, %v1010_v55  ;;  %v3309_v5 = vld [vmem:[#allocation6 + $0x50] sm:$0xff]  ;;  %v3311_v6 = vld [vmem:[#allocation6 + $0x58] sm:$0xff]  ;;  %v2661_v8 = vpack.c.bf16 %v1029_v61, %v1028_v60  ;;  %v3313_v10 = vld [vmem:[#allocation6 + $0xe0] sm:$0xff] }
  0x39   :  { %2624 = vmatpush3.bf16.msra.mxu0 %v2623_v48  ;;  %v1012_v7 = vld [vmem:[#allocation6 + $0x150] sm:$0xff]  ;;  %v1013_v9 = vld [vmem:[#allocation6 + $0x158] sm:$0xff]  ;;  %v3315_v12 = vld [vmem:[#allocation6 + $0xe8] sm:$0xff]  ;;  %v2631_v18 = vpack.c.bf16 %v3311_v6, %v3309_v5 }
  0x3a   :  { %2626 = vmatprep.subr.bf16.mxu0 %v2625_v52  ;;  %v1030_v16 = vld [vmem:[#allocation6 + $0x1e0] sm:$0xff]  ;;  %v1031_v17 = vld [vmem:[#allocation6 + $0x1e8] sm:$0xff]  ;;  %v2663_v21 = vpack.c.bf16 %v1013_v9, %v1012_v7  ;;  %v2633_v22 = vpack.c.bf16 %v3315_v12, %v3313_v10  ;;  %v3328_v31 = vld [vmem:[#allocation6 + $0xf0] sm:$0xff] }
  0x3b   :  { %2656 = vmatpush3.bf16.msra.mxu1 %v2655_v51  ;;  %v3319_v19 = vld [vmem:[#allocation6 + $0x60] sm:$0xff]  ;;  %v3321_v20 = vld [vmem:[#allocation6 + $0x68] sm:$0xff]  ;;  %v2665_v30 = vpack.c.bf16 %v1031_v17, %v1030_v16  ;;  %v3330_v32 = vld [vmem:[#allocation6 + $0xf8] sm:$0xff] }
  0x3c   :  { %2658 = vmatprep.subr.bf16.mxu1 %v2657_v56  ;;  %v1014_v25 = vld [vmem:[#allocation6 + $0x160] sm:$0xff]  ;;  %v1015_v26 = vld [vmem:[#allocation6 + $0x168] sm:$0xff]  ;;  %v965_v33 = vld [vmem:[%s4114_s22 + $0x18] sm:$0xff]  ;;  %v2635_v39 = vpack.c.bf16 %v3321_v20, %v3319_v19  ;;  %v2637_v42 = vpack.c.bf16 %v3330_v32, %v3328_v31 }
  0x3d   :  { %2628 = vmatpush3.bf16.msra.mxu0 %v2627_v62  ;;  %v963_v29 = vld [vmem:[%s4114_s22 + $0x8] sm:$0xff]  ;;  %v1032_v34 = vld [vmem:[#allocation6 + $0x1f0] sm:$0xff]  ;;  %v1033_v38 = vld [vmem:[#allocation6 + $0x1f8] sm:$0xff]  ;;  %1239 = vmatprep.mubr.f32.mxu1 %v965_v33  ;;  %v2667_v41 = vpack.c.bf16 %v1015_v26, %v1014_v25 }
  0x3e   :  { %2630 = vmatprep.subr.bf16.mxu0 %v2629_v3  ;;  %1169 = vmatprep.mubr.f32.mxu0 %v963_v29  ;;  %v3339_v43 = vld [vmem:[#allocation6 + $0x70] sm:$0xff]  ;;  %v3341_v44 = vld [vmem:[#allocation6 + $0x78] sm:$0xff]  ;;  %v2669_v48 = vpack.c.bf16 %v1033_v38, %v1032_v34  ;;  %v3343_v50 = vld [vmem:[#allocation6 + $0x280] sm:$0xff] }
  0x3f   :  { %2660 = vmatpush3.bf16.msra.mxu1 %v2659_v63  ;;  %v1016_v45 = vld [vmem:[#allocation6 + $0x170] sm:$0xff]  ;;  %v1017_v49 = vld [vmem:[#allocation6 + $0x178] sm:$0xff]  ;;  %v3345_v51 = vld [vmem:[#allocation6 + $0x288] sm:$0xff]  ;;  %v2639_v56 = vpack.c.bf16 %v3341_v44, %v3339_v43 }
  0x40   :  { %2662 = vmatprep.subr.bf16.mxu1 %v2661_v8  ;;  %v1082_v52 = vld [vmem:[#allocation6 + $0x380] sm:$0xff]  ;;  %v1083_v55 = vld [vmem:[#allocation6 + $0x388] sm:$0xff]  ;;  %v2671_v57 = vpack.c.bf16 %v1017_v49, %v1016_v45  ;;  %v2673_v60 = vpack.c.bf16 %v3345_v51, %v3343_v50  ;;  %v3355_v8 = vld [vmem:[#allocation6 + $0x290] sm:$0xff] }
  0x41   :  { %2632 = vmatpush3.bf16.msra.mxu0 %v2631_v18  ;;  %v3351_v61 = vld [vmem:[#allocation6 + $0x200] sm:$0xff]  ;;  %v3353_v62 = vld [vmem:[#allocation6 + $0x208] sm:$0xff]  ;;  %v2705_v3 = vpack.c.bf16 %v1083_v55, %v1082_v52  ;;  %v3357_v9 = vld [vmem:[#allocation6 + $0x298] sm:$0xff] }
  0x42   :  { %2634 = vmatprep.subr.bf16.mxu0 %v2633_v22  ;;  %v1066_v63 = vld [vmem:[#allocation6 + $0x300] sm:$0xff]  ;;  %v1067_v7 = vld [vmem:[#allocation6 + $0x308] sm:$0xff]  ;;  %v1084_v16 = vld [vmem:[#allocation6 + $0x390] sm:$0xff]  ;;  %v2677_v26 = vpack.c.bf16 %v3357_v9, %v3355_v8 }
  0x43   :  { %2664 = vmatpush3.bf16.msra.mxu1 %v2663_v21  ;;  %v1085_v17 = vld [vmem:[#allocation6 + $0x398] sm:$0xff]  ;;  %v2675_v21 = vpack.c.bf16 %v3353_v62, %v3351_v61  ;;  %v964_v22 = vld [vmem:[%s4114_s22 + $0x10] sm:$0xff]  ;;  %v2707_v25 = vpack.c.bf16 %v1067_v7, %v1066_v63  ;;  %v3369_v29 = vld [vmem:[#allocation6 + $0x210] sm:$0xff] }
  0x44   :  { %2666 = vmatprep.subr.bf16.mxu1 %v2665_v30  ;;  %v962_v18 = vld [vmem:[%s4114_s22] sm:$0xff]  ;;  %4115 = vst [vmem:[#allocation23_spill] sm:$0xff] %v3369_v29  ;;  %v1068_v33 = vld [vmem:[#allocation6 + $0x310] sm:$0xff]  ;;  %v2709_v34 = vpack.c.bf16 %v1085_v17, %v1084_v16  ;;  %v1087_v45 = vld [vmem:[#allocation6 + $0x3a8] sm:$0xff] }
  0x45   :  { %2636 = vmatpush3.bf16.msra.mxu0 %v2635_v39  ;;  %v3371_v30 = vld [vmem:[#allocation6 + $0x218] sm:$0xff]  ;;  %v1054_v39 = vld [vmem:[#allocation6 + $0x2a0] sm:$0xff]  ;;  %v1071_v63 = vld [vmem:[#allocation6 + $0x328] sm:$0xff] }
  0x46   :  { %2638 = vmatprep.subr.bf16.mxu0 %v2637_v42  ;;  %4116 = vst [vmem:[#allocation24_spill] sm:$0xff] %v3371_v30  ;;  %v1069_v38 = vld [vmem:[#allocation6 + $0x318] sm:$0xff]  ;;  %v1086_v42 = vld [vmem:[#allocation6 + $0x3a0] sm:$0xff]  ;;  %v1088_v16 = vld [vmem:[#allocation6 + $0x3b0] sm:$0xff] }
  0x47   :  { %2668 = vmatpush3.bf16.msra.mxu1 %v2667_v41  ;;  %v1055_v41 = vld [vmem:[#allocation6 + $0x2a8] sm:$0xff]  ;;  %v2711_v49 = vpack.c.bf16 %v1069_v38, %v1068_v33  ;;  %v1038_v55 = vld [vmem:[#allocation6 + $0x220] sm:$0xff]  ;;  %v1057_v7 = vld [vmem:[#allocation6 + $0x2b8] sm:$0xff] }
  0x48   :  { %2670 = vmatprep.subr.bf16.mxu1 %v2669_v48  ;;  %v2679_v48 = vpack.c.bf16 %v3371_v30, %v3369_v29  ;;  %v2681_v52 = vpack.c.bf16 %v1055_v41, %v1054_v39  ;;  %v1089_v17 = vld [vmem:[#allocation6 + $0x3b8] sm:$0xff]  ;;  %v1072_v33 = vld [vmem:[#allocation6 + $0x330] sm:$0xff]  ;;  %v1058_v41 = vld [vmem:[#allocation6 + $0x2c0] sm:$0xff] }
  0x49   :  { %2640 = vmatpush3.bf16.msra.mxu0 %v2639_v56  ;;  %v1039_v56 = vld [vmem:[#allocation6 + $0x228] sm:$0xff]  ;;  %v2717_v38 = vpack.c.bf16 %v1089_v17, %v1088_v16  ;;  %v1073_v39 = vld [vmem:[#allocation6 + $0x338] sm:$0xff]  ;;  %v1092_v17 = vld [vmem:[#allocation6 + $0x3d0] sm:$0xff] }
  0x4a   :  { %2674 = vmatprep.subr.bf16.mxu0 %v2673_v60  ;;  %v2713_v60 = vpack.c.bf16 %v1087_v45, %v1086_v42  ;;  %v1090_v42 = vld [vmem:[#allocation6 + $0x3c0] sm:$0xff]  ;;  %v1091_v45 = vld [vmem:[#allocation6 + $0x3c8] sm:$0xff]  ;;  %v1061_v16 = vld [vmem:[#allocation6 + $0x2d8] sm:$0xff] }
  0x4b   :  { %2672 = vmatpush3.bf16.msra.mxu1 %v2671_v57  ;;  %v1070_v57 = vld [vmem:[#allocation6 + $0x320] sm:$0xff]  ;;  %v1095_v29 = vld [vmem:[#allocation6 + $0x3e8] sm:$0xff] }
  0x4c   :  { %2706 = vmatprep.subr.bf16.mxu1 %v2705_v3  ;;  %1170 = vmatmul.mubr.f32.vlgmr.msra.gmra.mrb[0].mxu0 %v962_v18  ;;  %v1056_v3 = vld [vmem:[#allocation6 + $0x2b0] sm:$0xff]  ;;  %v2683_v18 = vpack.c.bf16 %v1039_v56, %v1038_v55  ;;  %v1042_v56 = vld [vmem:[#allocation6 + $0x240] sm:$0xff] }
  0x4d   :  { %2676 = vmatpush3.bf16.msra.mxu0 %v2675_v21  ;;  %v2715_v21 = vpack.c.bf16 %v1071_v63, %v1070_v57  ;;  %v1043_v57 = vld [vmem:[#allocation6 + $0x248] sm:$0xff]  ;;  %v2721_v63 = vpack.c.bf16 %v1091_v45, %v1090_v42  ;;  %v1094_v45 = vld [vmem:[#allocation6 + $0x3e0] sm:$0xff] }
  0x4e   :  { %1240 = vmatmul.mubr.f32.vlgmr.msra.gmra.mrb[0].mxu1 %v964_v22  ;;  %2678 = vmatprep.subr.bf16.mxu0 %v2677_v26  ;;  %v2685_v22 = vpack.c.bf16 %v1057_v7, %v1056_v3  ;;  %v1041_v26 = vld [vmem:[#allocation6 + $0x238] sm:$0xff]  ;;  %v1075_v3 = vld [vmem:[#allocation6 + $0x348] sm:$0xff]  ;;  %v1060_v7 = vld [vmem:[#allocation6 + $0x2d0] sm:$0xff] }
  0x4f   :  { %2708 = vmatpush3.bf16.msra.mxu1 %v2707_v25  ;;  %v1040_v25 = vld [vmem:[#allocation6 + $0x230] sm:$0xff]  ;;  %v1063_v42 = vld [vmem:[#allocation6 + $0x2e8] sm:$0xff] }
  0x50   :  { %2710 = vmatprep.subr.bf16.mxu1 %v2709_v34  ;;  %v1059_v34 = vld [vmem:[#allocation6 + $0x2c8] sm:$0xff]  ;;  %v2687_v30 = vpack.c.bf16 %v1041_v26, %v1040_v25  ;;  %v2691_v25 = vpack.c.bf16 %v1043_v57, %v1042_v56  ;;  %v1044_v26 = vld [vmem:[#allocation6 + $0x250] sm:$0xff]  ;;  %v1078_v56 = vld [vmem:[#allocation6 + $0x360] sm:$0xff]  ;;  %v2729_v57 = vpack.c.bf16 %v1095_v29, %v1094_v45 }
  0x51   :  { %2680 = vmatpush3.bf16.msra.mxu0 %v2679_v48  ;;  %v967_v48 = vld [vmem:[%s4114_s22 + $0x28] sm:$0xff]  ;;  %v2689_v55 = vpack.c.bf16 %v1059_v34, %v1058_v41  ;;  %v103_v45 = vld [vmem:[#allocation9 + $0x88] sm:$0xff] }
  0x52   :  { %2682 = vmatprep.subr.bf16.mxu0 %v2681_v52  ;;  %v2719_v52 = vpack.c.bf16 %v1073_v39, %v1072_v33  ;;  %1309 = vmatprep.mubr.f32.mxu0 %v967_v48  ;;  %v1045_v33 = vld [vmem:[#allocation6 + $0x258] sm:$0xff]  ;;  %v1076_v39 = vld [vmem:[#allocation6 + $0x350] sm:$0xff]  ;;  %v1062_v34 = vld [vmem:[#allocation6 + $0x2e0] sm:$0xff] }
  0x53   :  { %2712 = vmatpush3.bf16.msra.mxu1 %v2711_v49  ;;  %v969_v49 = vld [vmem:[%s4114_s22 + $0x38] sm:$0xff]  ;;  %v2695_v48 = vpack.c.bf16 %v1045_v33, %v1044_v26 }
  0x54   :  { %2714 = vmatprep.subr.bf16.mxu1 %v2713_v60  ;;  %v1074_v60 = vld [vmem:[#allocation6 + $0x340] sm:$0xff]  ;;  %1379 = vmatprep.mubr.f32.mxu1 %v969_v49  ;;  %v2697_v49 = vpack.c.bf16 %v1063_v42, %v1062_v34  ;;  %v1080_v33 = vld [vmem:[#allocation6 + $0x370] sm:$0xff]  ;;  %v968_v34 = vld [vmem:[%s4114_s22 + $0x30] sm:$0xff] }
  0x55   :  { %2684 = vmatpush3.bf16.msra.mxu0 %v2683_v18  ;;  %v1093_v18 = vld [vmem:[#allocation6 + $0x3d8] sm:$0xff]  ;;  %v102_v42 = vld [vmem:[#allocation9 + $0x80] sm:$0xff] }
  0x56   :  { %2686 = vmatprep.subr.bf16.mxu0 %v2685_v22  ;;  %v2693_v22 = vpack.c.bf16 %v1061_v16, %v1060_v7  ;;  %v2725_v41 = vpack.c.bf16 %v1093_v18, %v1092_v17  ;;  %v1096_v7 = vld [vmem:[#allocation6 + $0x3f0] sm:$0xff]  ;;  %v1097_v16 = vld [vmem:[#allocation6 + $0x3f8] sm:$0xff] }
  0x57   :  { %2716 = vmatpush3.bf16.msra.mxu1 %v2715_v21  ;;  %v2723_v21 = vpack.c.bf16 %v1075_v3, %v1074_v60  ;;  %v1079_v60 = vld [vmem:[#allocation6 + $0x368] sm:$0xff]  ;;  %v1064_v3 = vld [vmem:[#allocation6 + $0x2f0] sm:$0xff]  ;;  %v2733_v26 = vpack.c.bf16 %v1097_v16, %v1096_v7 }
  0x58   :  { %2718 = vmatprep.subr.bf16.mxu1 %v2717_v38  ;;  %v1077_v38 = vld [vmem:[#allocation6 + $0x358] sm:$0xff]  ;;  %v2731_v18 = vpack.c.bf16 %v1079_v60, %v1078_v56  ;;  %v487_v56 = vmul.f32 0.001, %v3245_v1  ;;  %v4092_v60 = vmov 0.0|0.0   ;;  %v87_v7 = vld [vmem:[#allocation9 + $0x8] sm:$0xff]  ;;  %v1389_v1 = vld [vmem:[%s4076_s5 + $0x18] sm:$0xff] }
  0x59   :  { %2688 = vmatpush3.bf16.msra.mxu0 %v2687_v30  ;;  %v2727_v30 = vpack.c.bf16 %v1077_v38, %v1076_v39  ;;  %v1081_v39 = vld [vmem:[#allocation6 + $0x378] sm:$0xff] }
  0x5a   :  { %2690 = vmatprep.subr.bf16.mxu0 %v2689_v55  ;;  %v1047_v55 = vld [vmem:[#allocation6 + $0x268] sm:$0xff]  ;;  %v2735_v29 = vpack.c.bf16 %v1081_v39, %v1080_v33  ;;  %v966_v38 = vld [vmem:[%s4114_s22 + $0x20] sm:$0xff] }
  0x5b   :  { %2720 = vmatpush3.bf16.msra.mxu1 %v2719_v52  ;;  %v1046_v52 = vld [vmem:[#allocation6 + $0x260] sm:$0xff]  ;;  %v105_v39 = vld [vmem:[#allocation9 + $0x98] sm:$0xff] }
  0x5c   :  { %2722 = vmatprep.subr.bf16.mxu1 %v2721_v63  ;;  %v1065_v63 = vld [vmem:[#allocation6 + $0x2f8] sm:$0xff]  ;;  %v2699_v17 = vpack.c.bf16 %v1047_v55, %v1046_v52  ;;  %v1387_v55 = vld [vmem:[%s4076_s5 + $0x8] sm:$0xff] }
  0x5d   :  { %2692 = vmatpush3.bf16.msra.mxu0 %v2691_v25  ;;  %v2701_v25 = vpack.c.bf16 %v1065_v63, %v1064_v3  ;;  %v1386_v52 = vld [vmem:[%s4076_s5] sm:$0xff] }
  0x5e   :  { %2694 = vmatprep.subr.bf16.mxu0 %v2693_v22  ;;  %v1049_v22 = vld [vmem:[#allocation6 + $0x278] sm:$0xff]  ;;  %v2738_v3 = vpack.c.bf16 %v1387_v55, %v1386_v52 }
  0x5f   :  { %2724 = vmatpush3.bf16.msra.mxu1 %v2723_v21  ;;  %v1048_v21 = vld [vmem:[#allocation6 + $0x270] sm:$0xff] }
  0x60   :  { %2726 = vmatprep.subr.bf16.mxu1 %v2725_v41  ;;  %v2703_v41 = vpack.c.bf16 %v1049_v22, %v1048_v21  ;;  %v471_v21 = vmul.f32 0.001, %v3251_v4  ;;  %v104_v22 = vld [vmem:[#allocation9 + $0x90] sm:$0xff]  ;;  %v233_v4 = vmul.f32 0.999, %v105_v39 }
  0x61   :  { %2696 = vmatpush3.bf16.msra.mxu0 %v2695_v48  ;;  %v230_v48 = vmul.f32 0.999, %v102_v42  ;;  %v489_v42 = vmul.f32 0.001, %v3257_v13  ;;  %v1391_v13 = vld [vmem:[%s4076_s5 + $0x28] sm:$0xff] }
  0x62   :  { %2698 = vmatprep.subr.bf16.mxu0 %v2697_v49  ;;  %v486_v49 = vmul.f32 0.001, %v3243_v0  ;;  %v470_v0 = vmul.f32 0.001, %v3247_v2  ;;  %v488_v2 = vmul.f32 0.001, %v3255_v11 }
  0x63   :  { %2728 = vmatpush3.bf16.msra.mxu1 %v2727_v30  ;;  %v231_v30 = vmul.f32 0.999, %v103_v45  ;;  %v89_v45 = vld [vmem:[#allocation9 + $0x18] sm:$0xff]  ;;  %v472_v11 = vmul.f32 0.001, %v3259_v14  ;;  %v91_v14 = vld [vmem:[#allocation9 + $0x28] sm:$0xff] }
  0x64   :  { %2730 = vmatprep.subr.bf16.mxu1 %v2729_v57  ;;  %v86_v57 = vld [vmem:[#allocation9] sm:$0xff]  ;;  %v614_v63 = vadd.f32 %v486_v49, %v230_v48  ;;  %v1390_v48 = vld [vmem:[%s4076_s5 + $0x20] sm:$0xff]  ;;  %v217_v52 = vmul.f32 0.999, %v89_v45  ;;  %v219_v39 = vmul.f32 0.999, %v91_v14 }
  0x65   :  { %2700 = vmatpush3.bf16.msra.mxu0 %v2699_v17  ;;  %v214_v16 = vmul.f32 0.999, %v86_v57  ;;  %v1388_v17 = vld [vmem:[%s4076_s5 + $0x10] sm:$0xff]  ;;  %v473_v57 = vmul.f32 0.001, %v3261_v15 }
  0x66   :  { %2702 = vmatprep.subr.bf16.mxu0 %v2701_v25  ;;  %v215_v25 = vmul.f32 0.999, %v87_v7  ;;  %832 = vst [vmem:[#allocation11 + $0x80] sm:$0xff] %v614_v63  ;;  %v2741_v33 = vpack.c.bf16 %v1389_v1, %v1388_v17  ;;  %v490_v15 = vmul.f32 0.001, %v3267_v23 }
  0x67   :  { %2732 = vmatpush3.bf16.msra.mxu1 %v2731_v18  ;;  %v615_v18 = vadd.f32 %v487_v56, %v231_v30  ;;  %v617_v56 = vadd.f32 %v489_v42, %v233_v4  ;;  %v491_v1 = vmul.f32 0.001, %v3269_v24  ;;  %v475_v24 = vmul.f32 0.001, %v3275_v28  ;;  %v109_v4 = vld [vmem:[#allocation9 + $0xb8] sm:$0xff]  ;;  %v92_v42 = vld [vmem:[#allocation9 + $0x30] sm:$0xff] }
  0x68   :  { %2734 = vmatprep.subr.bf16.mxu1 %v2733_v26  ;;  %v598_v26 = vadd.f32 %v470_v0, %v214_v16  ;;  %v2744_v16 = vpack.c.bf16 %v1391_v13, %v1390_v48  ;;  %v220_v28 = vmul.f32 0.999, %v92_v42 }
  0x69   :  { %2704 = vmatpush3.bf16.msra.mxu0 %v2703_v41  ;;  %v232_v41 = vmul.f32 0.999, %v104_v22  ;;  %833 = vst [vmem:[#allocation11 + $0x88] sm:$0xff] %v615_v18  ;;  %835 = vst [vmem:[#allocation11 + $0x98] sm:$0xff] %v617_v56  ;;  %v1392_v22 = vld [vmem:[%s4076_s5 + $0x30] sm:$0xff] }
  0x6a   :  { %2737 = vmatprep.subr.bf16.mxu0 %v4092_v60  ;;  %816 = vst [vmem:[#allocation11] sm:$0xff] %v598_v26 }
  0x6b   :  { %2736 = vmatpush3.bf16.msra.mxu1 %v2735_v29  ;;  %v88_v29 = vld [vmem:[#allocation9 + $0x10] sm:$0xff]  ;;  %v616_v30 = vadd.f32 %v488_v2, %v232_v41  ;;  %v474_v41 = vmul.f32 0.001, %v3273_v27 }
  0x6c   :  { %1310 = vmatmul.mubr.f32.vlgmr.msra.gmra.mrb[2].mxu0 %v966_v38  ;;  %v2761_v38 = vpack.c.bf16 %v615_v18, %v614_v63  ;;  %v216_v49 = vmul.f32 0.999, %v88_v29  ;;  %v107_v63 = vld [vmem:[#allocation9 + $0xa8] sm:$0xff]  ;;  %v90_v18 = vld [vmem:[#allocation9 + $0x20] sm:$0xff] }
  0x6d   :  { %2739 = vmatpush3.bf16.msra.mxu0 %v2738_v3  ;;  %v106_v3 = vld [vmem:[#allocation9 + $0xa0] sm:$0xff]  ;;  %834 = vst [vmem:[#allocation11 + $0x90] sm:$0xff] %v616_v30  ;;  %v235_v17 = vmul.f32 0.999, %v107_v63 }
  0x6e   :  { %1380 = vmatmul.mubr.f32.vlgmr.msra.gmra.mrb[2].mxu1 %v968_v34  ;;  %v599_v34 = vadd.f32 %v471_v21, %v215_v25  ;;  %2740 = vmatprep.subr.bf16.mxu0 %v4092_v60  ;;  %v600_v7 = vadd.f32 %v472_v11, %v216_v49  ;;  %v234_v0 = vmul.f32 0.999, %v106_v3  ;;  %v2765_v25 = vpack.c.bf16 %v617_v56, %v616_v30  ;;  %v1394_v56 = vld [vmem:[%s4076_s5 + $0x40] sm:$0xff] }
  0x6f   :  { %2762 = vmatprep.subr.bf16.mxu1 %v2761_v38  ;;  %v601_v21 = vadd.f32 %v473_v57, %v217_v52  ;;  %v619_v38 = vadd.f32 %v491_v1, %v235_v17  ;;  %v237_v30 = vmul.f32 0.999, %v109_v4  ;;  %v492_v49 = vmul.f32 0.001, %v3279_v35  ;;  %v113_v4 = vld [vmem:[#allocation9 + $0xd8] sm:$0xff] }
  0x70   :  { %817 = vst [vmem:[#allocation11 + $0x8] sm:$0xff] %v599_v34  ;;  %v2763_v55 = vpack.c.bf16 %v599_v34, %v598_v26  ;;  %v1393_v26 = vld [vmem:[%s4076_s5 + $0x38] sm:$0xff]  ;;  %818 = vst [vmem:[#allocation11 + $0x10] sm:$0xff] %v600_v7  ;;  %v618_v23 = vadd.f32 %v490_v15, %v234_v0  ;;  %v603_v52 = vadd.f32 %v475_v24, %v219_v39  ;;  %v493_v11 = vmul.f32 0.001, %v3281_v36  ;;  %v1395_v36 = vld [vmem:[%s4076_s5 + $0x48] sm:$0xff] }
  0x71   :  { %2742 = vmatpush3.bf16.msra.mxu0 %v2741_v33  ;;  %v218_v33 = vmul.f32 0.999, %v90_v18  ;;  %v2747_v2 = vpack.c.bf16 %v1393_v26, %v1392_v22  ;;  %819 = vst [vmem:[#allocation11 + $0x18] sm:$0xff] %v601_v21  ;;  %v2767_v29 = vpack.c.bf16 %v601_v21, %v600_v7  ;;  %v108_v34 = vld [vmem:[#allocation9 + $0xb0] sm:$0xff]  ;;  %837 = vst [vmem:[#allocation11 + $0xa8] sm:$0xff] %v619_v38  ;;  %v111_v0 = vld [vmem:[#allocation9 + $0xc8] sm:$0xff] }
  0x72   :  { %2764 = vmatpush3.bf16.msra.mxu1 %v2763_v55  ;;  %2743 = vmatprep.subr.bf16.mxu0 %v4092_v60  ;;  %v236_v48 = vmul.f32 0.999, %v108_v34  ;;  %836 = vst [vmem:[#allocation11 + $0xa0] sm:$0xff] %v618_v23  ;;  %v2769_v27 = vpack.c.bf16 %v619_v38, %v618_v23  ;;  %v93_v55 = vld [vmem:[#allocation9 + $0x38] sm:$0xff]  ;;  %v476_v35 = vmul.f32 0.001, %v3283_v37  ;;  %v621_v7 = vadd.f32 %v493_v11, %v237_v30 }
  0x73   :  { %2766 = vmatprep.subr.bf16.mxu1 %v2765_v25  ;;  %v602_v45 = vadd.f32 %v474_v41, %v218_v33  ;;  %v221_v13 = vmul.f32 0.999, %v93_v55  ;;  %v477_v3 = vmul.f32 0.001, %v3287_v40  ;;  %821 = vst [vmem:[#allocation11 + $0x28] sm:$0xff] %v603_v52  ;;  %v2750_v25 = vpack.c.bf16 %v1395_v36, %v1394_v56  ;;  %v94_v21 = vld [vmem:[#allocation9 + $0x40] sm:$0xff] }
  0x74   :  { %v620_v57 = vadd.f32 %v492_v49, %v236_v48  ;;  %v494_v17 = vmul.f32 0.001, %v3289_v46  ;;  %v604_v18 = vadd.f32 %v476_v35, %v220_v28  ;;  %v95_v40 = vld [vmem:[#allocation9 + $0x48] sm:$0xff]  ;;  %839 = vst [vmem:[#allocation11 + $0xb8] sm:$0xff] %v621_v7  ;;  %v239_v22 = vmul.f32 0.999, %v111_v0 }
  0x75   :  { %2745 = vmatpush3.bf16.msra.mxu0 %v2744_v16  ;;  %820 = vst [vmem:[#allocation11 + $0x20] sm:$0xff] %v602_v45  ;;  %v2771_v63 = vpack.c.bf16 %v603_v52, %v602_v45  ;;  %v110_v16 = vld [vmem:[#allocation9 + $0xc0] sm:$0xff]  ;;  %v605_v14 = vadd.f32 %v477_v3, %v221_v13  ;;  %v1396_v15 = vld [vmem:[%s4076_s5 + $0x50] sm:$0xff]  ;;  %v495_v46 = vmul.f32 0.001, %v3291_v47  ;;  %v112_v23 = vld [vmem:[#allocation9 + $0xd0] sm:$0xff] }
  0x76   :  { %2768 = vmatpush3.bf16.msra.mxu1 %v2767_v29  ;;  %2746 = vmatprep.subr.bf16.mxu0 %v4092_v60  ;;  %838 = vst [vmem:[#allocation11 + $0xb0] sm:$0xff] %v620_v57  ;;  %v238_v37 = vmul.f32 0.999, %v110_v16  ;;  %v2773_v1 = vpack.c.bf16 %v621_v7, %v620_v57  ;;  %v222_v26 = vmul.f32 0.999, %v94_v21  ;;  %822 = vst [vmem:[#allocation11 + $0x30] sm:$0xff] %v604_v18 }
  0x77   :  { %2770 = vmatprep.subr.bf16.mxu1 %v2769_v27  ;;  %823 = vst [vmem:[#allocation11 + $0x38] sm:$0xff] %v605_v14  ;;  %v2775_v33 = vpack.c.bf16 %v605_v14, %v604_v18  ;;  %v223_v41 = vmul.f32 0.999, %v95_v40  ;;  %v1397_v29 = vld [vmem:[%s4076_s5 + $0x58] sm:$0xff]  ;;  %v623_v38 = vadd.f32 %v495_v46, %v239_v22  ;;  %v479_v24 = vmul.f32 0.001, %v3299_v54 }
  0x78   :  { %v622_v39 = vadd.f32 %v494_v17, %v238_v37  ;;  %v2753_v34 = vpack.c.bf16 %v1397_v29, %v1396_v15  ;;  %v240_v47 = vmul.f32 0.999, %v112_v23  ;;  %v241_v45 = vmul.f32 0.999, %v113_v4  ;;  %v96_v27 = vld [vmem:[#allocation9 + $0x50] sm:$0xff]  ;;  %v97_v52 = vld [vmem:[#allocation9 + $0x58] sm:$0xff] }
  0x79   :  { %2748 = vmatpush3.bf16.msra.mxu0 %v2747_v2  ;;  %v478_v2 = vmul.f32 0.001, %v3297_v53  ;;  %v496_v48 = vmul.f32 0.001, %v3301_v58  ;;  %v497_v53 = vmul.f32 0.001, %v3303_v59  ;;  %v607_v49 = vadd.f32 %v479_v24, %v223_v41 }
  0x7a   :  { %2772 = vmatpush3.bf16.msra.mxu1 %v2771_v63  ;;  %2749 = vmatprep.subr.bf16.mxu0 %v4092_v60  ;;  %840 = vst [vmem:[#allocation11 + $0xc0] sm:$0xff] %v622_v39  ;;  %841 = vst [vmem:[#allocation11 + $0xc8] sm:$0xff] %v623_v38  ;;  %v2777_v30 = vpack.c.bf16 %v623_v38, %v622_v39  ;;  %v480_v54 = vmul.f32 0.001, %v3309_v5  ;;  %v481_v11 = vmul.f32 0.001, %v3311_v6 }
  0x7b   :  { %2774 = vmatprep.subr.bf16.mxu1 %v2773_v1  ;;  %v606_v42 = vadd.f32 %v478_v2, %v222_v26  ;;  %v624_v55 = vadd.f32 %v496_v48, %v240_v47  ;;  %v625_v28 = vadd.f32 %v497_v53, %v241_v45  ;;  %v224_v56 = vmul.f32 0.999, %v96_v27  ;;  %825 = vst [vmem:[#allocation11 + $0x48] sm:$0xff] %v607_v49  ;;  %v114_v59 = vld [vmem:[#allocation9 + $0xe0] sm:$0xff]  ;;  %v115_v13 = vld [vmem:[#allocation9 + $0xe8] sm:$0xff]  ;;  %v1398_v18 = vld [vmem:[%s4076_s5 + $0x60] sm:$0xff] }
  0x7c   :  { %v225_v57 = vmul.f32 0.999, %v97_v52  ;;  %v242_v7 = vmul.f32 0.999, %v114_v59  ;;  %v98_v5 = vld [vmem:[#allocation9 + $0x60] sm:$0xff]  ;;  %v99_v36 = vld [vmem:[#allocation9 + $0x68] sm:$0xff] }
  0x7d   :  { %2751 = vmatpush3.bf16.msra.mxu0 %v2750_v25  ;;  %824 = vst [vmem:[#allocation11 + $0x40] sm:$0xff] %v606_v42  ;;  %v2779_v58 = vpack.c.bf16 %v607_v49, %v606_v42  ;;  %842 = vst [vmem:[#allocation11 + $0xd0] sm:$0xff] %v624_v55  ;;  %v2781_v35 = vpack.c.bf16 %v625_v28, %v624_v55  ;;  %v608_v3 = vadd.f32 %v480_v54, %v224_v56  ;;  %v1399_v14 = vld [vmem:[%s4076_s5 + $0x68] sm:$0xff]  ;;  %v117_v1 = vld [vmem:[#allocation9 + $0xf8] sm:$0xff] }
  0x7e   :  { %2776 = vmatpush3.bf16.msra.mxu1 %v2775_v33  ;;  %2752 = vmatprep.subr.bf16.mxu0 %v4092_v60  ;;  %843 = vst [vmem:[#allocation11 + $0xd8] sm:$0xff] %v625_v28  ;;  %v609_v63 = vadd.f32 %v481_v11, %v225_v57  ;;  %v243_v6 = vmul.f32 0.999, %v115_v13  ;;  %v498_v16 = vmul.f32 0.001, %v3313_v10  ;;  %v2756_v21 = vpack.c.bf16 %v1399_v14, %v1398_v18  ;;  %v100_v29 = vld [vmem:[#allocation9 + $0x70] sm:$0xff] }
  0x7f   :  { %2778 = vmatprep.subr.bf16.mxu1 %v2777_v30  ;;  %v499_v0 = vmul.f32 0.001, %v3315_v12  ;;  %826 = vst [vmem:[#allocation11 + $0x50] sm:$0xff] %v608_v3  ;;  %v226_v25 = vmul.f32 0.999, %v98_v5  ;;  %v116_v12 = vld [vmem:[#allocation9 + $0xf0] sm:$0xff] }
  0x80   :  { %827 = vst [vmem:[#allocation11 + $0x58] sm:$0xff] %v609_v63  ;;  %v2783_v17 = vpack.c.bf16 %v609_v63, %v608_v3  ;;  %v227_v37 = vmul.f32 0.999, %v99_v36  ;;  %v626_v40 = vadd.f32 %v498_v16, %v242_v7  ;;  %v482_v10 = vmul.f32 0.001, %v3319_v19  ;;  %v101_v23 = vld [vmem:[#allocation9 + $0x78] sm:$0xff] }
  0x81   :  { %2754 = vmatpush3.bf16.msra.mxu0 %v2753_v34  ;;  %v627_v15 = vadd.f32 %v499_v0, %v243_v6  ;;  %v483_v22 = vmul.f32 0.001, %v3321_v20  ;;  %v244_v46 = vmul.f32 0.999, %v116_v12  ;;  %v245_v26 = vmul.f32 0.999, %v117_v1 }
  0x82   :  { %2780 = vmatpush3.bf16.msra.mxu1 %v2779_v58  ;;  %2755 = vmatprep.subr.bf16.mxu0 %v4092_v60  ;;  %844 = vst [vmem:[#allocation11 + $0xe0] sm:$0xff] %v626_v40  ;;  %v610_v39 = vadd.f32 %v482_v10, %v226_v25  ;;  %v500_v41 = vmul.f32 0.001, %v3328_v31  ;;  %v501_v2 = vmul.f32 0.001, %v3330_v32  ;;  %v1400_v19 = vld [vmem:[%s4076_s5 + $0x70] sm:$0xff] }
  0x83   :  { %2782 = vmatprep.subr.bf16.mxu1 %v2781_v35  ;;  %845 = vst [vmem:[#allocation11 + $0xe8] sm:$0xff] %v627_v15  ;;  %v2785_v33 = vpack.c.bf16 %v627_v15, %v626_v40  ;;  %v611_v38 = vadd.f32 %v483_v22, %v227_v37  ;;  %v1401_v20 = vld [vmem:[%s4076_s5 + $0x78] sm:$0xff]  ;;  %v228_v24 = vmul.f32 0.999, %v100_v29  ;;  %v229_v34 = vmul.f32 0.999, %v101_v23 }
  0x84   :  { %828 = vst [vmem:[#allocation11 + $0x60] sm:$0xff] %v610_v39  ;;  %v2759_v31 = vpack.c.bf16 %v1401_v20, %v1400_v19  ;;  %v628_v4 = vadd.f32 %v500_v41, %v244_v46  ;;  %v629_v32 = vadd.f32 %v501_v2, %v245_v26  ;;  %v484_v47 = vmul.f32 0.001, %v3339_v43  ;;  %v134_v42 = vld [vmem:[#allocation9 + $0x180] sm:$0xff]  ;;  %v135_v45 = vld [vmem:[#allocation9 + $0x188] sm:$0xff]  ;;  %v1479_v10 = vld [vmem:[%s4073_s2] sm:$0xff] }
  0x85   :  { %2757 = vmatpush3.bf16.msra.mxu0 %v2756_v21  ;;  %v390_v48 = vld [vmem:[#allocation6 + $0x180] sm:$0xff]  ;;  %829 = vst [vmem:[#allocation11 + $0x68] sm:$0xff] %v611_v38  ;;  %v2787_v53 = vpack.c.bf16 %v611_v38, %v610_v39  ;;  %v485_v30 = vmul.f32 0.001, %v3341_v44  ;;  %v262_v49 = vmul.f32 0.999, %v134_v42 }
  0x86   :  { %2784 = vmatpush3.bf16.msra.mxu1 %v2783_v17  ;;  %2758 = vmatprep.subr.bf16.mxu0 %v4092_v60  ;;  %v263_v27 = vmul.f32 0.999, %v135_v45  ;;  %846 = vst [vmem:[#allocation11 + $0xf0] sm:$0xff] %v628_v4  ;;  %847 = vst [vmem:[#allocation11 + $0xf8] sm:$0xff] %v629_v32  ;;  %v2789_v52 = vpack.c.bf16 %v629_v32, %v628_v4  ;;  %v612_v54 = vadd.f32 %v484_v47, %v228_v24  ;;  %v391_v11 = vld [vmem:[#allocation6 + $0x188] sm:$0xff]  ;;  %v118_v28 = vld [vmem:[#allocation9 + $0x100] sm:$0xff] }
  0x87   :  { %2786 = vmatprep.subr.bf16.mxu1 %v2785_v33  ;;  %v518_v55 = vmul.f32 0.001, %v390_v48  ;;  %v119_v56 = vld [vmem:[#allocation9 + $0x108] sm:$0xff]  ;;  %v613_v43 = vadd.f32 %v485_v30, %v229_v34  ;;  %v519_v57 = vmul.f32 0.001, %v391_v11  ;;  %v374_v44 = vld [vmem:[#allocation6 + $0x100] sm:$0xff] }
  0x88   :  { %v246_v58 = vmul.f32 0.999, %v118_v28  ;;  %v247_v59 = vmul.f32 0.999, %v119_v56  ;;  %830 = vst [vmem:[#allocation11 + $0x70] sm:$0xff] %v612_v54  ;;  %v375_v35 = vld [vmem:[#allocation6 + $0x108] sm:$0xff] }
  0x89   :  { %2760 = vmatpush3.bf16.msra.mxu0 %v2759_v31  ;;  %v646_v13 = vadd.f32 %v518_v55, %v262_v49  ;;  %v166_v3 = vld [vmem:[#allocation9 + $0x280] sm:$0xff]  ;;  %831 = vst [vmem:[#allocation11 + $0x78] sm:$0xff] %v613_v43  ;;  %v2791_v63 = vpack.c.bf16 %v613_v43, %v612_v54  ;;  %v3119_v7 = vmov 0.0   ;;  %v647_v5 = vadd.f32 %v519_v57, %v263_v27  ;;  %v167_v16 = vld [vmem:[#allocation9 + $0x288] sm:$0xff]  ;;  %v136_v39 = vld [vmem:[#allocation9 + $0x190] sm:$0xff] }
  0x8a   :  { %2788 = vmatpush3.bf16.msra.mxu1 %v2787_v53  ;;  %2571 = vmatprep.mubr.msk.f32.mxu0 %vm3118_vm0, %v3119_v7  ;;  %v502_v36 = vmul.f32 0.001, %v374_v44  ;;  %v503_v6 = vmul.f32 0.001, %v375_v35  ;;  %v150_v0 = vld [vmem:[#allocation9 + $0x200] sm:$0xff]  ;;  %v151_v12 = vld [vmem:[#allocation9 + $0x208] sm:$0xff] }
  0x8b   :  { %2790 = vmatprep.subr.bf16.mxu1 %v2789_v52  ;;  %864 = vst [vmem:[#allocation11 + $0x180] sm:$0xff] %v646_v13  ;;  %v294_v17 = vmul.f32 0.999, %v166_v3  ;;  %v295_v18 = vmul.f32 0.999, %v167_v16  ;;  %865 = vst [vmem:[#allocation11 + $0x188] sm:$0xff] %v647_v5  ;;  %v2793_v25 = vpack.c.bf16 %v647_v5, %v646_v13 }
  0x8c   :  { %v550_v14 = vmul.f32 0.001, %v3343_v50  ;;  %v3478_v37 = vadd.f32 %v502_v36, %v246_v58  ;;  %v3480_v21 = vadd.f32 %v503_v6, %v247_v59  ;;  %v1480_v40 = vld [vmem:[%s4073_s2 + $0x8] sm:$0xff]  ;;  %v551_v15 = vmul.f32 0.001, %v3345_v51  ;;  %v137_v41 = vld [vmem:[#allocation9 + $0x198] sm:$0xff] }
  0x8d   :  { %1557 = vmatprep.mubr.f32.mxu1 %v1480_v40  ;;  %v278_v1 = vmul.f32 0.999, %v150_v0  ;;  %v279_v22 = vmul.f32 0.999, %v151_v12  ;;  %v534_v46 = vmul.f32 0.001, %v3351_v61  ;;  %2794 = vmatprep.subr.bf16.mxu0 %v2793_v25 }
  0x8e   :  { %2792 = vmatpush3.bf16.msra.mxu1 %v2791_v63  ;;  %v678_v50 = vadd.f32 %v550_v14, %v294_v17  ;;  %848 = vst [vmem:[#allocation11 + $0x100] sm:$0xff] %v3478_v37  ;;  %849 = vst [vmem:[#allocation11 + $0x108] sm:$0xff] %v3480_v21  ;;  %v679_v51 = vadd.f32 %v551_v15, %v295_v18  ;;  %v535_v33 = vmul.f32 0.001, %v3353_v62  ;;  %v392_v2 = vld [vmem:[#allocation6 + $0x190] sm:$0xff]  ;;  %v393_v61 = vld [vmem:[#allocation6 + $0x198] sm:$0xff] }
  0x8f   :  { %v662_v29 = vadd.f32 %v534_v46, %v278_v1  ;;  %v264_v23 = vmul.f32 0.999, %v136_v39  ;;  %v265_v38 = vmul.f32 0.999, %v137_v41  ;;  %v120_v19 = vld [vmem:[#allocation9 + $0x110] sm:$0xff]  ;;  %v121_v4 = vld [vmem:[#allocation9 + $0x118] sm:$0xff] }
  0x90   :  { %896 = vst [vmem:[#allocation11 + $0x280] sm:$0xff] %v678_v50  ;;  %897 = vst [vmem:[#allocation11 + $0x288] sm:$0xff] %v679_v51  ;;  %v2825_v20 = vpack.c.bf16 %v679_v51, %v678_v50  ;;  %v663_v24 = vadd.f32 %v535_v33, %v279_v22  ;;  %v520_v34 = vmul.f32 0.001, %v392_v2  ;;  %v521_v31 = vmul.f32 0.001, %v393_v61 }
  0x91   :  { %1558 = vmatmul.mubr.f32.vlgmr.msra.gmra.mrb[4].mxu1 %v1479_v10  ;;  %v376_v32 = vld [vmem:[#allocation6 + $0x110] sm:$0xff]  ;;  %880 = vst [vmem:[#allocation11 + $0x200] sm:$0xff] %v662_v29  ;;  %v248_v47 = vmul.f32 0.999, %v120_v19  ;;  %v249_v62 = vmul.f32 0.999, %v121_v4 }
  0x92   :  { %v377_v42 = vld [vmem:[#allocation6 + $0x118] sm:$0xff]  ;;  %v168_v45 = vld [vmem:[#allocation9 + $0x290] sm:$0xff]  ;;  %2826 = vmatprep.subr.bf16.mxu1 %v2825_v20  ;;  %881 = vst [vmem:[#allocation11 + $0x208] sm:$0xff] %v663_v24  ;;  %v2827_v48 = vpack.c.bf16 %v663_v24, %v662_v29  ;;  %v3495_v53 = vadd.f32 %v520_v34, %v264_v23  ;;  %v3497_v30 = vadd.f32 %v521_v31, %v265_v38  ;;  %v504_v49 = vmul.f32 0.001, %v376_v32  ;;  %v138_v59 = vld [vmem:[#allocation9 + $0x1a0] sm:$0xff] }
  0x93   :  { %v169_v27 = vld [vmem:[#allocation9 + $0x298] sm:$0xff]  ;;  %v152_v52 = vld [vmem:[#allocation9 + $0x210] sm:$0xff]  ;;  %v505_v11 = vmul.f32 0.001, %v377_v42  ;;  %v296_v55 = vmul.f32 0.999, %v168_v45 }
  0x94   :  { %v153_v54 = vld [vmem:[#allocation9 + $0x218] sm:$0xff]  ;;  %v297_v28 = vmul.f32 0.999, %v169_v27  ;;  %2828 = vmatpush3.bf16.msra.mxu1 %v2827_v48  ;;  %866 = vst [vmem:[#allocation11 + $0x190] sm:$0xff] %v3495_v53  ;;  %867 = vst [vmem:[#allocation11 + $0x198] sm:$0xff] %v3497_v30  ;;  %v3503_v43 = vadd.f32 %v504_v49, %v248_v47  ;;  %v139_v13 = vld [vmem:[#allocation9 + $0x1a8] sm:$0xff] }
  0x95   :  { %v552_v57 = vmul.f32 0.001, %v3355_v8  ;;  %v553_v58 = vmul.f32 0.001, %v3357_v9  ;;  %v3507_v44 = vadd.f32 %v505_v11, %v249_v62  ;;  %v280_v35 = vmul.f32 0.999, %v152_v52 }
  0x96   :  { %v281_v3 = vmul.f32 0.999, %v153_v54  ;;  %v4117_v63 = vld [vmem:[#allocation23_spill] sm:$0xff]  ;;  %850 = vst [vmem:[#allocation11 + $0x110] sm:$0xff] %v3503_v43  ;;  %v4118_v16 = vld [vmem:[#allocation24_spill] sm:$0xff]  ;;  %v140_v11 = vld [vmem:[#allocation9 + $0x1b0] sm:$0xff] }
  0x97   :  { %v536_v5 = vmul.f32 0.001, %v4117_v63  ;;  %v680_v36 = vadd.f32 %v552_v57, %v296_v55  ;;  %v681_v6 = vadd.f32 %v553_v58, %v297_v28  ;;  %v537_v0 = vmul.f32 0.001, %v4118_v16  ;;  %v394_v18 = vld [vmem:[#allocation6 + $0x1a0] sm:$0xff]  ;;  %v395_v14 = vld [vmem:[#allocation6 + $0x1a8] sm:$0xff] }
  0x98   :  { %v266_v17 = vmul.f32 0.999, %v138_v59  ;;  %851 = vst [vmem:[#allocation11 + $0x118] sm:$0xff] %v3507_v44  ;;  %v267_v25 = vmul.f32 0.999, %v139_v13  ;;  %v122_v15 = vld [vmem:[#allocation9 + $0x120] sm:$0xff] }
  0x99   :  { %v664_v9 = vadd.f32 %v536_v5, %v280_v35  ;;  %v522_v40 = vmul.f32 0.001, %v394_v18  ;;  %v123_v10 = vld [vmem:[#allocation9 + $0x128] sm:$0xff]  ;;  %898 = vst [vmem:[#allocation11 + $0x290] sm:$0xff] %v680_v36  ;;  %899 = vst [vmem:[#allocation11 + $0x298] sm:$0xff] %v681_v6  ;;  %v2829_v12 = vpack.c.bf16 %v681_v6, %v680_v36  ;;  %v665_v50 = vadd.f32 %v537_v0, %v281_v3  ;;  %v378_v46 = vld [vmem:[#allocation6 + $0x120] sm:$0xff] }
  0x9a   :  { %v523_v1 = vmul.f32 0.001, %v395_v14  ;;  %v250_v22 = vmul.f32 0.999, %v122_v15  ;;  %v379_v51 = vld [vmem:[#allocation6 + $0x128] sm:$0xff]  ;;  %v170_v38 = vld [vmem:[#allocation9 + $0x2a0] sm:$0xff] }
  0x9b   :  { %882 = vst [vmem:[#allocation11 + $0x210] sm:$0xff] %v664_v9  ;;  %v3515_v33 = vadd.f32 %v522_v40, %v266_v17  ;;  %v251_v39 = vmul.f32 0.999, %v123_v10  ;;  %v506_v41 = vmul.f32 0.001, %v378_v46  ;;  %2830 = vmatprep.subr.bf16.mxu1 %v2829_v12  ;;  %883 = vst [vmem:[#allocation11 + $0x218] sm:$0xff] %v665_v50  ;;  %v2831_v29 = vpack.c.bf16 %v665_v50, %v664_v9 }
  0x9c   :  { %v507_v2 = vmul.f32 0.001, %v379_v51  ;;  %v3517_v23 = vadd.f32 %v523_v1, %v267_v25  ;;  %v171_v61 = vld [vmem:[#allocation9 + $0x2a8] sm:$0xff]  ;;  %v426_v19 = vld [vmem:[#allocation6 + $0x2a0] sm:$0xff]  ;;  %v298_v34 = vmul.f32 0.999, %v170_v38 }
  0x9d   :  { %868 = vst [vmem:[#allocation11 + $0x1a0] sm:$0xff] %v3515_v33  ;;  %v3520_v20 = vadd.f32 %v506_v41, %v250_v22  ;;  %v299_v31 = vmul.f32 0.999, %v171_v61  ;;  %v427_v4 = vld [vmem:[#allocation6 + $0x2a8] sm:$0xff]  ;;  %v154_v32 = vld [vmem:[#allocation9 + $0x220] sm:$0xff]  ;;  %2832 = vmatpush3.bf16.msra.mxu1 %v2831_v29  ;;  %v141_v59 = vld [vmem:[#allocation9 + $0x1b8] sm:$0xff] }
  0x9e   :  { %v3522_v24 = vadd.f32 %v507_v2, %v251_v39  ;;  %869 = vst [vmem:[#allocation11 + $0x1a8] sm:$0xff] %v3517_v23  ;;  %v554_v62 = vmul.f32 0.001, %v426_v19  ;;  %v555_v42 = vmul.f32 0.001, %v427_v4  ;;  %v155_v45 = vld [vmem:[#allocation9 + $0x228] sm:$0xff] }
  0x9f   :  { %v410_v48 = vld [vmem:[#allocation6 + $0x220] sm:$0xff]  ;;  %852 = vst [vmem:[#allocation11 + $0x120] sm:$0xff] %v3520_v20  ;;  %v282_v27 = vmul.f32 0.999, %v154_v32  ;;  %v283_v52 = vmul.f32 0.999, %v155_v45 }
  0xa0   :  { %853 = vst [vmem:[#allocation11 + $0x128] sm:$0xff] %v3522_v24  ;;  %v411_v54 = vld [vmem:[#allocation6 + $0x228] sm:$0xff]  ;;  %v682_v55 = vadd.f32 %v554_v62, %v298_v34  ;;  %v683_v28 = vadd.f32 %v555_v42, %v299_v31  ;;  %v538_v57 = vmul.f32 0.001, %v410_v48  ;;  %v396_v13 = vld [vmem:[#allocation6 + $0x1b0] sm:$0xff]  ;;  %v397_v63 = vld [vmem:[#allocation6 + $0x1b8] sm:$0xff] }
  0xa1   :  { %v539_v58 = vmul.f32 0.001, %v411_v54  ;;  %v268_v35 = vmul.f32 0.999, %v140_v11  ;;  %v269_v3 = vmul.f32 0.999, %v141_v59 }
  0xa2   :  { %v124_v5 = vld [vmem:[#allocation9 + $0x130] sm:$0xff]  ;;  %900 = vst [vmem:[#allocation11 + $0x2a0] sm:$0xff] %v682_v55  ;;  %901 = vst [vmem:[#allocation11 + $0x2a8] sm:$0xff] %v683_v28  ;;  %v2833_v36 = vpack.c.bf16 %v683_v28, %v682_v55  ;;  %v666_v6 = vadd.f32 %v538_v57, %v282_v27  ;;  %v524_v0 = vmul.f32 0.001, %v396_v13  ;;  %v125_v17 = vld [vmem:[#allocation9 + $0x138] sm:$0xff] }
  0xa3   :  { %v667_v16 = vadd.f32 %v539_v58, %v283_v52  ;;  %v380_v18 = vld [vmem:[#allocation6 + $0x130] sm:$0xff]  ;;  %v381_v14 = vld [vmem:[#allocation6 + $0x138] sm:$0xff]  ;;  %v525_v9 = vmul.f32 0.001, %v397_v63  ;;  %v252_v25 = vmul.f32 0.999, %v124_v5 }
  0xa4   :  { %v253_v40 = vmul.f32 0.999, %v125_v17  ;;  %2834 = vmatprep.subr.bf16.mxu1 %v2833_v36  ;;  %884 = vst [vmem:[#allocation11 + $0x220] sm:$0xff] %v666_v6  ;;  %v3531_v10 = vadd.f32 %v524_v0, %v268_v35  ;;  %v508_v12 = vmul.f32 0.001, %v380_v18  ;;  %v172_v1 = vld [vmem:[#allocation9 + $0x2b0] sm:$0xff] }
  0xa5   :  { %885 = vst [vmem:[#allocation11 + $0x228] sm:$0xff] %v667_v16  ;;  %v2835_v15 = vpack.c.bf16 %v667_v16, %v666_v6  ;;  %v509_v50 = vmul.f32 0.001, %v381_v14  ;;  %v173_v22 = vld [vmem:[#allocation9 + $0x2b8] sm:$0xff]  ;;  %v3533_v46 = vadd.f32 %v525_v9, %v269_v3  ;;  %v300_v51 = vmul.f32 0.999, %v172_v1 }
  0xa6   :  { %v301_v39 = vmul.f32 0.999, %v173_v22  ;;  %v428_v41 = vld [vmem:[#allocation6 + $0x2b0] sm:$0xff]  ;;  %v429_v2 = vld [vmem:[#allocation6 + $0x2b8] sm:$0xff]  ;;  %870 = vst [vmem:[#allocation11 + $0x1b0] sm:$0xff] %v3531_v10  ;;  %v3536_v29 = vadd.f32 %v508_v12, %v252_v25  ;;  %v142_v11 = vld [vmem:[#allocation9 + $0x1c0] sm:$0xff] }
  0xa7   :  { %2836 = vmatpush3.bf16.msra.mxu1 %v2835_v15  ;;  %v3538_v38 = vadd.f32 %v509_v50, %v253_v40  ;;  %v556_v61 = vmul.f32 0.001, %v428_v41  ;;  %v557_v19 = vmul.f32 0.001, %v429_v2  ;;  %v156_v34 = vld [vmem:[#allocation9 + $0x230] sm:$0xff]  ;;  %v157_v31 = vld [vmem:[#allocation9 + $0x238] sm:$0xff] }
  0xa8   :  { %871 = vst [vmem:[#allocation11 + $0x1b8] sm:$0xff] %v3533_v46  ;;  %v284_v32 = vmul.f32 0.999, %v156_v34  ;;  %v285_v62 = vmul.f32 0.999, %v157_v31  ;;  %v412_v42 = vld [vmem:[#allocation6 + $0x230] sm:$0xff] }
  0xa9   :  { %v413_v45 = vld [vmem:[#allocation6 + $0x238] sm:$0xff]  ;;  %854 = vst [vmem:[#allocation11 + $0x130] sm:$0xff] %v3536_v29  ;;  %855 = vst [vmem:[#allocation11 + $0x138] sm:$0xff] %v3538_v38  ;;  %v684_v27 = vadd.f32 %v556_v61, %v300_v51  ;;  %v685_v52 = vadd.f32 %v557_v19, %v301_v39  ;;  %v540_v54 = vmul.f32 0.001, %v412_v42  ;;  %v143_v55 = vld [vmem:[#allocation9 + $0x1c8] sm:$0xff] }
  0xaa   :  { %v398_v28 = vld [vmem:[#allocation6 + $0x1c0] sm:$0xff]  ;;  %v541_v57 = vmul.f32 0.001, %v413_v45  ;;  %v270_v58 = vmul.f32 0.999, %v142_v11  ;;  %v399_v3 = vld [vmem:[#allocation6 + $0x1c8] sm:$0xff] }
  0xab   :  { %v271_v59 = vmul.f32 0.999, %v143_v55  ;;  %902 = vst [vmem:[#allocation11 + $0x2b0] sm:$0xff] %v684_v27  ;;  %903 = vst [vmem:[#allocation11 + $0x2b8] sm:$0xff] %v685_v52  ;;  %v2837_v13 = vpack.c.bf16 %v685_v52, %v684_v27  ;;  %v668_v35 = vadd.f32 %v540_v54, %v284_v32  ;;  %v526_v63 = vmul.f32 0.001, %v398_v28 }
  0xac   :  { %v126_v5 = vld [vmem:[#allocation9 + $0x140] sm:$0xff]  ;;  %v127_v36 = vld [vmem:[#allocation9 + $0x148] sm:$0xff]  ;;  %v669_v6 = vadd.f32 %v541_v57, %v285_v62  ;;  %v527_v16 = vmul.f32 0.001, %v399_v3  ;;  %v144_v57 = vld [vmem:[#allocation9 + $0x1d0] sm:$0xff] }
  0xad   :  { %v254_v0 = vmul.f32 0.999, %v126_v5  ;;  %v255_v17 = vmul.f32 0.999, %v127_v36  ;;  %2838 = vmatprep.subr.bf16.mxu1 %v2837_v13  ;;  %886 = vst [vmem:[#allocation11 + $0x230] sm:$0xff] %v668_v35  ;;  %v3547_v18 = vadd.f32 %v526_v63, %v270_v58  ;;  %v382_v14 = vld [vmem:[#allocation6 + $0x140] sm:$0xff] }
  0xae   :  { %v383_v9 = vld [vmem:[#allocation6 + $0x148] sm:$0xff]  ;;  %v174_v25 = vld [vmem:[#allocation9 + $0x2c0] sm:$0xff]  ;;  %887 = vst [vmem:[#allocation11 + $0x238] sm:$0xff] %v669_v6  ;;  %v2839_v40 = vpack.c.bf16 %v669_v6, %v668_v35  ;;  %v3549_v15 = vadd.f32 %v527_v16, %v271_v59  ;;  %v510_v12 = vmul.f32 0.001, %v382_v14  ;;  %v145_v58 = vld [vmem:[#allocation9 + $0x1d8] sm:$0xff] }
  0xaf   :  { %v511_v50 = vmul.f32 0.001, %v383_v9  ;;  %v175_v1 = vld [vmem:[#allocation9 + $0x2c8] sm:$0xff]  ;;  %v430_v22 = vld [vmem:[#allocation6 + $0x2c0] sm:$0xff]  ;;  %872 = vst [vmem:[#allocation11 + $0x1c0] sm:$0xff] %v3547_v18  ;;  %v400_v3 = vld [vmem:[#allocation6 + $0x1d0] sm:$0xff] }
  0xb0   :  { %v302_v51 = vmul.f32 0.999, %v174_v25  ;;  %v303_v39 = vmul.f32 0.999, %v175_v1  ;;  %v431_v41 = vld [vmem:[#allocation6 + $0x2c8] sm:$0xff]  ;;  %v158_v2 = vld [vmem:[#allocation9 + $0x240] sm:$0xff]  ;;  %2840 = vmatpush3.bf16.msra.mxu1 %v2839_v40  ;;  %v3555_v19 = vadd.f32 %v510_v12, %v254_v0 }
  0xb1   :  { %873 = vst [vmem:[#allocation11 + $0x1c8] sm:$0xff] %v3549_v15  ;;  %v3557_v34 = vadd.f32 %v511_v50, %v255_v17  ;;  %v558_v31 = vmul.f32 0.001, %v430_v22  ;;  %v159_v32 = vld [vmem:[#allocation9 + $0x248] sm:$0xff]  ;;  %v414_v62 = vld [vmem:[#allocation6 + $0x240] sm:$0xff]  ;;  %v401_v63 = vld [vmem:[#allocation6 + $0x1d8] sm:$0xff] }
  0xb2   :  { %v415_v42 = vld [vmem:[#allocation6 + $0x248] sm:$0xff]  ;;  %v559_v45 = vmul.f32 0.001, %v431_v41  ;;  %v286_v27 = vmul.f32 0.999, %v158_v2  ;;  %856 = vst [vmem:[#allocation11 + $0x140] sm:$0xff] %v3555_v19 }
  0xb3   :  { %v287_v52 = vmul.f32 0.999, %v159_v32  ;;  %857 = vst [vmem:[#allocation11 + $0x148] sm:$0xff] %v3557_v34  ;;  %v686_v11 = vadd.f32 %v558_v31, %v302_v51  ;;  %v542_v55 = vmul.f32 0.001, %v414_v62  ;;  %v128_v0 = vld [vmem:[#allocation9 + $0x150] sm:$0xff] }
  0xb4   :  { %v543_v28 = vmul.f32 0.001, %v415_v42  ;;  %v687_v59 = vadd.f32 %v559_v45, %v303_v39  ;;  %v272_v13 = vmul.f32 0.999, %v144_v57  ;;  %v273_v35 = vmul.f32 0.999, %v145_v58 }
  0xb5   :  { %904 = vst [vmem:[#allocation11 + $0x2c0] sm:$0xff] %v686_v11  ;;  %v670_v5 = vadd.f32 %v542_v55, %v286_v27  ;;  %v528_v6 = vmul.f32 0.001, %v400_v3  ;;  %v529_v16 = vmul.f32 0.001, %v401_v63  ;;  %v129_v17 = vld [vmem:[#allocation9 + $0x158] sm:$0xff] }
  0xb6   :  { %v671_v36 = vadd.f32 %v543_v28, %v287_v52  ;;  %905 = vst [vmem:[#allocation11 + $0x2c8] sm:$0xff] %v687_v59  ;;  %v2841_v14 = vpack.c.bf16 %v687_v59, %v686_v11  ;;  %v256_v9 = vmul.f32 0.999, %v128_v0  ;;  %v257_v25 = vmul.f32 0.999, %v129_v17  ;;  %v384_v40 = vld [vmem:[#allocation6 + $0x150] sm:$0xff] }
  0xb7   :  { %v385_v12 = vld [vmem:[#allocation6 + $0x158] sm:$0xff]  ;;  %888 = vst [vmem:[#allocation11 + $0x240] sm:$0xff] %v670_v5  ;;  %v3563_v1 = vadd.f32 %v528_v6, %v272_v13  ;;  %v3565_v22 = vadd.f32 %v529_v16, %v273_v35  ;;  %v512_v51 = vmul.f32 0.001, %v384_v40  ;;  %v176_v39 = vld [vmem:[#allocation9 + $0x2d0] sm:$0xff]  ;;  %v146_v63 = vld [vmem:[#allocation9 + $0x1e0] sm:$0xff] }
  0xb8   :  { %889 = vst [vmem:[#allocation11 + $0x248] sm:$0xff] %v671_v36  ;;  %v2843_v50 = vpack.c.bf16 %v671_v36, %v670_v5  ;;  %v177_v41 = vld [vmem:[#allocation9 + $0x2d8] sm:$0xff]  ;;  %v432_v2 = vld [vmem:[#allocation6 + $0x2d0] sm:$0xff]  ;;  %2842 = vmatprep.subr.bf16.mxu1 %v2841_v14  ;;  %v513_v31 = vmul.f32 0.001, %v385_v12  ;;  %v147_v0 = vld [vmem:[#allocation9 + $0x1e8] sm:$0xff] }
  0xb9   :  { %v304_v32 = vmul.f32 0.999, %v176_v39  ;;  %v305_v62 = vmul.f32 0.999, %v177_v41  ;;  %874 = vst [vmem:[#allocation11 + $0x1d0] sm:$0xff] %v3563_v1  ;;  %875 = vst [vmem:[#allocation11 + $0x1d8] sm:$0xff] %v3565_v22  ;;  %v3571_v45 = vadd.f32 %v512_v51, %v256_v9 }
  0xba   :  { %2844 = vmatpush3.bf16.msra.mxu1 %v2843_v50  ;;  %v433_v27 = vld [vmem:[#allocation6 + $0x2d8] sm:$0xff]  ;;  %v560_v52 = vmul.f32 0.001, %v432_v2  ;;  %v160_v11 = vld [vmem:[#allocation9 + $0x250] sm:$0xff]  ;;  %v3573_v28 = vadd.f32 %v513_v31, %v257_v25  ;;  %v402_v17 = vld [vmem:[#allocation6 + $0x1e0] sm:$0xff] }
  0xbb   :  { %v161_v55 = vld [vmem:[#allocation9 + $0x258] sm:$0xff]  ;;  %v561_v57 = vmul.f32 0.001, %v433_v27  ;;  %v288_v58 = vmul.f32 0.999, %v160_v11  ;;  %858 = vst [vmem:[#allocation11 + $0x150] sm:$0xff] %v3571_v45 }
  0xbc   :  { %v289_v59 = vmul.f32 0.999, %v161_v55  ;;  %v688_v13 = vadd.f32 %v560_v52, %v304_v32  ;;  %v416_v35 = vld [vmem:[#allocation6 + $0x250] sm:$0xff]  ;;  %v417_v3 = vld [vmem:[#allocation6 + $0x258] sm:$0xff]  ;;  %859 = vst [vmem:[#allocation11 + $0x158] sm:$0xff] %v3573_v28  ;;  %v403_v25 = vld [vmem:[#allocation6 + $0x1e8] sm:$0xff] }
  0xbd   :  { %v689_v36 = vadd.f32 %v561_v57, %v305_v62  ;;  %v544_v6 = vmul.f32 0.001, %v416_v35  ;;  %v545_v16 = vmul.f32 0.001, %v417_v3  ;;  %v274_v14 = vmul.f32 0.999, %v146_v63 }
  0xbe   :  { %906 = vst [vmem:[#allocation11 + $0x2d0] sm:$0xff] %v688_v13  ;;  %v275_v9 = vmul.f32 0.999, %v147_v0  ;;  %v130_v40 = vld [vmem:[#allocation9 + $0x160] sm:$0xff]  ;;  %v530_v39 = vmul.f32 0.001, %v402_v17 }
  0xbf   :  { %907 = vst [vmem:[#allocation11 + $0x2d8] sm:$0xff] %v689_v36  ;;  %v2845_v12 = vpack.c.bf16 %v689_v36, %v688_v13  ;;  %v672_v50 = vadd.f32 %v544_v6, %v288_v58  ;;  %v673_v51 = vadd.f32 %v545_v16, %v289_v59  ;;  %v131_v41 = vld [vmem:[#allocation9 + $0x168] sm:$0xff]  ;;  %v386_v2 = vld [vmem:[#allocation6 + $0x160] sm:$0xff]  ;;  %v531_v32 = vmul.f32 0.001, %v403_v25  ;;  %v192_v56 = vld [vmem:[#allocation9 + $0x350] sm:$0xff] }
  0xc0   :  { %v387_v31 = vld [vmem:[#allocation6 + $0x168] sm:$0xff]  ;;  %v258_v27 = vmul.f32 0.999, %v130_v40  ;;  %v259_v62 = vmul.f32 0.999, %v131_v41  ;;  %v3579_v11 = vadd.f32 %v530_v39, %v274_v14  ;;  %v178_v35 = vld [vmem:[#allocation9 + $0x2e0] sm:$0xff] }
  0xc1   :  { %2846 = vmatprep.subr.bf16.mxu1 %v2845_v12  ;;  %890 = vst [vmem:[#allocation11 + $0x250] sm:$0xff] %v672_v50  ;;  %891 = vst [vmem:[#allocation11 + $0x258] sm:$0xff] %v673_v51  ;;  %v2847_v52 = vpack.c.bf16 %v673_v51, %v672_v50  ;;  %v514_v55 = vmul.f32 0.001, %v386_v2  ;;  %v515_v57 = vmul.f32 0.001, %v387_v31  ;;  %v3581_v13 = vadd.f32 %v531_v32, %v275_v9 }
  0xc2   :  { %v179_v3 = vld [vmem:[#allocation9 + $0x2e8] sm:$0xff]  ;;  %v306_v58 = vmul.f32 0.999, %v178_v35  ;;  %v434_v63 = vld [vmem:[#allocation6 + $0x2e0] sm:$0xff]  ;;  %876 = vst [vmem:[#allocation11 + $0x1e0] sm:$0xff] %v3579_v11  ;;  %v148_v32 = vld [vmem:[#allocation9 + $0x1f0] sm:$0xff] }
  0xc3   :  { %v307_v59 = vmul.f32 0.999, %v179_v3  ;;  %v435_v36 = vld [vmem:[#allocation6 + $0x2e8] sm:$0xff]  ;;  %2848 = vmatpush3.bf16.msra.mxu1 %v2847_v52  ;;  %v3584_v6 = vadd.f32 %v514_v55, %v258_v27  ;;  %v3586_v16 = vadd.f32 %v515_v57, %v259_v62  ;;  %v562_v0 = vmul.f32 0.001, %v434_v63  ;;  %v162_v14 = vld [vmem:[#allocation9 + $0x260] sm:$0xff] }
  0xc4   :  { %v563_v17 = vmul.f32 0.001, %v435_v36  ;;  %v163_v25 = vld [vmem:[#allocation9 + $0x268] sm:$0xff]  ;;  %877 = vst [vmem:[#allocation11 + $0x1e8] sm:$0xff] %v3581_v13  ;;  %v290_v40 = vmul.f32 0.999, %v162_v14 }
  0xc5   :  { %v291_v12 = vmul.f32 0.999, %v163_v25  ;;  %v418_v50 = vld [vmem:[#allocation6 + $0x260] sm:$0xff]  ;;  %v419_v51 = vld [vmem:[#allocation6 + $0x268] sm:$0xff]  ;;  %860 = vst [vmem:[#allocation11 + $0x160] sm:$0xff] %v3584_v6  ;;  %861 = vst [vmem:[#allocation11 + $0x168] sm:$0xff] %v3586_v16  ;;  %v690_v41 = vadd.f32 %v562_v0, %v306_v58 }
  0xc6   :  { %v691_v2 = vadd.f32 %v563_v17, %v307_v59  ;;  %v546_v31 = vmul.f32 0.001, %v418_v50  ;;  %v149_v27 = vld [vmem:[#allocation9 + $0x1f8] sm:$0xff]  ;;  %v404_v62 = vld [vmem:[#allocation6 + $0x1f0] sm:$0xff]  ;;  %v547_v52 = vmul.f32 0.001, %v419_v51 }
  0xc7   :  { %v276_v55 = vmul.f32 0.999, %v148_v32  ;;  %v277_v57 = vmul.f32 0.999, %v149_v27  ;;  %908 = vst [vmem:[#allocation11 + $0x2e0] sm:$0xff] %v690_v41  ;;  %v405_v63 = vld [vmem:[#allocation6 + $0x1f8] sm:$0xff] }
  0xc8   :  { %909 = vst [vmem:[#allocation11 + $0x2e8] sm:$0xff] %v691_v2  ;;  %v2849_v35 = vpack.c.bf16 %v691_v2, %v690_v41  ;;  %v674_v3 = vadd.f32 %v546_v31, %v290_v40  ;;  %v532_v36 = vmul.f32 0.001, %v404_v62  ;;  %v132_v14 = vld [vmem:[#allocation9 + $0x170] sm:$0xff]  ;;  %v133_v25 = vld [vmem:[#allocation9 + $0x178] sm:$0xff]  ;;  %v675_v9 = vadd.f32 %v547_v52, %v291_v12  ;;  %v1484_v52 = vld [vmem:[%s4073_s2 + $0x28] sm:$0xff] }
  0xc9   :  { %v533_v5 = vmul.f32 0.001, %v405_v63  ;;  %v260_v39 = vmul.f32 0.999, %v132_v14  ;;  %v261_v58 = vmul.f32 0.999, %v133_v25  ;;  %1697 = vmatprep.mubr.f32.mxu1 %v1484_v52 }
  0xca   :  { %2850 = vmatprep.subr.bf16.mxu1 %v2849_v35  ;;  %892 = vst [vmem:[#allocation11 + $0x260] sm:$0xff] %v674_v3  ;;  %v3595_v59 = vadd.f32 %v532_v36, %v276_v55  ;;  %v388_v0 = vld [vmem:[#allocation6 + $0x170] sm:$0xff]  ;;  %v389_v17 = vld [vmem:[#allocation6 + $0x178] sm:$0xff]  ;;  %893 = vst [vmem:[#allocation11 + $0x268] sm:$0xff] %v675_v9  ;;  %v2851_v51 = vpack.c.bf16 %v675_v9, %v674_v3 }
  0xcb   :  { %v180_v50 = vld [vmem:[#allocation9 + $0x2f0] sm:$0xff]  ;;  %v3597_v32 = vadd.f32 %v533_v5, %v277_v57  ;;  %v516_v40 = vmul.f32 0.001, %v388_v0  ;;  %v517_v41 = vmul.f32 0.001, %v389_v17  ;;  %v181_v2 = vld [vmem:[#allocation9 + $0x2f8] sm:$0xff] }
  0xcc   :  { %v436_v31 = vld [vmem:[#allocation6 + $0x2f0] sm:$0xff]  ;;  %878 = vst [vmem:[#allocation11 + $0x1f0] sm:$0xff] %v3595_v59  ;;  %v308_v12 = vmul.f32 0.999, %v180_v50  ;;  %v309_v27 = vmul.f32 0.999, %v181_v2  ;;  %2852 = vmatpush3.bf16.msra.mxu1 %v2851_v51 }
  0xcd   :  { %v437_v62 = vld [vmem:[#allocation6 + $0x2f8] sm:$0xff]  ;;  %879 = vst [vmem:[#allocation11 + $0x1f8] sm:$0xff] %v3597_v32  ;;  %v3603_v55 = vadd.f32 %v516_v40, %v260_v39  ;;  %v3605_v9 = vadd.f32 %v517_v41, %v261_v58  ;;  %v564_v5 = vmul.f32 0.001, %v436_v31  ;;  %v164_v57 = vld [vmem:[#allocation9 + $0x270] sm:$0xff]  ;;  %v198_v50 = vld [vmem:[#allocation9 + $0x380] sm:$0xff] }
  0xce   :  { %v165_v35 = vld [vmem:[#allocation9 + $0x278] sm:$0xff]  ;;  %v420_v3 = vld [vmem:[#allocation6 + $0x270] sm:$0xff]  ;;  %v565_v63 = vmul.f32 0.001, %v437_v62  ;;  %v292_v36 = vmul.f32 0.999, %v164_v57 }
  0xcf   :  { %v293_v14 = vmul.f32 0.999, %v165_v35  ;;  %862 = vst [vmem:[#allocation11 + $0x170] sm:$0xff] %v3603_v55  ;;  %863 = vst [vmem:[#allocation11 + $0x178] sm:$0xff] %v3605_v9  ;;  %v692_v0 = vadd.f32 %v564_v5, %v308_v12  ;;  %v421_v17 = vld [vmem:[#allocation6 + $0x278] sm:$0xff]  ;;  %v199_v40 = vld [vmem:[#allocation9 + $0x388] sm:$0xff] }
  0xd0   :  { %v548_v39 = vmul.f32 0.001, %v420_v3  ;;  %v693_v58 = vadd.f32 %v565_v63, %v309_v27  ;;  %v549_v51 = vmul.f32 0.001, %v421_v17  ;;  %v326_v41 = vmul.f32 0.999, %v198_v50 }
  0xd1   :  { %v454_v2 = vld [vmem:[#allocation6 + $0x380] sm:$0xff]  ;;  %910 = vst [vmem:[#allocation11 + $0x2f0] sm:$0xff] %v692_v0  ;;  %v327_v62 = vmul.f32 0.999, %v199_v40  ;;  %v455_v57 = vld [vmem:[#allocation6 + $0x388] sm:$0xff]  ;;  %v1483_v52 = vld [vmem:[%s4073_s2 + $0x20] sm:$0xff] }
  0xd2   :  { %v676_v31 = vadd.f32 %v548_v39, %v292_v36  ;;  %v582_v35 = vmul.f32 0.001, %v454_v2  ;;  %911 = vst [vmem:[#allocation11 + $0x2f8] sm:$0xff] %v693_v58  ;;  %v2853_v25 = vpack.c.bf16 %v693_v58, %v692_v0  ;;  %v677_v12 = vadd.f32 %v549_v51, %v293_v14  ;;  %v182_v3 = vld [vmem:[#allocation9 + $0x300] sm:$0xff]  ;;  %v183_v27 = vld [vmem:[#allocation9 + $0x308] sm:$0xff]  ;;  %v200_v14 = vld [vmem:[#allocation9 + $0x390] sm:$0xff] }
  0xd3   :  { %v583_v5 = vmul.f32 0.001, %v455_v57  ;;  %v438_v63 = vld [vmem:[#allocation6 + $0x300] sm:$0xff]  ;;  %v310_v50 = vmul.f32 0.999, %v182_v3  ;;  %v439_v39 = vld [vmem:[#allocation6 + $0x308] sm:$0xff] }
  0xd4   :  { %894 = vst [vmem:[#allocation11 + $0x270] sm:$0xff] %v676_v31  ;;  %v3614_v17 = vadd.f32 %v582_v35, %v326_v41  ;;  %v311_v36 = vmul.f32 0.999, %v183_v27  ;;  %2854 = vmatprep.subr.bf16.mxu1 %v2853_v25  ;;  %895 = vst [vmem:[#allocation11 + $0x278] sm:$0xff] %v677_v12  ;;  %v2855_v40 = vpack.c.bf16 %v677_v12, %v676_v31  ;;  %v566_v42 = vmul.f32 0.001, %v438_v63 }
  0xd5   :  { %v3616_v2 = vadd.f32 %v583_v5, %v327_v62  ;;  %v567_v54 = vmul.f32 0.001, %v439_v39  ;;  %v201_v0 = vld [vmem:[#allocation9 + $0x398] sm:$0xff]  ;;  %v328_v58 = vmul.f32 0.999, %v200_v14  ;;  %v456_v41 = vld [vmem:[#allocation6 + $0x390] sm:$0xff] }
  0xd6   :  { %928 = vst [vmem:[#allocation11 + $0x380] sm:$0xff] %v3614_v17  ;;  %v329_v51 = vmul.f32 0.999, %v201_v0  ;;  %v457_v57 = vld [vmem:[#allocation6 + $0x398] sm:$0xff]  ;;  %2856 = vmatpush3.bf16.msra.mxu1 %v2855_v40  ;;  %v3625_v31 = vadd.f32 %v566_v42, %v310_v50  ;;  %v584_v35 = vmul.f32 0.001, %v456_v41 }
  0xd7   :  { %929 = vst [vmem:[#allocation11 + $0x388] sm:$0xff] %v3616_v2  ;;  %v3627_v62 = vadd.f32 %v567_v54, %v311_v36  ;;  %v184_v12 = vld [vmem:[#allocation9 + $0x310] sm:$0xff]  ;;  %v185_v5 = vld [vmem:[#allocation9 + $0x318] sm:$0xff]  ;;  %v585_v27 = vmul.f32 0.001, %v457_v57  ;;  %2889 = vmatprep.subr.bf16.mxu1 %v4092_v60  ;;  %v202_v36 = vld [vmem:[#allocation9 + $0x3a0] sm:$0xff] }
  0xd8   :  { %v440_v3 = vld [vmem:[#allocation6 + $0x310] sm:$0xff]  ;;  %v312_v63 = vmul.f32 0.999, %v184_v12  ;;  %v313_v39 = vmul.f32 0.999, %v185_v5  ;;  %912 = vst [vmem:[#allocation11 + $0x300] sm:$0xff] %v3625_v31  ;;  %v3634_v42 = vadd.f32 %v584_v35, %v328_v58 }
  0xd9   :  { %913 = vst [vmem:[#allocation11 + $0x308] sm:$0xff] %v3627_v62  ;;  %v441_v54 = vld [vmem:[#allocation6 + $0x318] sm:$0xff]  ;;  %v568_v50 = vmul.f32 0.001, %v440_v3  ;;  %v203_v14 = vld [vmem:[#allocation9 + $0x3a8] sm:$0xff]  ;;  %1698 = vmatmul.mubr.f32.vlgmr.msra.gmra.mrb[6].mxu1 %v1483_v52  ;;  %v3636_v0 = vadd.f32 %v585_v27, %v329_v51  ;;  %v458_v60 = vld [vmem:[#allocation6 + $0x3a0] sm:$0xff] }
  0xda   :  { %v569_v41 = vmul.f32 0.001, %v441_v54  ;;  %v330_v57 = vmul.f32 0.999, %v202_v36  ;;  %v331_v12 = vmul.f32 0.999, %v203_v14  ;;  %2606 = vmatprep.mubr.msk.f32.mxu1 %vm3118_vm0, %v3119_v7 }
  0xdb   :  { %930 = vst [vmem:[#allocation11 + $0x390] sm:$0xff] %v3634_v42  ;;  %v3639_v5 = vadd.f32 %v568_v50, %v312_v63  ;;  %v459_v25 = vld [vmem:[#allocation6 + $0x3a8] sm:$0xff]  ;;  %v186_v61 = vld [vmem:[#allocation9 + $0x320] sm:$0xff]  ;;  %931 = vst [vmem:[#allocation11 + $0x398] sm:$0xff] %v3636_v0  ;;  %v586_v51 = vmul.f32 0.001, %v458_v60 }
  0xdc   :  { %v3646_v58 = vadd.f32 %v569_v41, %v313_v39  ;;  %v587_v35 = vmul.f32 0.001, %v459_v25  ;;  %v187_v3 = vld [vmem:[#allocation9 + $0x328] sm:$0xff]  ;;  %v442_v27 = vld [vmem:[#allocation6 + $0x320] sm:$0xff]  ;;  %v314_v63 = vmul.f32 0.999, %v186_v61 }
  0xdd   :  { %4119 = vst [vmem:[#allocation23_spill] sm:$0xff] %v3639_v5  ;;  %914 = vst [vmem:[#allocation11 + $0x310] sm:$0xff] %v3639_v5  ;;  %v315_v54 = vmul.f32 0.999, %v187_v3  ;;  %v443_v50 = vld [vmem:[#allocation6 + $0x328] sm:$0xff]  ;;  %v204_v36 = vld [vmem:[#allocation9 + $0x3b0] sm:$0xff]  ;;  %v3652_v14 = vadd.f32 %v586_v51, %v330_v57 }
  0xde   :  { %4120 = vst [vmem:[#allocation24_spill] sm:$0xff] %v3646_v58  ;;  %915 = vst [vmem:[#allocation11 + $0x318] sm:$0xff] %v3646_v58  ;;  %v3654_v52 = vadd.f32 %v587_v35, %v331_v12  ;;  %v570_v39 = vmul.f32 0.001, %v442_v27  ;;  %v205_v60 = vld [vmem:[#allocation9 + $0x3b8] sm:$0xff]  ;;  %v460_v25 = vld [vmem:[#allocation6 + $0x3b0] sm:$0xff] }
  0xdf   :  { %4121 = vst [vmem:[#allocation25_spill] sm:$0xff] %v3652_v14  ;;  %v461_v41 = vld [vmem:[#allocation6 + $0x3b8] sm:$0xff]  ;;  %v571_v40 = vmul.f32 0.001, %v443_v50  ;;  %v332_v48 = vmul.f32 0.999, %v204_v36 }
  0xe0   :  { %4122 = vst [vmem:[#allocation26_spill] sm:$0xff] %v3654_v52  ;;  %v333_v4 = vmul.f32 0.999, %v205_v60  ;;  %932 = vst [vmem:[#allocation11 + $0x3a0] sm:$0xff] %v3652_v14  ;;  %v3660_v3 = vadd.f32 %v570_v39, %v314_v63  ;;  %v588_v57 = vmul.f32 0.001, %v460_v25 }
  0xe1   :  { %933 = vst [vmem:[#allocation11 + $0x3a8] sm:$0xff] %v3654_v52  ;;  %v589_v51 = vmul.f32 0.001, %v461_v41  ;;  %v188_v12 = vld [vmem:[#allocation9 + $0x330] sm:$0xff]  ;;  %v189_v35 = vld [vmem:[#allocation9 + $0x338] sm:$0xff]  ;;  %v3662_v27 = vadd.f32 %v571_v40, %v315_v54  ;;  %v206_v63 = vld [vmem:[#allocation9 + $0x3c0] sm:$0xff] }
  0xe2   :  { %4123 = vst [vmem:[#allocation27_spill] sm:$0xff] %v3660_v3  ;;  %v316_v7 = vmul.f32 0.999, %v188_v12  ;;  %v317_v49 = vmul.f32 0.999, %v189_v35  ;;  %v444_v50 = vld [vmem:[#allocation6 + $0x330] sm:$0xff]  ;;  %v3665_v60 = vadd.f32 %v588_v57, %v332_v48 }
  0xe3   :  { %4124 = vst [vmem:[#allocation28_spill] sm:$0xff] %v3662_v27  ;;  %v445_v36 = vld [vmem:[#allocation6 + $0x338] sm:$0xff]  ;;  %916 = vst [vmem:[#allocation11 + $0x320] sm:$0xff] %v3660_v3  ;;  %v3667_v47 = vadd.f32 %v589_v51, %v333_v4  ;;  %v572_v8 = vmul.f32 0.001, %v444_v50  ;;  %v207_v39 = vld [vmem:[#allocation9 + $0x3c8] sm:$0xff] }
  0xe4   :  { %4125 = vst [vmem:[#allocation29_spill] sm:$0xff] %v3665_v60  ;;  %v573_v61 = vmul.f32 0.001, %v445_v36  ;;  %917 = vst [vmem:[#allocation11 + $0x328] sm:$0xff] %v3662_v27  ;;  %v334_v54 = vmul.f32 0.999, %v206_v63 }
  0xe5   :  { %4126 = vst [vmem:[#allocation30_spill] sm:$0xff] %v3667_v47  ;;  %v335_v25 = vmul.f32 0.999, %v207_v39  ;;  %v462_v41 = vld [vmem:[#allocation6 + $0x3c0] sm:$0xff]  ;;  %v463_v12 = vld [vmem:[#allocation6 + $0x3c8] sm:$0xff]  ;;  %934 = vst [vmem:[#allocation11 + $0x3b0] sm:$0xff] %v3665_v60  ;;  %v3676_v48 = vadd.f32 %v572_v8, %v316_v7 }
  0xe6   :  { %935 = vst [vmem:[#allocation11 + $0x3b8] sm:$0xff] %v3667_v47  ;;  %v3678_v57 = vadd.f32 %v573_v61, %v317_v49  ;;  %v590_v51 = vmul.f32 0.001, %v462_v41  ;;  %v190_v35 = vld [vmem:[#allocation9 + $0x340] sm:$0xff]  ;;  %v191_v50 = vld [vmem:[#allocation9 + $0x348] sm:$0xff]  ;;  %v208_v49 = vld [vmem:[#allocation9 + $0x3d0] sm:$0xff] }
  0xe7   :  { %4127 = vst [vmem:[#allocation31_spill] sm:$0xff] %v3676_v48  ;;  %v446_v36 = vld [vmem:[#allocation6 + $0x340] sm:$0xff]  ;;  %v591_v40 = vmul.f32 0.001, %v463_v12  ;;  %v318_v63 = vmul.f32 0.999, %v190_v35 }
  0xe8   :  { %4128 = vst [vmem:[#allocation32_spill] sm:$0xff] %v3678_v57  ;;  %v319_v39 = vmul.f32 0.999, %v191_v50  ;;  %918 = vst [vmem:[#allocation11 + $0x330] sm:$0xff] %v3676_v48  ;;  %v3684_v26 = vadd.f32 %v590_v51, %v334_v54  ;;  %v447_v8 = vld [vmem:[#allocation6 + $0x348] sm:$0xff]  ;;  %v209_v61 = vld [vmem:[#allocation9 + $0x3d8] sm:$0xff] }
  0xe9   :  { %919 = vst [vmem:[#allocation11 + $0x338] sm:$0xff] %v3678_v57  ;;  %v574_v7 = vmul.f32 0.001, %v446_v36  ;;  %v2152_v41 = vld [vmem:[%s4075_s4] ss:$0 sm:$0xff]  ;;  %v3689_v12 = vadd.f32 %v591_v40, %v335_v25  ;;  %v464_v54 = vld [vmem:[#allocation6 + $0x3d0] sm:$0xff] }
  0xea   :  { %4129 = vst [vmem:[#allocation33_spill] sm:$0xff] %v3684_v26  ;;  %v575_v35 = vmul.f32 0.001, %v447_v8  ;;  %v336_v50 = vmul.f32 0.999, %v208_v49  ;;  %936 = vst [vmem:[#allocation11 + $0x3c0] sm:$0xff] %v3684_v26 }
  0xeb   :  { %4130 = vst [vmem:[#allocation34_spill] sm:$0xff] %v3689_v12  ;;  %v337_v4 = vmul.f32 0.999, %v209_v61  ;;  %v3692_v47 = vadd.f32 %v574_v7, %v318_v63  ;;  %v465_v51 = vld [vmem:[#allocation6 + $0x3d8] sm:$0xff]  ;;  %937 = vst [vmem:[#allocation11 + $0x3c8] sm:$0xff] %v3689_v12  ;;  %v448_v3 = vld [vmem:[#allocation6 + $0x350] sm:$0xff] }
  0xec   :  { %v3697_v40 = vadd.f32 %v575_v35, %v319_v39  ;;  %v592_v25 = vmul.f32 0.001, %v464_v54  ;;  %v593_v8 = vmul.f32 0.001, %v465_v51  ;;  %v193_v63 = vld [vmem:[#allocation9 + $0x358] sm:$0xff]  ;;  %v210_v35 = vld [vmem:[#allocation9 + $0x3e0] sm:$0xff] }
  0xed   :  { %4131 = vst [vmem:[#allocation35_spill] sm:$0xff] %v3692_v47  ;;  %920 = vst [vmem:[#allocation11 + $0x340] sm:$0xff] %v3692_v47  ;;  %v320_v7 = vmul.f32 0.999, %v192_v56  ;;  %v449_v27 = vld [vmem:[#allocation6 + $0x358] sm:$0xff]  ;;  %v211_v54 = vld [vmem:[#allocation9 + $0x3e8] sm:$0xff] }
  0xee   :  { %4132 = vst [vmem:[#allocation36_spill] sm:$0xff] %v3697_v40  ;;  %921 = vst [vmem:[#allocation11 + $0x348] sm:$0xff] %v3697_v40  ;;  %v3703_v5 = vadd.f32 %v592_v25, %v336_v50  ;;  %v3705_v39 = vadd.f32 %v593_v8, %v337_v4  ;;  %v576_v57 = vmul.f32 0.001, %v448_v3  ;;  %v577_v26 = vmul.f32 0.001, %v449_v27 }
  0xef   :  { %v467_v50 = vld [vmem:[#allocation6 + $0x3e8] sm:$0xff]  ;;  %v194_v25 = vld [vmem:[#allocation9 + $0x360] sm:$0xff] }
  0xf0   :  { %4133 = vst [vmem:[#allocation37_spill] sm:$0xff] %v3703_v5  ;;  %4134 = vst [vmem:[#allocation38_spill] sm:$0xff] %v3705_v39  ;;  %v3711_v8 = vadd.f32 %v576_v57, %v320_v7  ;;  %v450_v3 = vld [vmem:[#allocation6 + $0x360] sm:$0xff]  ;;  %v451_v27 = vld [vmem:[#allocation6 + $0x368] sm:$0xff]  ;;  %v322_v47 = vmul.f32 0.999, %v194_v25 }
  0xf1   :  { %938 = vst [vmem:[#allocation11 + $0x3d0] sm:$0xff] %v3703_v5  ;;  %939 = vst [vmem:[#allocation11 + $0x3d8] sm:$0xff] %v3705_v39  ;;  %v579_v57 = vmul.f32 0.001, %v451_v27  ;;  %v213_v7 = vld [vmem:[#allocation9 + $0x3f8] sm:$0xff] }
  0xf2   :  { %4135 = vst [vmem:[#allocation39_spill] sm:$0xff] %v3711_v8  ;;  %922 = vst [vmem:[#allocation11 + $0x350] sm:$0xff] %v3711_v8  ;;  %v469_v25 = vld [vmem:[#allocation6 + $0x3f8] sm:$0xff] }
 0x11f   :  { %v2189_v60 = vpop.f32.mrb[0].mxu0 }
 0x120   :  { %v2190_v36 = vpop.f32.mrb[1].mxu0 }
 0x121   :  { %v2224_v48 = vpop.f32.mrb[0].mxu1  ;;  %v2191_v49 = vadd.f32 %v2190_v36, %v2189_v60  ;;  %v466_v60 = vld [vmem:[#allocation6 + $0x3e0] sm:$0xff]  ;;  %v321_v36 = vmul.f32 0.999, %v193_v63  ;;  %v595_v63 = vmul.f32 0.001, %v467_v50 }
 0x122   :  { %v2225_v61 = vpop.f32.mrb[1].mxu1  ;;  %v468_v50 = vld [vmem:[#allocation6 + $0x3f0] sm:$0xff] }
 0x123   :  { %v2226_v14 = vadd.f32 %v2225_v61, %v2224_v48  ;;  %v1172_v51 = vadd.f32 %v2191_v49, %v2152_v41  ;;  %v338_v48 = vmul.f32 0.999, %v210_v35  ;;  %v339_v61 = vmul.f32 0.999, %v211_v54  ;;  %v195_v49 = vld [vmem:[#allocation9 + $0x368] sm:$0xff] }
 0x124   :  { %v3713_v52 = vadd.f32 %v577_v26, %v321_v36  ;;  %v594_v41 = vmul.f32 0.001, %v466_v60  ;;  %v323_v40 = vmul.f32 0.999, %v195_v49  ;;  %v212_v26 = vld [vmem:[#allocation9 + $0x3f0] sm:$0xff] }
 0x125   :  { %v1242_v4 = vadd.f32 %v2226_v14, %v1172_v51  ;;  %v578_v14 = vmul.f32 0.001, %v450_v3  ;;  %v3721_v60 = vadd.f32 %v595_v63, %v339_v61  ;;  %v340_v51 = vmul.f32 0.999, %v212_v26  ;;  %v452_v63 = vld [vmem:[#allocation6 + $0x370] sm:$0xff]  ;;  %v453_v26 = vld [vmem:[#allocation6 + $0x378] sm:$0xff] }
 0x126   :  { %4136 = vst [vmem:[#allocation40_spill] sm:$0xff] %v3713_v52  ;;  %923 = vst [vmem:[#allocation11 + $0x358] sm:$0xff] %v3713_v52  ;;  %v3719_v54 = vadd.f32 %v594_v41, %v338_v48  ;;  %v341_v36 = vmul.f32 0.999, %v213_v7  ;;  %v3726_v56 = vadd.f32 %v579_v57, %v323_v40  ;;  %v596_v5 = vmul.f32 0.001, %v468_v50 }
 0x127   :  { %v3724_v49 = vadd.f32 %v578_v14, %v322_v47  ;;  %v597_v35 = vmul.f32 0.001, %v469_v25  ;;  %v196_v48 = vld [vmem:[#allocation9 + $0x370] sm:$0xff]  ;;  %v197_v41 = vld [vmem:[#allocation9 + $0x378] sm:$0xff]  ;;  %941 = vst [vmem:[#allocation11 + $0x3e8] sm:$0xff] %v3721_v60 }
 0x128   :  { %940 = vst [vmem:[#allocation11 + $0x3e0] sm:$0xff] %v3719_v54  ;;  %v2881_v61 = vpack.c.bf16 %v3721_v60, %v3719_v54  ;;  %v324_v3 = vmul.f32 0.999, %v196_v48  ;;  %v325_v27 = vmul.f32 0.999, %v197_v41  ;;  %925 = vst [vmem:[#allocation11 + $0x368] sm:$0xff] %v3726_v56  ;;  %v724_v40 = vadd.f32 %v596_v5, %v340_v51 }
 0x129   :  { %924 = vst [vmem:[#allocation11 + $0x360] sm:$0xff] %v3724_v49  ;;  %v2883_v47 = vpack.c.bf16 %v3726_v56, %v3724_v49  ;;  %v725_v14 = vadd.f32 %v597_v35, %v341_v36  ;;  %v580_v57 = vmul.f32 0.001, %v452_v63  ;;  %v581_v7 = vmul.f32 0.001, %v453_v26  ;;  %v1482_v35 = vld [vmem:[%s4073_s2 + $0x18] sm:$0xff] }
 0x12a   :  { %942 = vst [vmem:[#allocation11 + $0x3f0] sm:$0xff] %v724_v40  ;;  %v4137_v51 = vpack.c.bf16 %v3480_v21, %v3478_v37  ;;  %v4138_v36 = vpack.c.bf16 %v3497_v30, %v3495_v53  ;;  %v4142_v37 = vpack.c.bf16 %v3533_v46, %v3531_v10  ;;  %v4143_v21 = vpack.c.bf16 %v3538_v38, %v3536_v29  ;;  %v1481_v10 = vld [vmem:[%s4073_s2 + $0x10] sm:$0xff]  ;;  %v1486_v29 = vld [vmem:[%s4073_s2 + $0x38] sm:$0xff] }
 0x12b   :  { %943 = vst [vmem:[#allocation11 + $0x3f8] sm:$0xff] %v725_v14  ;;  %v2885_v50 = vpack.c.bf16 %v725_v14, %v724_v40  ;;  %v708_v25 = vadd.f32 %v580_v57, %v324_v3  ;;  %v709_v54 = vadd.f32 %v581_v7, %v325_v27  ;;  %v4144_v53 = vpack.c.bf16 %v3549_v15, %v3547_v18  ;;  %v4155_v15 = vld [vmem:[#allocation24_spill] sm:$0xff]  ;;  %v4180_v3 = vld [vmem:[#allocation39_spill] sm:$0xff]  ;;  %v726_v40 = vld [vmem:[%s4079_s8] sm:$0x1] }
 0x12c   :  { %v4145_v30 = vpack.c.bf16 %v3557_v34, %v3555_v19  ;;  %v4152_v46 = vpack.c.bf16 %v3616_v2, %v3614_v17  ;;  %v4153_v38 = vpack.c.bf16 %v3627_v62, %v3625_v31  ;;  %v4154_v18 = vpack.c.bf16 %v3636_v0, %v3634_v42  ;;  %v4156_v19 = vld [vmem:[#allocation23_spill] sm:$0xff]  ;;  %v4170_v17 = vld [vmem:[#allocation34_spill] sm:$0xff]  ;;  %v4171_v2 = vld [vmem:[#allocation33_spill] sm:$0xff] }
 0x12d   :  { %926 = vst [vmem:[#allocation11 + $0x370] sm:$0xff] %v708_v25  ;;  %927 = vst [vmem:[#allocation11 + $0x378] sm:$0xff] %v709_v54  ;;  %v2887_v60 = vpack.c.bf16 %v709_v54, %v708_v25  ;;  %v4157_v34 = vpack.c.bf16 %v4155_v15, %v4156_v19  ;;  %v4172_v31 = vpack.c.bf16 %v4170_v17, %v4171_v2  ;;  %v4173_v62 = vld [vmem:[#allocation36_spill] sm:$0xff]  ;;  %v4174_v42 = vld [vmem:[#allocation35_spill] sm:$0xff]  ;;  %v1488_v57 = vlaneseq }
 0x12e   :  { %v4175_v0 = vpack.c.bf16 %v4173_v62, %v4174_v42  ;;  %v4179_v49 = vld [vmem:[#allocation40_spill] sm:$0xff]  ;;  %v728_v14 = vld [vmem:[%s4075_s4] sm:$0x1]  ;;  %v727_v7 = vmul.f32 0.999, %v726_v40  ;;  %v768_v19 = vld [vmem:[%s4076_s5 + $0x28] sm:$0xff] }
 0x12f   :  { %v4181_v27 = vpack.c.bf16 %v4179_v49, %v4180_v3  ;;  %v1485_v63 = vld [vmem:[%s4073_s2 + $0x30] sm:$0xff]  ;;  %v771_v42 = vld [vmem:[%s4076_s5 + $0x40] sm:$0xff] }
 0x13f   :  { %v2259_v48 = vpop.f32.mrb[2].mxu0 }
 0x140   :  { %v2260_v41 = vpop.f32.mrb[3].mxu0 }
 0x141   :  { %v2294_v8 = vpop.f32.mrb[2].mxu1  ;;  %v2261_v52 = vadd.f32 %v2260_v41, %v2259_v48 }
 0x142   :  { %v2295_v39 = vpop.f32.mrb[3].mxu1 }
 0x143   :  { %v2296_v12 = vadd.f32 %v2295_v39, %v2294_v8  ;;  %v1312_v58 = vadd.f32 %v2261_v52, %v1242_v4  ;;  %v4139_v39 = vpack.c.bf16 %v3507_v44, %v3503_v43  ;;  %v4140_v52 = vpack.c.bf16 %v3517_v23, %v3515_v33  ;;  %v4177_v4 = vld [vmem:[#allocation37_spill] sm:$0xff] }
 0x144   :  { %v4146_v43 = vpack.c.bf16 %v3565_v22, %v3563_v1  ;;  %v4147_v44 = vpack.c.bf16 %v3573_v28, %v3571_v45  ;;  %v4148_v33 = vpack.c.bf16 %v3581_v13, %v3579_v11  ;;  %v4149_v23 = vpack.c.bf16 %v3586_v16, %v3584_v6  ;;  %v4158_v1 = vld [vmem:[#allocation26_spill] sm:$0xff]  ;;  %v4159_v22 = vld [vmem:[#allocation25_spill] sm:$0xff]  ;;  %v4161_v28 = vld [vmem:[#allocation28_spill] sm:$0xff] }
 0x145   :  { %v1382_v56 = vadd.f32 %v2296_v12, %v1312_v58  ;;  %v4141_v58 = vpack.c.bf16 %v3522_v24, %v3520_v20  ;;  %v4150_v20 = vpack.c.bf16 %v3597_v32, %v3595_v59  ;;  %v4151_v24 = vpack.c.bf16 %v3605_v9, %v3603_v55  ;;  %v4162_v11 = vld [vmem:[#allocation27_spill] sm:$0xff]  ;;  %v4164_v6 = vld [vmem:[#allocation30_spill] sm:$0xff]  ;;  %v4165_v16 = vld [vmem:[#allocation29_spill] sm:$0xff] }
 0x146   :  { %v4160_v45 = vpack.c.bf16 %v4158_v1, %v4159_v22  ;;  %v4163_v13 = vpack.c.bf16 %v4161_v28, %v4162_v11  ;;  %v4166_v59 = vpack.c.bf16 %v4164_v6, %v4165_v16  ;;  %v4167_v32 = vld [vmem:[#allocation32_spill] sm:$0xff]  ;;  %v4168_v55 = vld [vmem:[#allocation31_spill] sm:$0xff]  ;;  %v4176_v12 = vld [vmem:[#allocation38_spill] sm:$0xff]  ;;  %v784_v28 = vmul.f32 0.001, %v768_v19 }
 0x147   :  { %v1385_v5 = vmax.f32 %v1382_v56, 0.0  ;;  %v4169_v9 = vpack.c.bf16 %v4167_v32, %v4168_v55  ;;  %v4178_v8 = vpack.c.bf16 %v4176_v12, %v4177_v4  ;;  %v731_v56 = vld [vmem:[%s4080_s9] sm:$0xff]  ;;  %v4182_v6 = vmov 0.0|0.0   ;;  %v770_v32 = vld [vmem:[%s4076_s5 + $0x38] sm:$0xff] }
 0x148   :  { %v786_v12 = vmul.f32 0.001, %v770_v32 }
 0x149   :  { %2572 = vmatmul.mubr.f32.vlgmr.msra.gmra.mrb[4].mxu0 %v1385_v5  ;;  %v732_v5 = vld [vmem:[%s4080_s9 + $0x8] sm:$0xff] }
 0x14a   :  { %2796 = vmatpush3.bf16.msra.mxu0 %v4137_v51  ;;  %1627 = vmatprep.mubr.f32.mxu0 %v1482_v35  ;;  %v763_v35 = vld [vmem:[%s4076_s5] sm:$0xff]  ;;  %v747_v51 = vmul.f32 0.999, %v731_v56 }
 0x14b   :  { %2798 = vmatprep.subr.bf16.mxu0 %v4138_v36  ;;  %v748_v36 = vmul.f32 0.999, %v732_v5 }
 0x14e   :  { %2800 = vmatpush3.bf16.msra.mxu0 %v4139_v39  ;;  %v764_v39 = vld [vmem:[%s4076_s5 + $0x8] sm:$0xff] }
 0x14f   :  { %2802 = vmatprep.subr.bf16.mxu0 %v4140_v52  ;;  %v779_v52 = vmul.f32 0.001, %v763_v35 }
 0x152   :  { %2804 = vmatpush3.bf16.msra.mxu0 %v4141_v58  ;;  %v780_v58 = vmul.f32 0.001, %v764_v39 }
 0x153   :  { %2806 = vmatprep.subr.bf16.mxu0 %v4142_v37  ;;  %v795_v37 = vadd.f32 %v779_v52, %v747_v51 }
 0x156   :  { %2808 = vmatpush3.bf16.msra.mxu0 %v4143_v21  ;;  %v796_v21 = vadd.f32 %v780_v58, %v748_v36 }
 0x157   :  { %2810 = vmatprep.subr.bf16.mxu0 %v4144_v53  ;;  %v733_v53 = vld [vmem:[%s4080_s9 + $0x10] sm:$0xff] }
 0x15a   :  { %2812 = vmatpush3.bf16.msra.mxu0 %v4145_v30  ;;  %v734_v30 = vld [vmem:[%s4080_s9 + $0x18] sm:$0xff] }
 0x15b   :  { %2814 = vmatprep.subr.bf16.mxu0 %v4146_v43  ;;  %v765_v43 = vld [vmem:[%s4076_s5 + $0x10] sm:$0xff] }
 0x15e   :  { %2816 = vmatpush3.bf16.msra.mxu0 %v4147_v44  ;;  %v749_v44 = vmul.f32 0.999, %v733_v53 }
 0x15f   :  { %2818 = vmatprep.subr.bf16.mxu0 %v4148_v33  ;;  %v750_v33 = vmul.f32 0.999, %v734_v30  ;;  %v776_v30 = vld [vmem:[%s4076_s5 + $0x68] sm:$0xff] }
 0x162   :  { %2820 = vmatpush3.bf16.msra.mxu0 %v4149_v23  ;;  %v766_v23 = vld [vmem:[%s4076_s5 + $0x18] sm:$0xff] }
 0x163   :  { %2822 = vmatprep.subr.bf16.mxu0 %v4150_v20  ;;  %v735_v20 = vld [vmem:[%s4080_s9 + $0x20] sm:$0xff] }
 0x164   :  { %v2346_v26 = vpop.f32.mrb[4].mxu1  ;;  %945 = vst [vmem:[%s4086_s15] sm:$0xff] %v795_v37  ;;  %946 = vst [vmem:[%s4086_s15 + $0x8] sm:$0xff] %v796_v21 }
 0x166   :  { %2824 = vmatpush3.bf16.msra.mxu0 %v4151_v24  ;;  %v2890_v24 = vpack.c.bf16 %v796_v21, %v795_v37  ;;  %v775_v37 = vld [vmem:[%s4076_s5 + $0x60] sm:$0xff] }
 0x167   :  { %2858 = vmatprep.subr.bf16.mxu0 %v4152_v46  ;;  %v782_v46 = vmul.f32 0.001, %v766_v23 }
 0x168   :  { %2891 = vmatpush3.bf16.msra.mxu1 %v2890_v24 }
 0x169   :  { %1628 = vmatmul.mubr.f32.vlgmr.msra.gmra.mrb[6].mxu0 %v1481_v10  ;;  %v781_v10 = vmul.f32 0.001, %v765_v43  ;;  %v798_v22 = vadd.f32 %v782_v46, %v750_v33  ;;  %2892 = vmatprep.subr.bf16.mxu1 %v4182_v6  ;;  %v791_v43 = vmul.f32 0.001, %v775_v37 }
 0x16a   :  { %2860 = vmatpush3.bf16.msra.mxu0 %v4153_v38  ;;  %1767 = vmatprep.mubr.f32.mxu0 %v1486_v29  ;;  %v767_v38 = vld [vmem:[%s4076_s5 + $0x20] sm:$0xff] }
 0x16b   :  { %2862 = vmatprep.subr.bf16.mxu0 %v4154_v18  ;;  %v736_v29 = vld [vmem:[%s4080_s9 + $0x28] sm:$0xff]  ;;  %v751_v18 = vmul.f32 0.999, %v735_v20  ;;  %v797_v1 = vadd.f32 %v781_v10, %v749_v44  ;;  %v738_v11 = vld [vmem:[%s4080_s9 + $0x38] sm:$0xff]  ;;  %v739_v55 = vld [vmem:[%s4080_s9 + $0x40] sm:$0xff] }
 0x16c   :  { %v752_v15 = vmul.f32 0.999, %v736_v29  ;;  %v755_v4 = vmul.f32 0.999, %v739_v55  ;;  %v792_v44 = vmul.f32 0.001, %v776_v30 }
 0x16d   :  { %v777_v10 = vld [vmem:[%s4076_s5 + $0x70] sm:$0xff]  ;;  %v811_v55 = vld [vmem:[%s4081_s10] sm:$0x1] }
 0x16e   :  { %2864 = vmatpush3.bf16.msra.mxu0 %v4157_v34  ;;  %v737_v34 = vld [vmem:[%s4080_s9 + $0x30] sm:$0xff]  ;;  %v800_v2 = vadd.f32 %v784_v28, %v752_v15  ;;  %v793_v15 = vmul.f32 0.001, %v777_v10 }
 0x16f   :  { %2866 = vmatprep.subr.bf16.mxu0 %v4160_v45  ;;  %v783_v45 = vmul.f32 0.001, %v767_v38  ;;  %v753_v16 = vmul.f32 0.999, %v737_v34  ;;  %947 = vst [vmem:[%s4086_s15 + $0x10] sm:$0xff] %v797_v1  ;;  %948 = vst [vmem:[%s4086_s15 + $0x18] sm:$0xff] %v798_v22 }
 0x170   :  { %v778_v38 = vld [vmem:[%s4076_s5 + $0x78] sm:$0xff] }
 0x171   :  { %v799_v17 = vadd.f32 %v783_v45, %v751_v18  ;;  %v794_v19 = vmul.f32 0.001, %v778_v38 }
 0x172   :  { %2868 = vmatpush3.bf16.msra.mxu0 %v4163_v13  ;;  %v769_v13 = vld [vmem:[%s4076_s5 + $0x30] sm:$0xff] }
 0x173   :  { %2870 = vmatprep.subr.bf16.mxu0 %v4166_v59  ;;  %v754_v59 = vmul.f32 0.999, %v738_v11  ;;  %v2896_v49 = vpack.c.bf16 %v800_v2, %v799_v17 }
 0x176   :  { %2872 = vmatpush3.bf16.msra.mxu0 %v4169_v9  ;;  %v2893_v9 = vpack.c.bf16 %v798_v22, %v797_v1  ;;  %v740_v62 = vld [vmem:[%s4080_s9 + $0x48] sm:$0xff] }
 0x177   :  { %2874 = vmatprep.subr.bf16.mxu0 %v4172_v31  ;;  %v785_v31 = vmul.f32 0.001, %v769_v13  ;;  %949 = vst [vmem:[%s4086_s15 + $0x20] sm:$0xff] %v799_v17  ;;  %950 = vst [vmem:[%s4086_s15 + $0x28] sm:$0xff] %v800_v2  ;;  %v2153_v13 = vld [vmem:[%s4077_s6] ss:$0 sm:$0xff] }
 0x178   :  { %2894 = vmatpush3.bf16.msra.mxu1 %v2893_v9  ;;  %v813_v9 = vld [vmem:[%s4077_s6] sm:$0x1]  ;;  %v812_v17 = vmul.f32 0.999, %v811_v55  ;;  %s3120_s6 = smov [#allocation2]  }
 0x179   :  { %v801_v3 = vadd.f32 %v785_v31, %v753_v16  ;;  %2895 = vmatprep.subr.bf16.mxu1 %v4182_v6  ;;  %v814_v2 = vmul.f32 0.001, %v813_v9  ;;  %s82_s10 = sshll.u32 %s3120_s6, 4  ;;  %s83_s10 = int_to_ptr.vmem [resolvable:$true] %s82_s10 }
 0x17a   :  { %2876 = vmatpush3.bf16.msra.mxu0 %v4175_v0  ;;  %v772_v0 = vld [vmem:[%s4076_s5 + $0x48] sm:$0xff] }
 0x17b   :  { %2878 = vmatprep.subr.bf16.mxu0 %v4178_v8  ;;  %v756_v8 = vmul.f32 0.999, %v740_v62  ;;  %v815_v31 = vadd.f32 %v814_v2, %v812_v17 }
 0x17c   :  { %2897 = vmatpush3.bf16.msra.mxu1 %v2896_v49 }
 0x17d   :  { %2898 = vmatprep.subr.bf16.mxu1 %v4182_v6  ;;  %961 = vst [vmem:[%s4087_s16] sm:$0x1] %v815_v31 }
 0x17e   :  { %2880 = vmatpush3.bf16.msra.mxu0 %v4181_v27  ;;  %v787_v27 = vmul.f32 0.001, %v771_v42  ;;  %v742_v40 = vld [vmem:[%s4080_s9 + $0x58] sm:$0xff] }
 0x17f   :  { %2882 = vmatprep.subr.bf16.mxu0 %v2881_v61  ;;  %v729_v61 = vmul.f32 0.001, %v728_v14  ;;  %v802_v14 = vadd.f32 %v786_v12, %v754_v59 }
 0x181   :  { %v730_v54 = vadd.f32 %v729_v61, %v727_v7  ;;  %v758_v7 = vmul.f32 0.999, %v742_v40  ;;  %v773_v61 = vld [vmem:[%s4076_s5 + $0x50] sm:$0xff]  ;;  %v2899_v5 = vpack.c.bf16 %v802_v14, %v801_v3 }
 0x182   :  { %2884 = vmatpush3.bf16.msra.mxu0 %v2883_v47  ;;  %v2347_v47 = vpop.f32.mrb[5].mxu1 }
 0x183   :  { %2886 = vmatprep.subr.bf16.mxu0 %v2885_v50  ;;  %v3834_v50 = vshrl.u32 %v1488_v57, 7  ;;  %v2348_v25 = vadd.f32 %v2347_v47, %v2346_v26  ;;  %944 = vst [vmem:[%s4085_s14] sm:$0x1] %v730_v54  ;;  %v741_v26 = vld [vmem:[%s4080_s9 + $0x50] sm:$0xff]  ;;  %v774_v47 = vld [vmem:[%s4076_s5 + $0x58] sm:$0xff]  ;;  %2900 = vmatpush3.bf16.msra.mxu1 %v2899_v5 }
 0x184   :  { %v757_v57 = vmul.f32 0.999, %v741_v26  ;;  %951 = vst [vmem:[%s4086_s15 + $0x30] sm:$0xff] %v801_v3  ;;  %v790_v56 = vmul.f32 0.001, %v774_v47  ;;  %952 = vst [vmem:[%s4086_s15 + $0x38] sm:$0xff] %v802_v14  ;;  %2901 = vmatprep.subr.bf16.mxu1 %v4182_v6 }
 0x186   :  { %2888 = vmatpush3.bf16.msra.mxu0 %v2887_v60  ;;  %v1490_v60 = vsub.s32 0, %v3834_v50  ;;  %v806_v51 = vadd.f32 %v790_v56, %v758_v7 }
 0x188   :  { %v1491_v48 = vrot.slane %v730_v54, %v1490_v60  ;;  %956 = vst [vmem:[%s4086_s15 + $0x58] sm:$0xff] %v806_v51  ;;  %v1778_v26 = vrot.slane %v815_v31, %v1490_v60 }
 0x189   :  { %1768 = vmatmul.mubr.f32.vlgmr.msra.gmra.mrb[8].mxu0 %v1485_v63  ;;  %v788_v63 = vmul.f32 0.001, %v772_v0 }
 0x18a   :  { %v3842_v41 = vadd.f32 %v2348_v25, %v1491_v48  ;;  %v803_v25 = vadd.f32 %v787_v27, %v755_v4  ;;  %v789_v48 = vmul.f32 0.001, %v773_v61 }
 0x18b   :  { %v804_v54 = vadd.f32 %v788_v63, %v756_v8 }
 0x18c   :  { %953 = vst [vmem:[%s4086_s15 + $0x40] sm:$0xff] %v803_v25  ;;  %v805_v35 = vadd.f32 %v789_v48, %v757_v57 }
 0x18d   :  { %954 = vst [vmem:[%s4086_s15 + $0x48] sm:$0xff] %v804_v54  ;;  %v2902_v36 = vpack.c.bf16 %v804_v54, %v803_v25 }
 0x18e   :  { %955 = vst [vmem:[%s4086_s15 + $0x50] sm:$0xff] %v805_v35  ;;  %v2905_v39 = vpack.c.bf16 %v806_v51, %v805_v35 }
 0x18f   :  { %2903 = vmatpush3.bf16.msra.mxu1 %v2902_v36 }
 0x190   :  { %2904 = vmatprep.subr.bf16.mxu1 %v4182_v6 }
 0x193   :  { %2906 = vmatpush3.bf16.msra.mxu1 %v2905_v39 }
 0x194   :  { %2907 = vmatprep.subr.bf16.mxu1 %v4182_v6 }
 0x195   :  { %v743_v52 = vld [vmem:[%s4080_s9 + $0x60] sm:$0xff]  ;;  %v744_v58 = vld [vmem:[%s4080_s9 + $0x68] sm:$0xff]  ;;  %v745_v20 = vld [vmem:[%s4080_s9 + $0x70] sm:$0xff] }
 0x196   :  { %v759_v21 = vmul.f32 0.999, %v743_v52  ;;  %v760_v53 = vmul.f32 0.999, %v744_v58  ;;  %v746_v24 = vld [vmem:[%s4080_s9 + $0x78] sm:$0xff] }
 0x197   :  { %v761_v46 = vmul.f32 0.999, %v745_v20  ;;  %v762_v29 = vmul.f32 0.999, %v746_v24 }
 0x198   :  { %v807_v33 = vadd.f32 %v791_v43, %v759_v21  ;;  %v808_v23 = vadd.f32 %v792_v44, %v760_v53 }
 0x199   :  { %v809_v34 = vadd.f32 %v793_v15, %v761_v46  ;;  %v810_v1 = vadd.f32 %v794_v19, %v762_v29 }
 0x19a   :  { %957 = vst [vmem:[%s4086_s15 + $0x60] sm:$0xff] %v807_v33  ;;  %958 = vst [vmem:[%s4086_s15 + $0x68] sm:$0xff] %v808_v23  ;;  %v2908_v18 = vpack.c.bf16 %v808_v23, %v807_v33 }
 0x19b   :  { %959 = vst [vmem:[%s4086_s15 + $0x70] sm:$0xff] %v809_v34  ;;  %960 = vst [vmem:[%s4086_s15 + $0x78] sm:$0xff] %v810_v1  ;;  %v2911_v22 = vpack.c.bf16 %v810_v1, %v809_v34 }
 0x19c   :  { %2909 = vmatpush3.bf16.msra.mxu1 %v2908_v18 }
 0x19d   :  { %2910 = vmatprep.subr.bf16.mxu1 %v4182_v6 }
 0x1a0   :  { %2912 = vmatpush3.bf16.msra.mxu1 %v2911_v22 }
 0x1ac   :  { %v2416_v45 = vpop.f32.mrb[6].mxu1 }
 0x1ad   :  { %v2417_v28 = vpop.f32.mrb[7].mxu1 }
 0x1ae   :  { %v2418_v11 = vadd.f32 %v2417_v28, %v2416_v45 }
 0x21c   :  { %v1475_v16 = vpop.f32.mrb[4].mxu0 }
 0x21d   :  { %v1476_v59 = vadd.f32 %v2153_v13, %v1475_v16  ;;  %v2573_v6 = vpop.f32.mrb[5].mxu0 }
 0x21f   :  { %v1850_v32 = vmul.f32 %v1476_v59, %v1476_v59 }
 0x221   :  { %1851 = vadd.xlane.f32.xlu0 %v1850_v32 }
 0x23c   :  { %v2381_v62 = vpop.f32.mrb[6].mxu0 }
 0x23d   :  { %v2382_v42 = vpop.f32.mrb[7].mxu0 }
 0x23e   :  { %v2383_v0 = vadd.f32 %v2382_v42, %v2381_v62 }
 0x240   :  { %v1630_v12 = vadd.f32 %v2383_v0, %v3842_v41 }
 0x242   :  { %v1700_v4 = vadd.f32 %v2418_v11, %v1630_v12 }
 0x25c   :  { %v2451_v8 = vpop.f32.mrb[8].mxu0 }
 0x25d   :  { %v2452_v49 = vpop.f32.mrb[9].mxu0 }
 0x25e   :  { %v2453_v3 = vadd.f32 %v2452_v49, %v2451_v8 }
 0x260   :  { %v1770_v27 = vadd.f32 %v2453_v3, %v1700_v4 }
 0x262   :  { %v1773_v63 = vmax.f32 %v1770_v27, 0.0 }
 0x264   :  { %2607 = vmatmul.mubr.f32.vlgmr.msra.gmra.mrb[8].mxu1 %v1773_v63 }
 0x2ae   :  { %v1852_v61 = vpop.xlane.xlu0 %1851 }
 0x2af   :  { %v1853_v47 = vmax.f32 %v1852_v61, 1e-24 }
 0x2b1   :  { %2987 = vrsqrt.f32 %v1853_v47 }
 0x2bb   :  { %v2988_v54 = vpop.eup %2987 }
 0x2bc   :  { %v4010_v56 = vmul.f32 %v2988_v54, %v1476_v59 }
 0x337   :  { %v1846_v40 = vpop.f32.mrb[8].mxu1 }
 0x338   :  { %v1847_v14 = vadd.f32 %v1846_v40, %v1778_v26  ;;  %v2608_v57 = vpop.f32.mrb[9].mxu1 }
 0x33a   :  { %v1856_v7 = vmul.f32 %v1847_v14, %v1847_v14 }
 0x33c   :  { %1857 = vadd.xlane.f32.xlu0 %v1856_v7 }
 0x3c9   :  { %v1858_v25 = vpop.xlane.xlu0 %1857 }
 0x3ca   :  { %v1859_v41 = vmax.f32 %v1858_v25, 1e-24 }
 0x3cc   :  { %2989 = vrsqrt.f32 %v1859_v41 }
 0x3d6   :  { %v2990_v48 = vpop.eup %2989 }
 0x3d7   :  { %v1861_v5 = vmul.f32 %v2990_v48, %v1847_v14 }
 0x3d9   :  { %v1863_v35 = vmul.f32 %v1861_v5, %v4010_v56  ;;  %1862 = vst [vmem:[#allocation3] sm:$0xff] %v1861_v5 }
 0x3db   :  { %1864 = vadd.xlane.f32.xlu1 %v1863_v35 }
 0x3dc   :  { %3044 = shalt.err (!%p3041_p4)  }
 0x3dd   :  { %s3045_s22 = scalar_lea.vmem %s83_s10, 8192  ;;  %p3050_p6 = scmp.lt.s32.totalorder %s83_s10, %s83_s10 }
 0x3de   :  { %p3046_p5 = scmp.ne.s32.totalorder %s83_s10, %s3045_s22  ;;  %p3051_p7 = scmp.lt.s32.totalorder %s3045_s22, %s3045_s22 }
 0x3e0   :  { %p3052_p8 = por %p3051_p7, %p3050_p6 }
 0x3e2   :  { %p3053_p9 = pnand %p3052_p8, %p3046_p5 }
 0x3e4   :  { %3056 = shalt.err (!%p3053_p9)  }
 0x3e5   :  { %85 = dma.hbm_to_vmem [thread:$0]  %s4082_s11, 8192, %s83_s10, [#allocation4] }
 0x468   :  { %v1865_v50 = vpop.xlane.xlu1 %1864 }
 0x469   :  { %v1866_v60 = vmul.f32 14.285714, %v1865_v50 }
 0x46b   :  { %1867 = vst [vmem:[%s4083_s12] sm:$0xff] %v1866_v60 }
 0x46c   :  { %3107 = dma.done.wait [#allocation4], 8192 }
 0x46d   :  { %3108 = vsyncadd [#allocation4], 4294959104  ;;  %2503 = vmatprep.mubr.f32.mxu0 %v4010_v56  ;;  %2537 = vmatprep.mubr.f32.mxu1 %v4010_v56  ;;  %v1887_v51 = vld [vmem:[#allocation2 + $0x80] sm:$0xff]  ;;  %v1888_v36 = vld [vmem:[#allocation2 + $0x88] sm:$0xff]  ;;  %s4183_s5 = sld [smem:[#allocation41_spill]]  ;;  %s3121_s18 = smov [#allocation3]  }
 0x46e   :  { %v1919_v39 = vld [vmem:[#allocation2 + $0x180] sm:$0xff]  ;;  %v2913_v52 = vpack.c.bf16 %v1888_v36, %v1887_v51  ;;  %v1920_v58 = vld [vmem:[#allocation2 + $0x188] sm:$0xff]  ;;  %v1889_v33 = vld [vmem:[#allocation2 + $0x90] sm:$0xff]  ;;  %s2096_s4 = sshll.u32 %s3121_s18, 4  ;;  %s2097_s4 = int_to_ptr.vmem [resolvable:$true] %s2096_s4 }
 0x46f   :  { %v1871_v37 = vld [vmem:[#allocation2] sm:$0xff]  ;;  %v1872_v21 = vld [vmem:[#allocation2 + $0x8] sm:$0xff]  ;;  %v2945_v53 = vpack.c.bf16 %v1920_v58, %v1919_v39  ;;  %v1890_v20 = vld [vmem:[#allocation2 + $0x98] sm:$0xff]  ;;  %s3057_s15 = scalar_lea.vmem %s2097_s4, 32  ;;  %s3061_s25 = scalar_lea.vmem %s2097_s4, 128 }
 0x470   :  { %v2915_v30 = vpack.c.bf16 %v1872_v21, %v1871_v37  ;;  %v1903_v43 = vld [vmem:[#allocation2 + $0x100] sm:$0xff]  ;;  %v1904_v44 = vld [vmem:[#allocation2 + $0x108] sm:$0xff]  ;;  %2914 = vmatprep.subr.bf16.mxu0 %v2913_v52  ;;  %v1921_v24 = vld [vmem:[#allocation2 + $0x190] sm:$0xff]  ;;  %v2917_v46 = vpack.c.bf16 %v1890_v20, %v1889_v33  ;;  %p3058_p10 = scmp.ne.s32.totalorder %s2097_s4, %s3057_s15  ;;  %p3062_p11 = scmp.lt.s32.totalorder %s2097_s4, %s2097_s4 }
 0x471   :  { %v2947_v23 = vpack.c.bf16 %v1904_v44, %v1903_v43  ;;  %v1922_v10 = vld [vmem:[#allocation2 + $0x198] sm:$0xff]  ;;  %2946 = vmatprep.subr.bf16.mxu1 %v2945_v53  ;;  %v1873_v38 = vld [vmem:[#allocation2 + $0x10] sm:$0xff]  ;;  %v1891_v34 = vld [vmem:[#allocation2 + $0xa0] sm:$0xff]  ;;  %p3063_p12 = scmp.lt.s32.totalorder %s3061_s25, %s3057_s15 }
 0x472   :  { %2916 = vmatpush3.bf16.xpose.msra.mxu0 %v2915_v30  ;;  %v2949_v29 = vpack.c.bf16 %v1922_v10, %v1921_v24  ;;  %v1874_v18 = vld [vmem:[#allocation2 + $0x18] sm:$0xff]  ;;  %v1905_v15 = vld [vmem:[#allocation2 + $0x110] sm:$0xff]  ;;  %v1892_v1 = vld [vmem:[#allocation2 + $0xa8] sm:$0xff] }
 0x473   :  { %2948 = vmatpush3.bf16.xpose.msra.mxu1 %v2947_v23  ;;  %2918 = vmatprep.subr.bf16.mxu0 %v2917_v46  ;;  %v1906_v19 = vld [vmem:[#allocation2 + $0x118] sm:$0xff]  ;;  %v1923_v22 = vld [vmem:[#allocation2 + $0x1a0] sm:$0xff]  ;;  %v1924_v45 = vld [vmem:[#allocation2 + $0x1a8] sm:$0xff]  ;;  %v2919_v28 = vpack.c.bf16 %v1874_v18, %v1873_v38  ;;  %v2921_v13 = vpack.c.bf16 %v1892_v1, %v1891_v34  ;;  %s2154_s2 = sshll.u32 %s4183_s5, 4  ;;  %p3064_p13 = por %p3063_p12, %p3062_p11 }
 0x474   :  { %2950 = vmatprep.subr.bf16.mxu1 %v2949_v29  ;;  %v2951_v11 = vpack.c.bf16 %v1906_v19, %v1905_v15  ;;  %v2953_v16 = vpack.c.bf16 %v1924_v45, %v1923_v22  ;;  %v1875_v59 = vld [vmem:[#allocation2 + $0x20] sm:$0xff]  ;;  %v1876_v6 = vld [vmem:[#allocation2 + $0x28] sm:$0xff]  ;;  %v1893_v9 = vld [vmem:[#allocation2 + $0xb0] sm:$0xff]  ;;  %s2087_s3 = scalar_lea.hbm %s4088_s17, %s2154_s2 }
 0x475   :  { %v1907_v32 = vld [vmem:[#allocation2 + $0x120] sm:$0xff]  ;;  %v1908_v55 = vld [vmem:[#allocation2 + $0x128] sm:$0xff]  ;;  %v1894_v17 = vld [vmem:[#allocation2 + $0xb8] sm:$0xff]  ;;  %v2923_v62 = vpack.c.bf16 %v1876_v6, %v1875_v59  ;;  %p3065_p0 = pnand %p3064_p13, %p3058_p10 }
 0x476   :  { %v1925_v2 = vld [vmem:[#allocation2 + $0x1b0] sm:$0xff]  ;;  %v1926_v31 = vld [vmem:[#allocation2 + $0x1b8] sm:$0xff]  ;;  %v2955_v42 = vpack.c.bf16 %v1908_v55, %v1907_v32  ;;  %v2925_v0 = vpack.c.bf16 %v1894_v17, %v1893_v9  ;;  %v1895_v27 = vld [vmem:[#allocation2 + $0xc0] sm:$0xff] }
 0x477   :  { %v2957_v12 = vpack.c.bf16 %v1926_v31, %v1925_v2  ;;  %v1877_v4 = vld [vmem:[#allocation2 + $0x30] sm:$0xff]  ;;  %v1878_v8 = vld [vmem:[#allocation2 + $0x38] sm:$0xff]  ;;  %v1896_v63 = vld [vmem:[#allocation2 + $0xc8] sm:$0xff] }
 0x478   :  { %v1909_v49 = vld [vmem:[#allocation2 + $0x130] sm:$0xff]  ;;  %v1910_v3 = vld [vmem:[#allocation2 + $0x138] sm:$0xff]  ;;  %v1927_v26 = vld [vmem:[#allocation2 + $0x1c0] sm:$0xff]  ;;  %v2927_v14 = vpack.c.bf16 %v1878_v8, %v1877_v4  ;;  %v2929_v7 = vpack.c.bf16 %v1896_v63, %v1895_v27 }
 0x479   :  { %v1928_v40 = vld [vmem:[#allocation2 + $0x1c8] sm:$0xff]  ;;  %v2959_v57 = vpack.c.bf16 %v1910_v3, %v1909_v49  ;;  %v1879_v47 = vld [vmem:[#allocation2 + $0x40] sm:$0xff]  ;;  %v1897_v48 = vld [vmem:[#allocation2 + $0xd0] sm:$0xff] }
 0x47a   :  { %2920 = vmatpush3.bf16.xpose.msra.mxu0 %v2919_v28  ;;  %v2961_v61 = vpack.c.bf16 %v1928_v40, %v1927_v26  ;;  %v1880_v25 = vld [vmem:[#allocation2 + $0x48] sm:$0xff]  ;;  %v1911_v41 = vld [vmem:[#allocation2 + $0x140] sm:$0xff]  ;;  %v1898_v5 = vld [vmem:[#allocation2 + $0xd8] sm:$0xff] }
 0x47b   :  { %2952 = vmatpush3.bf16.xpose.msra.mxu1 %v2951_v11  ;;  %2922 = vmatprep.subr.bf16.mxu0 %v2921_v13  ;;  %v1912_v54 = vld [vmem:[#allocation2 + $0x148] sm:$0xff]  ;;  %v1929_v35 = vld [vmem:[#allocation2 + $0x1d0] sm:$0xff]  ;;  %v1930_v50 = vld [vmem:[#allocation2 + $0x1d8] sm:$0xff]  ;;  %v2931_v60 = vpack.c.bf16 %v1880_v25, %v1879_v47  ;;  %v2933_v36 = vpack.c.bf16 %v1898_v5, %v1897_v48 }
 0x47c   :  { %2954 = vmatprep.subr.bf16.mxu1 %v2953_v16  ;;  %v2963_v51 = vpack.c.bf16 %v1912_v54, %v1911_v41  ;;  %v2965_v39 = vpack.c.bf16 %v1930_v50, %v1929_v35  ;;  %v1881_v52 = vld [vmem:[#allocation2 + $0x50] sm:$0xff]  ;;  %v1882_v58 = vld [vmem:[#allocation2 + $0x58] sm:$0xff]  ;;  %v1899_v53 = vld [vmem:[#allocation2 + $0xe0] sm:$0xff] }
 0x47d   :  { %v1913_v37 = vld [vmem:[#allocation2 + $0x150] sm:$0xff]  ;;  %v1914_v21 = vld [vmem:[#allocation2 + $0x158] sm:$0xff]  ;;  %v1900_v30 = vld [vmem:[#allocation2 + $0xe8] sm:$0xff]  ;;  %v2935_v33 = vpack.c.bf16 %v1882_v58, %v1881_v52 }
 0x47e   :  { %v1931_v43 = vld [vmem:[#allocation2 + $0x1e0] sm:$0xff]  ;;  %v1932_v44 = vld [vmem:[#allocation2 + $0x1e8] sm:$0xff]  ;;  %v2967_v23 = vpack.c.bf16 %v1914_v21, %v1913_v37  ;;  %v2937_v20 = vpack.c.bf16 %v1900_v30, %v1899_v53  ;;  %v1901_v18 = vld [vmem:[#allocation2 + $0xf0] sm:$0xff] }
 0x47f   :  { %v2969_v24 = vpack.c.bf16 %v1932_v44, %v1931_v43  ;;  %v1883_v10 = vld [vmem:[#allocation2 + $0x60] sm:$0xff]  ;;  %v1884_v46 = vld [vmem:[#allocation2 + $0x68] sm:$0xff]  ;;  %v1902_v15 = vld [vmem:[#allocation2 + $0xf8] sm:$0xff] }
 0x480   :  { %v1915_v29 = vld [vmem:[#allocation2 + $0x160] sm:$0xff]  ;;  %v1916_v38 = vld [vmem:[#allocation2 + $0x168] sm:$0xff]  ;;  %v1933_v19 = vld [vmem:[#allocation2 + $0x1f0] sm:$0xff]  ;;  %v2939_v1 = vpack.c.bf16 %v1884_v46, %v1883_v10  ;;  %v2941_v45 = vpack.c.bf16 %v1902_v15, %v1901_v18 }
 0x481   :  { %v1934_v34 = vld [vmem:[#allocation2 + $0x1f8] sm:$0xff]  ;;  %v2971_v22 = vpack.c.bf16 %v1916_v38, %v1915_v29  ;;  %v1885_v11 = vld [vmem:[#allocation2 + $0x70] sm:$0xff] }
 0x482   :  { %2924 = vmatpush3.bf16.xpose.msra.mxu0 %v2923_v62  ;;  %v2973_v28 = vpack.c.bf16 %v1934_v34, %v1933_v19  ;;  %v1886_v13 = vld [vmem:[#allocation2 + $0x78] sm:$0xff]  ;;  %v1917_v16 = vld [vmem:[#allocation2 + $0x170] sm:$0xff] }
 0x483   :  { %2956 = vmatpush3.bf16.xpose.msra.mxu1 %v2955_v42  ;;  %2926 = vmatprep.subr.bf16.mxu0 %v2925_v0  ;;  %v1918_v59 = vld [vmem:[#allocation2 + $0x178] sm:$0xff]  ;;  %v2943_v6 = vpack.c.bf16 %v1886_v13, %v1885_v11 }
 0x484   :  { %2958 = vmatprep.subr.bf16.mxu1 %v2957_v12  ;;  %v2975_v32 = vpack.c.bf16 %v1918_v59, %v1917_v16 }
 0x48a   :  { %2928 = vmatpush3.bf16.xpose.msra.mxu0 %v2927_v14 }
 0x48b   :  { %2960 = vmatpush3.bf16.xpose.msra.mxu1 %v2959_v57  ;;  %2930 = vmatprep.subr.bf16.mxu0 %v2929_v7 }
 0x48c   :  { %2962 = vmatprep.subr.bf16.mxu1 %v2961_v61 }
 0x492   :  { %2932 = vmatpush3.bf16.xpose.msra.mxu0 %v2931_v60 }
 0x493   :  { %2964 = vmatpush3.bf16.xpose.msra.mxu1 %v2963_v51  ;;  %2934 = vmatprep.subr.bf16.mxu0 %v2933_v36 }
 0x494   :  { %2966 = vmatprep.subr.bf16.mxu1 %v2965_v39 }
 0x49a   :  { %2936 = vmatpush3.bf16.xpose.msra.mxu0 %v2935_v33 }
 0x49b   :  { %2968 = vmatpush3.bf16.xpose.msra.mxu1 %v2967_v23  ;;  %2938 = vmatprep.subr.bf16.mxu0 %v2937_v20 }
 0x49c   :  { %2970 = vmatprep.subr.bf16.mxu1 %v2969_v24 }
 0x4a2   :  { %2940 = vmatpush3.bf16.xpose.msra.mxu0 %v2939_v1 }
 0x4a3   :  { %2972 = vmatpush3.bf16.xpose.msra.mxu1 %v2971_v22  ;;  %2942 = vmatprep.subr.bf16.mxu0 %v2941_v45 }
 0x4a4   :  { %2974 = vmatprep.subr.bf16.mxu1 %v2973_v28 }
 0x4aa   :  { %2944 = vmatpush3.bf16.xpose.msra.mxu0 %v2943_v6 }
 0x4ab   :  { %2976 = vmatpush3.bf16.xpose.msra.mxu1 %v2975_v32 }
 0x4b1   :  { %2504 = vmatmul.mubr.f32.vlgmr.msra.gmra.mrb[10].mxu0 %v4010_v56 }
 0x4b2   :  { %2538 = vmatmul.mubr.f32.vlgmr.msra.gmra.mrb[10].mxu1 %v4010_v56 }
 0x4b3   :  { %3068 = shalt.err (!%p3065_p0)  }
 0x4b4   :  { %s3069_s7 = scalar_lea.hbm %s2087_s3, 32  ;;  %s3071_s16 = scalar_lea.hbm %s4088_s17, 8192 }
 0x4b5   :  { %p3070_p1 = scmp.ne.s32.totalorder %s2087_s3, %s3069_s7  ;;  %p3072_p2 = scmp.lt.u32.totalorder %s2087_s3, %s4088_s17 }
 0x4b6   :  { %p3073_p3 = scmp.lt.u32.totalorder %s3071_s16, %s3069_s7  ;;  %p3075_p5 = scmp.lt.u32.totalorder %s3069_s7, %s2087_s3 }
 0x4b8   :  { %p3074_p4 = por %p3073_p3, %p3072_p2 }
 0x4ba   :  { %p3076_p6 = por %p3075_p5, %p3074_p4 }
 0x4bc   :  { %p3077_p7 = pnand %p3076_p6, %p3070_p1 }
 0x4be   :  { %3080 = shalt.err (!%p3077_p7)  }
 0x4bf   :  { %2099 = dma.vmem_to_hbm [thread:$0]  %s2097_s4, 32, %s2087_s3, [#allocation4 + $0x1] }
 0x584   :  { %v2001_v56 = vpop.f32.mrb[10].mxu0 }
 0x585   :  { %v2077_v55 = vmul.f32 14.285714, %v2001_v56  ;;  %v2072_v9 = vpop.f32.mrb[10].mxu1  ;;  %v2003_v17 = vpop.f32.mrb[11].mxu0 }
 0x586   :  { %v2079_v2 = vmul.f32 14.285714, %v2072_v9  ;;  %v2078_v31 = vmul.f32 14.285714, %v2003_v17  ;;  %v2074_v62 = vpop.f32.mrb[11].mxu1 }
 0x587   :  { %2081 = vst [vmem:[%s4083_s12 + $0x8] sm:$0xff] %v2077_v55  ;;  %v2080_v42 = vmul.f32 14.285714, %v2074_v62 }
 0x588   :  { %2083 = vst [vmem:[%s4083_s12 + $0x18] sm:$0xff] %v2079_v2  ;;  %2082 = vst [vmem:[%s4083_s12 + $0x10] sm:$0xff] %v2078_v31 }
 0x589   :  { %2084 = vst [vmem:[%s4083_s12 + $0x20] sm:$0xff] %v2080_v42 }
 0x58a   :  { %3109 = dma.done.wait [#allocation4 + $0x1], 32 }
 0x58b   :  { %3110 = vsyncadd [#allocation4 + $0x1], 4294967264  ;;  %s3122_s0 = smov [#allocation11]  }
 0x58c   :  { %s2110_s9 = sshll.u32 %s3122_s0, 4  ;;  %s2111_s9 = int_to_ptr.vmem [resolvable:$true] %s2110_s9 }
 0x58d   :  { %s3081_s11 = scalar_lea.vmem %s2111_s9, 16384  ;;  %p3086_p9 = scmp.lt.s32.totalorder %s2111_s9, %s2111_s9 }
 0x58e   :  { %p3082_p8 = scmp.ne.s32.totalorder %s2111_s9, %s3081_s11  ;;  %p3087_p10 = scmp.lt.s32.totalorder %s3081_s11, %s3081_s11 }
 0x590   :  { %p3088_p11 = por %p3087_p10, %p3086_p9 }
 0x592   :  { %p3089_p12 = pnand %p3088_p11, %p3082_p8 }
 0x594   :  { %3092 = shalt.err (!%p3089_p12)
}
 0x595   :  { %s3093_s2 = scalar_lea.hbm %s4084_s13, 16384 }
 0x596   :  { %p3094_p13 = scmp.ne.s32.totalorder %s4084_s13, %s3093_s2  ;;  %p3097_p0 = scmp.lt.u32.totalorder %s3093_s2, %s4084_s13 }
 0x598   :  { %p3099_p1 = pnand %p3097_p0, %p3094_p13 }
 0x59a   :  { %3102 = shalt.err (!%p3099_p1)
}
 0x59b   :  { %2116 = dma.vmem_to_hbm [thread:$0]  %s2111_s9, 16384, %s4084_s13, [#allocation8], %s3114_s1, %s3114_s1, %s3115_s20  }
 0x59c   :  { %3111 = dma.done.wait [#allocation8], 16384  }
 0x59d   :  { %3112 = vsyncadd [#allocation8], 4294950912 }
 0x59e   :  { %2134 = vsyncpa [#allocation7], 1 }
 0x59f   :  { %2135 = vsyncpa [#allocation10], 1 }
 0x5a0   :  { %2136 = vsyncpa [#allocation8], 1 }
 0x5a1   :  { %2137 = vsyncmov [#allocation4] }
 0x5a4   :  { %s2138_s15 = vpop.sfrf %2137 }
 0x5a5   :  { %p2155_p2 = scmp.ne.s32.totalorder %s2138_s15, 0 }
 0x5a7   :  { %2142 = shalt.err (%p2155_p2)  }
 0x5a8   :  { %2144 = vsyncmov [#allocation4 + $0x1] }
 0x5ab   :  { %s2145_s25 = vpop.sfrf %2144 }
 0x5ac   :  { %p2156_p3 = scmp.ne.s32.totalorder %s2145_s25, 0 }
 0x5ae   :  { %2149 = shalt.err (%p2156_p3)  }

</bundles_post_ra>
